<compile_context>
chip_gen: v6e
topology: v6e:2x2x1
jax: 0.10.0
libtpu: 0.0.40
codegen_flags: <defaults>
</compile_context>

<pallas_src>
import jax
import jax.numpy as jnp
import numpy as np
from jax.experimental import pallas as pl
from jax.experimental.pallas import tpu as pltpu

C = 128                # fixed by the module
LEAKY_SLOPE = 0.01     # InPlaceABN default activation_param
BN_EPS = 1e-5
HALO = 3               # halo rows per side: conv1(1) + conv2(1) + upsample(1)


def _mc_kernel(x_ref, dw1_ref, pw1_ref, t1_ref, dw2_ref, pw2_ref, t2_ref,
               o_ref, scr):
    # x_ref : (1, 1, TH+6, W, C) f32  -- rows [r0-3, r0+TH+3), zero rows at image edges
    # o_ref : (1, 4, TH, W, C)  bf16  -- 4 parity planes of the 2x bilinear upsample
    # scr   : (TH+4, W, C)      f32   -- row-boundary fixup buffer (no full zeroing)
    th = o_ref.shape[2]
    w = o_ref.shape[3]
    c = o_ref.shape[4]

    ti = pl.program_id(1)
    is_first = ti == 0
    is_last = ti == pl.num_programs(1) - 1

    # column-index edge masks, broadcast over the leading (row) dim
    col = jax.lax.broadcasted_iota(jnp.int32, (w, c), 0)
    first_col = col == 0
    last_col = col == w - 1

    def neighbor_cols(v):
        # v: (Hin, W, C).  Column neighbours via a sublane roll on the (Hin*W, C)
        # flattening (XLU, no misaligned loads).  The only positions whose roll
        # source crosses a row boundary are w==0 / w==W-1, which every caller
        # masks (zero padding for the convs, clamp-to-edge for the upsample).
        hin = v.shape[0]
        flat = v.reshape(hin * w, c)
        left = pltpu.roll(flat, 1, axis=0).reshape(hin, w, c)              # v[:, j-1]
        right = pltpu.roll(flat, hin * w - 1, axis=0).reshape(hin, w, c)   # v[:, j+1]
        return left, right

    def depthwise3x3(xt, wt):
        # xt: (Hin, W, C) f32 (H halo provided by caller); zero padding in W via
        # roll + edge mask.  Returns (Hin-2, W, C) f32.
        hin = xt.shape[0]
        ho = hin - 2
        xl, xr = neighbor_cols(xt)
        xl = jnp.where(first_col, 0.0, xl)
        xr = jnp.where(last_col, 0.0, xr)
        acc = None
        for dh in range(3):
            term = (xl[dh:dh + ho] * wt[dh:dh + 1, 0:1]
                    + xt[dh:dh + ho] * wt[dh:dh + 1, 1:2]
                    + xr[dh:dh + ho] * wt[dh:dh + 1, 2:3])
            acc = term if acc is None else acc + term
        return acc

    def pointwise_abn(acc, pw_ref, t_ref):
        # pointwise 1x1 conv (MXU, bf16 operands / f32 accumulate) with conv biases
        # and the BN affine folded into pw_ref / t_ref, then LeakyReLU(0.01).
        ho = acc.shape[0]
        z = jnp.dot(acc.reshape(ho * w, c).astype(pw_ref.dtype), pw_ref[...],
                    preferred_element_type=jnp.float32)
        z = z + t_ref[...]
        z = jnp.maximum(z, LEAKY_SLOPE * z)      # LeakyReLU (slope < 1)
        return z.reshape(ho, w, c)

    xt = x_ref[0, 0].astype(jnp.float32)                                   # (TH+6, W, C)
    a1 = pointwise_abn(depthwise3x3(xt, dw1_ref[...]), pw1_ref, t1_ref)    # (TH+4, W, C)

    # conv2's zero padding in H at the *image* boundary: halo rows of a1 that fall
    # outside the image must be zero (interior tile halos keep real neighbour rows).
    scr[...] = a1

    @pl.when(is_first)
    def _():
        scr[0:2] = jnp.zeros((2, w, c), jnp.float32)

    @pl.when(is_last)
    def _():
        scr[th + 2:th + 4] = jnp.zeros((2, w, c), jnp.float32)

    u = pointwise_abn(depthwise3x3(scr[...], dw2_ref[...]), pw2_ref, t2_ref)  # (TH+2, W, C)

    # bilinear 2x upsample (align_corners=False):
    #   out[2i]   = 0.75*u[i] + 0.25*u[i-1]   (clamp at image row 0)
    #   out[2i+1] = 0.75*u[i] + 0.25*u[i+1]   (clamp at image row H-1)
    scr[0:th + 2] = u

    @pl.when(is_first)
    def _():
        scr[0:1] = scr[1:2]                    # clamp virtual row -1 -> row 0

    @pl.when(is_last)
    def _():
        scr[th + 1:th + 2] = scr[th:th + 1]    # clamp virtual row H -> row H-1

    center = scr[1:th + 1]
    r_prev = scr[0:th]
    r_next = scr[2:th + 2]
    rows = (0.75 * center + 0.25 * r_prev, 0.75 * center + 0.25 * r_next)
    for p in range(2):
        r = rows[p]
        cl, cr = neighbor_cols(r)
        cl = jnp.where(first_col, r, cl)       # clamp col 0
        cr = jnp.where(last_col, r, cr)        # clamp col W-1
        o_ref[0, 2 * p + 0] = (0.75 * r + 0.25 * cl).astype(o_ref.dtype)
        o_ref[0, 2 * p + 1] = (0.75 * r + 0.25 * cr).astype(o_ref.dtype)


def _pick_row_tile(h):
    for cand in range(min(h, 64), 0, -1):
        if h % cand == 0:
            return cand
    return h


def fold_params(params):
    """Fold conv biases + eval-mode BN affine into (dw_w, pw_w*scale bf16, shift)."""
    def fold(p):
        s = p["abn_scale"]                       # (1, C)
        w_scaled = p["pw_w"] * s                 # scale output channels
        t = p["dw_b"] @ w_scaled + p["pw_b"] * s + p["abn_shift"]
        return (p["dw_w"].astype(jnp.float32),
                w_scaled.astype(jnp.bfloat16),   # MXU runs bf16 natively
                t.astype(jnp.float32))
    return fold(params["1"]) + fold(params["2"])


def mc_forward(x_nchw, params, row_tile=None, out_dtype=jnp.bfloat16):
    x = jnp.transpose(x_nchw, (0, 2, 3, 1)).astype(jnp.float32)   # NCHW -> NHWC
    n, h, w, c = x.shape
    th = row_tile if row_tile is not None else _pick_row_tile(h)
    assert h % th == 0, "row_tile must divide H"
    nt = h // th

    # Overlapping row tiles with a 3-row halo; the zero rows at the image top/bottom
    # provide conv1's H zero padding for free.
    # TODO(synk): an element-indexed (halo) BlockSpec on the raw input could avoid
    # materializing the overlapped tiles on the host.
    x_pad = jnp.pad(x, ((0, 0), (HALO, HALO), (0, 0), (0, 0)))
    x_tiles = jnp.stack(
        [x_pad[:, i * th:i * th + th + 2 * HALO] for i in range(nt)], axis=1)

    dw1, pw1, t1, dw2, pw2, t2 = fold_params(params)

    def const_spec(shape):
        nd = len(shape)
        return pl.BlockSpec(shape, lambda i, j, _nd=nd: (0,) * _nd)

    in_specs = [
        pl.BlockSpec((1, 1, th + 2 * HALO, w, c), lambda i, j: (i, j, 0, 0, 0)),
        const_spec(dw1.shape), const_spec(pw1.shape), const_spec(t1.shape),
        const_spec(dw2.shape), const_spec(pw2.shape), const_spec(t2.shape),
    ]

    # advisory cost estimate (pointwise matmuls dominate)
    m_rows = (th + 4) * w + (th + 2) * w
    flops = n * nt * (2 * c * c * m_rows + 2 * 9 * c * m_rows + 16 * th * w * c)
    bytes_accessed = (x_tiles.size * 4 + n * 4 * h * w * c * 2
                      + 2 * (dw1.size * 4 + pw1.size * 2 + t1.size * 4))

    y = pl.pallas_call(
        _mc_kernel,
        out_shape=jax.ShapeDtypeStruct((n, 4, h, w, c), out_dtype),
        grid=(n, nt),
        in_specs=in_specs,
        out_specs=pl.BlockSpec((1, 4, th, w, c), lambda i, j: (i, 0, j, 0, 0)),
        scratch_shapes=[pltpu.VMEM((th + 4, w, c), jnp.float32)],
        compiler_params=pltpu.CompilerParams(
            dimension_semantics=("parallel", "parallel"),
            vmem_limit_bytes=32 * 1024 * 1024),
        cost_estimate=pl.CostEstimate(flops=int(flops), transcendentals=0,
                                      bytes_accessed=int(bytes_accessed)),
    )(x_tiles, dw1, pw1, t1, dw2, pw2, t2)

    # Interleave the 4 parity planes with a single fused transpose:
    # (N,4,H,W,C) -> (N,2,2,H,W,C) -> (N,C,H,2,W,2) -> (N,C,2H,2W)
    y = y.reshape(n, 2, 2, h, w, c)
    y = jnp.transpose(y, (0, 5, 3, 1, 4, 2)).reshape(n, c, 2 * h, 2 * w)
    return y


def make_params(key):
    def layer(k0):
        k = jax.random.split(k0, 8)
        dw_w = 0.2 * jax.random.normal(k[0], (3, 3, C), jnp.float32)
        dw_b = 0.05 * jax.random.normal(k[1], (1, C), jnp.float32)
        pw_w = (1.0 / jnp.sqrt(C)) * jax.random.normal(k[2], (C, C), jnp.float32)
        pw_b = 0.05 * jax.random.normal(k[3], (1, C), jnp.float32)
        gamma = 1.0 + 0.1 * jax.random.normal(k[4], (1, C), jnp.float32)
        beta = 0.1 * jax.random.normal(k[5], (1, C), jnp.float32)
        mean = 0.1 * jax.random.normal(k[6], (1, C), jnp.float32)
        var = jax.random.uniform(k[7], (1, C), jnp.float32, 0.5, 1.5)
        scale = gamma / jnp.sqrt(var + BN_EPS)
        shift = beta - mean * scale
        return dict(dw_w=dw_w, dw_b=dw_b, pw_w=pw_w, pw_b=pw_b,
                    abn_scale=scale, abn_shift=shift)
    k1, k2 = jax.random.split(key)
    return {"1": layer(k1), "2": layer(k2)}


def reference_forward(x_nchw, params):
    """Pure-JAX reference (lax.conv + explicit bilinear) for validation."""
    h = jnp.transpose(x_nchw, (0, 2, 3, 1)).astype(jnp.float32)

    def layer(h, p):
        w4 = p["dw_w"].reshape(3, 3, 1, C)
        h = jax.lax.conv_general_dilated(
            h, w4, (1, 1), ((1, 1), (1, 1)),
            dimension_numbers=("NHWC", "HWIO", "NHWC"),
            feature_group_count=C) + p["dw_b"][0]
        h = jnp.einsum("nhwc,cd->nhwd", h, p["pw_w"]) + p["pw_b"][0]
        h = h * p["abn_scale"][0] + p["abn_shift"][0]
        return jnp.where(h >= 0, h, LEAKY_SLOPE * h)

    h = layer(h, params["1"])
    h = layer(h, params["2"])

    N, H, W, Cc = h.shape

    def idx(n_in):
        src = (jnp.arange(2 * n_in, dtype=jnp.float32) + 0.5) / 2.0 - 0.5
        src = jnp.maximum(src, 0.0)
        i0 = jnp.floor(src).astype(jnp.int32)
        i1 = jnp.minimum(i0 + 1, n_in - 1)
        f = src - i0.astype(jnp.float32)
        return i0, i1, f

    h0, h1, fh = idx(H)
    w0, w1, fw = idx(W)
    t = h[:, h0] * (1.0 - fh)[None, :, None, None] + h[:, h1] * fh[None, :, None, None]
    o = t[:, :, w0] * (1.0 - fw)[None, None, :, None] + t[:, :, w1] * fw[None, None, :, None]
    return jnp.transpose(o, (0, 3, 1, 2))


if __name__ == "__main__":
    key = jax.random.PRNGKey(0)
    kx, kp = jax.random.split(key)
    x = jax.random.normal(kx, (2, C, 16, 16), jnp.float32)   # NCHW, like PyTorch
    params = make_params(kp)

    fwd = jax.jit(lambda xx: mc_forward(xx, params, row_tile=8))  # 2 row tiles: exercises halo
    out = jax.block_until_ready(fwd(x))
    assert out.shape == (2, C, 32, 32), out.shape

    ref = jax.block_until_ready(reference_forward(x, params))
    np.testing.assert_allclose(np.asarray(out.astype(jnp.float32)), np.asarray(ref),
                               rtol=5e-2, atol=5e-2)

    print("KERNEL_OK")
</pallas_src>

<mosaic_0001>
module attributes {stable_mosaic.version = 11 : i64} {
  func.func @_mc_kernel(%arg0: i32, %arg1: i32, %arg2: memref<1x1x14x16x128xf32, #tpu.memory_space<vmem>>, %arg3: memref<3x3x128xf32, #tpu.memory_space<vmem>>, %arg4: memref<128x128xbf16, #tpu.memory_space<vmem>>, %arg5: memref<1x128xf32, #tpu.memory_space<vmem>>, %arg6: memref<3x3x128xf32, #tpu.memory_space<vmem>>, %arg7: memref<128x128xbf16, #tpu.memory_space<vmem>>, %arg8: memref<1x128xf32, #tpu.memory_space<vmem>>, %arg9: memref<1x4x8x16x128xbf16, #tpu.memory_space<vmem>>, %arg10: memref<12x16x128xf32, #tpu.memory_space<vmem>>) attributes {dimension_semantics = [#tpu.dimension_semantics<parallel>, #tpu.dimension_semantics<parallel>], iteration_bounds = array<i64: 2, 2>, scalar_prefetch = 0 : i64, scratch_operands = 1 : i64, tpu.core_type = #tpu.core_type<tc>, window_params = [{transform_indices = @transform_0, window_bounds = array<i64: 1, 1, 14, 16, 128>}, {pipeline_mode = #tpu.pipeline_mode<synchronous>, transform_indices = @transform_1, window_bounds = array<i64: 3, 3, 128>}, {pipeline_mode = #tpu.pipeline_mode<synchronous>, transform_indices = @transform_2, window_bounds = array<i64: 128, 128>}, {pipeline_mode = #tpu.pipeline_mode<synchronous>, transform_indices = @transform_3, window_bounds = array<i64: 1, 128>}, {pipeline_mode = #tpu.pipeline_mode<synchronous>, transform_indices = @transform_4, window_bounds = array<i64: 3, 3, 128>}, {pipeline_mode = #tpu.pipeline_mode<synchronous>, transform_indices = @transform_5, window_bounds = array<i64: 128, 128>}, {pipeline_mode = #tpu.pipeline_mode<synchronous>, transform_indices = @transform_6, window_bounds = array<i64: 1, 128>}, {transform_indices = @transform_7, window_bounds = array<i64: 1, 4, 8, 16, 128>}]} {
    %c0_i32 = arith.constant 0 : i32
    %0 = arith.cmpi eq, %arg1, %c0_i32 : i32
    %c1_i32 = arith.constant 1 : i32
    %1 = arith.cmpi eq, %arg1, %c1_i32 : i32
    %2 = tpu.iota {dimensions = array<i32: 0>} : vector<16x128xi32>
    %c0_i32_0 = arith.constant 0 : i32
    %3 = vector.broadcast %c0_i32_0 : i32 to vector<16x128xi32>
    %4 = arith.cmpi eq, %2, %3 : vector<16x128xi32>
    %c15_i32 = arith.constant 15 : i32
    %5 = vector.broadcast %c15_i32 : i32 to vector<16x128xi32>
    %6 = arith.cmpi eq, %2, %5 : vector<16x128xi32>
    %c0 = arith.constant 0 : index
    %c0_1 = arith.constant 0 : index
    %c0_2 = arith.constant 0 : index
    %c0_3 = arith.constant 0 : index
    %c0_4 = arith.constant 0 : index
    %7 = vector.load %arg2[%c0, %c0_1, %c0_2, %c0_3, %c0_4] : memref<1x1x14x16x128xf32, #tpu.memory_space<vmem>>, vector<1x1x14x16x128xf32>
    %8 = vector.shape_cast %7 : vector<1x1x14x16x128xf32> to vector<14x16x128xf32>
    %c0_5 = arith.constant 0 : index
    %c0_6 = arith.constant 0 : index
    %c0_7 = arith.constant 0 : index
    %9 = vector.load %arg3[%c0_5, %c0_6, %c0_7] : memref<3x3x128xf32, #tpu.memory_space<vmem>>, vector<3x3x128xf32>
    %10 = vector.shape_cast %8 : vector<14x16x128xf32> to vector<224x128xf32>
    %c1_i32_8 = arith.constant 1 : i32
    %11 = tpu.dynamic_rotate %10 by %c1_i32_8 dim 0 : vector<224x128xf32>, i32 -> vector<224x128xf32>
    %12 = vector.shape_cast %11 : vector<224x128xf32> to vector<14x16x128xf32>
    %c223_i32 = arith.constant 223 : i32
    %13 = tpu.dynamic_rotate %10 by %c223_i32 dim 0 : vector<224x128xf32>, i32 -> vector<224x128xf32>
    %14 = vector.shape_cast %13 : vector<224x128xf32> to vector<14x16x128xf32>
    %cst = arith.constant 0.000000e+00 : f32
    %15 = vector.shape_cast %4 : vector<16x128xi1> to vector<1x16x128xi1>
    %16 = vector.broadcast %15 : vector<1x16x128xi1> to vector<14x16x128xi1>
    %17 = vector.broadcast %cst : f32 to vector<14x16x128xf32>
    %18 = arith.select %16, %17, %12 : vector<14x16x128xi1>, vector<14x16x128xf32>
    %cst_9 = arith.constant 0.000000e+00 : f32
    %19 = vector.shape_cast %6 : vector<16x128xi1> to vector<1x16x128xi1>
    %20 = vector.broadcast %19 : vector<1x16x128xi1> to vector<14x16x128xi1>
    %21 = vector.broadcast %cst_9 : f32 to vector<14x16x128xf32>
    %22 = arith.select %20, %21, %14 : vector<14x16x128xi1>, vector<14x16x128xf32>
    %23 = vector.extract_strided_slice %18 {offsets = [0, 0, 0], sizes = [12, 16, 128], strides = [1, 1, 1]} : vector<14x16x128xf32> to vector<12x16x128xf32>
    %24 = vector.extract_strided_slice %9 {offsets = [0, 0, 0], sizes = [1, 1, 128], strides = [1, 1, 1]} : vector<3x3x128xf32> to vector<1x1x128xf32>
    %25 = vector.broadcast %24 : vector<1x1x128xf32> to vector<12x16x128xf32>
    %26 = arith.mulf %23, %25 : vector<12x16x128xf32>
    %27 = vector.extract_strided_slice %8 {offsets = [0, 0, 0], sizes = [12, 16, 128], strides = [1, 1, 1]} : vector<14x16x128xf32> to vector<12x16x128xf32>
    %28 = vector.extract_strided_slice %9 {offsets = [0, 1, 0], sizes = [1, 1, 128], strides = [1, 1, 1]} : vector<3x3x128xf32> to vector<1x1x128xf32>
    %29 = vector.broadcast %28 : vector<1x1x128xf32> to vector<12x16x128xf32>
    %30 = arith.mulf %27, %29 : vector<12x16x128xf32>
    %31 = arith.addf %26, %30 : vector<12x16x128xf32>
    %32 = vector.extract_strided_slice %22 {offsets = [0, 0, 0], sizes = [12, 16, 128], strides = [1, 1, 1]} : vector<14x16x128xf32> to vector<12x16x128xf32>
    %33 = vector.extract_strided_slice %9 {offsets = [0, 2, 0], sizes = [1, 1, 128], strides = [1, 1, 1]} : vector<3x3x128xf32> to vector<1x1x128xf32>
    %34 = vector.broadcast %33 : vector<1x1x128xf32> to vector<12x16x128xf32>
    %35 = arith.mulf %32, %34 : vector<12x16x128xf32>
    %36 = arith.addf %31, %35 : vector<12x16x128xf32>
    %37 = vector.extract_strided_slice %18 {offsets = [1, 0, 0], sizes = [12, 16, 128], strides = [1, 1, 1]} : vector<14x16x128xf32> to vector<12x16x128xf32>
    %38 = vector.extract_strided_slice %9 {offsets = [1, 0, 0], sizes = [1, 1, 128], strides = [1, 1, 1]} : vector<3x3x128xf32> to vector<1x1x128xf32>
    %39 = vector.broadcast %38 : vector<1x1x128xf32> to vector<12x16x128xf32>
    %40 = arith.mulf %37, %39 : vector<12x16x128xf32>
    %41 = vector.extract_strided_slice %8 {offsets = [1, 0, 0], sizes = [12, 16, 128], strides = [1, 1, 1]} : vector<14x16x128xf32> to vector<12x16x128xf32>
    %42 = vector.extract_strided_slice %9 {offsets = [1, 1, 0], sizes = [1, 1, 128], strides = [1, 1, 1]} : vector<3x3x128xf32> to vector<1x1x128xf32>
    %43 = vector.broadcast %42 : vector<1x1x128xf32> to vector<12x16x128xf32>
    %44 = arith.mulf %41, %43 : vector<12x16x128xf32>
    %45 = arith.addf %40, %44 : vector<12x16x128xf32>
    %46 = vector.extract_strided_slice %22 {offsets = [1, 0, 0], sizes = [12, 16, 128], strides = [1, 1, 1]} : vector<14x16x128xf32> to vector<12x16x128xf32>
    %47 = vector.extract_strided_slice %9 {offsets = [1, 2, 0], sizes = [1, 1, 128], strides = [1, 1, 1]} : vector<3x3x128xf32> to vector<1x1x128xf32>
    %48 = vector.broadcast %47 : vector<1x1x128xf32> to vector<12x16x128xf32>
    %49 = arith.mulf %46, %48 : vector<12x16x128xf32>
    %50 = arith.addf %45, %49 : vector<12x16x128xf32>
    %51 = arith.addf %36, %50 : vector<12x16x128xf32>
    %52 = vector.extract_strided_slice %18 {offsets = [2, 0, 0], sizes = [12, 16, 128], strides = [1, 1, 1]} : vector<14x16x128xf32> to vector<12x16x128xf32>
    %53 = vector.extract_strided_slice %9 {offsets = [2, 0, 0], sizes = [1, 1, 128], strides = [1, 1, 1]} : vector<3x3x128xf32> to vector<1x1x128xf32>
    %54 = vector.broadcast %53 : vector<1x1x128xf32> to vector<12x16x128xf32>
    %55 = arith.mulf %52, %54 : vector<12x16x128xf32>
    %56 = vector.extract_strided_slice %8 {offsets = [2, 0, 0], sizes = [12, 16, 128], strides = [1, 1, 1]} : vector<14x16x128xf32> to vector<12x16x128xf32>
    %57 = vector.extract_strided_slice %9 {offsets = [2, 1, 0], sizes = [1, 1, 128], strides = [1, 1, 1]} : vector<3x3x128xf32> to vector<1x1x128xf32>
    %58 = vector.broadcast %57 : vector<1x1x128xf32> to vector<12x16x128xf32>
    %59 = arith.mulf %56, %58 : vector<12x16x128xf32>
    %60 = arith.addf %55, %59 : vector<12x16x128xf32>
    %61 = vector.extract_strided_slice %22 {offsets = [2, 0, 0], sizes = [12, 16, 128], strides = [1, 1, 1]} : vector<14x16x128xf32> to vector<12x16x128xf32>
    %62 = vector.extract_strided_slice %9 {offsets = [2, 2, 0], sizes = [1, 1, 128], strides = [1, 1, 1]} : vector<3x3x128xf32> to vector<1x1x128xf32>
    %63 = vector.broadcast %62 : vector<1x1x128xf32> to vector<12x16x128xf32>
    %64 = arith.mulf %61, %63 : vector<12x16x128xf32>
    %65 = arith.addf %60, %64 : vector<12x16x128xf32>
    %66 = arith.addf %51, %65 : vector<12x16x128xf32>
    %67 = vector.shape_cast %66 : vector<12x16x128xf32> to vector<192x128xf32>
    %68 = arith.truncf %67 : vector<192x128xf32> to vector<192x128xbf16>
    %c0_10 = arith.constant 0 : index
    %c0_11 = arith.constant 0 : index
    %69 = vector.load %arg4[%c0_10, %c0_11] : memref<128x128xbf16, #tpu.memory_space<vmem>>, vector<128x128xbf16>
    %cst_12 = arith.constant dense<0.000000e+00> : vector<192x128xf32>
    %70 = tpu.matmul %68, %69, %cst_12 {dimension_numbers = #tpu.dot_dimension_numbers<[1], [0], [0], [1], [0, 0, 1, 1], [], []>} : vector<192x128xbf16>, vector<128x128xbf16>, vector<192x128xf32> -> vector<192x128xf32>
    %c0_13 = arith.constant 0 : index
    %c0_14 = arith.constant 0 : index
    %71 = vector.load %arg5[%c0_13, %c0_14] : memref<1x128xf32, #tpu.memory_space<vmem>>, vector<1x128xf32>
    %72 = vector.broadcast %71 : vector<1x128xf32> to vector<192x128xf32>
    %73 = arith.addf %70, %72 : vector<192x128xf32>
    %cst_15 = arith.constant 0.00999999977 : f32
    %74 = vector.broadcast %cst_15 : f32 to vector<192x128xf32>
    %75 = arith.mulf %74, %73 : vector<192x128xf32>
    %76 = arith.maximumf %73, %75 : vector<192x128xf32>
    %77 = vector.shape_cast %76 : vector<192x128xf32> to vector<12x16x128xf32>
    %c0_16 = arith.constant 0 : index
    %c0_17 = arith.constant 0 : index
    %c0_18 = arith.constant 0 : index
    %78 = vector.load %arg10[%c0_16, %c0_17, %c0_18] : memref<12x16x128xf32, #tpu.memory_space<vmem>>, vector<12x16x128xf32>
    tpu.vector_store %arg10[%c0_16, %c0_17, %c0_18], %77 {strides = array<i32>} : memref<12x16x128xf32, #tpu.memory_space<vmem>>, vector<12x16x128xf32>,
    %79 = arith.extui %0 : i1 to i32
    %c0_i32_19 = arith.constant 0 : i32
    %80 = arith.cmpi ne, %79, %c0_i32_19 : i32
    scf.if %80 {
      %cst_82 = arith.constant 0.000000e+00 : f32
      %229 = vector.broadcast %cst_82 : f32 to vector<2x16x128xf32>
      %c0_83 = arith.constant 0 : index
      %c0_84 = arith.constant 0 : index
      %c0_85 = arith.constant 0 : index
      %230 = vector.load %arg10[%c0_83, %c0_84, %c0_85] : memref<12x16x128xf32, #tpu.memory_space<vmem>>, vector<2x16x128xf32>
      tpu.vector_store %arg10[%c0_83, %c0_84, %c0_85], %229 {strides = array<i32>} : memref<12x16x128xf32, #tpu.memory_space<vmem>>, vector<2x16x128xf32>,
    } else {
    }
    %81 = arith.extui %1 : i1 to i32
    %c0_i32_20 = arith.constant 0 : i32
    %82 = arith.cmpi ne, %81, %c0_i32_20 : i32
    scf.if %82 {
      %cst_82 = arith.constant 0.000000e+00 : f32
      %229 = vector.broadcast %cst_82 : f32 to vector<2x16x128xf32>
      %c10 = arith.constant 10 : index
      %c0_83 = arith.constant 0 : index
      %c0_84 = arith.constant 0 : index
      %230 = vector.load %arg10[%c10, %c0_83, %c0_84] : memref<12x16x128xf32, #tpu.memory_space<vmem>>, vector<2x16x128xf32>
      tpu.vector_store %arg10[%c10, %c0_83, %c0_84], %229 {strides = array<i32>} : memref<12x16x128xf32, #tpu.memory_space<vmem>>, vector<2x16x128xf32>,
    } else {
    }
    %c0_21 = arith.constant 0 : index
    %c0_22 = arith.constant 0 : index
    %c0_23 = arith.constant 0 : index
    %83 = vector.load %arg10[%c0_21, %c0_22, %c0_23] : memref<12x16x128xf32, #tpu.memory_space<vmem>>, vector<12x16x128xf32>
    %c0_24 = arith.constant 0 : index
    %c0_25 = arith.constant 0 : index
    %c0_26 = arith.constant 0 : index
    %84 = vector.load %arg6[%c0_24, %c0_25, %c0_26] : memref<3x3x128xf32, #tpu.memory_space<vmem>>, vector<3x3x128xf32>
    %85 = vector.shape_cast %83 : vector<12x16x128xf32> to vector<192x128xf32>
    %c1_i32_27 = arith.constant 1 : i32
    %86 = tpu.dynamic_rotate %85 by %c1_i32_27 dim 0 : vector<192x128xf32>, i32 -> vector<192x128xf32>
    %87 = vector.shape_cast %86 : vector<192x128xf32> to vector<12x16x128xf32>
    %c191_i32 = arith.constant 191 : i32
    %88 = tpu.dynamic_rotate %85 by %c191_i32 dim 0 : vector<192x128xf32>, i32 -> vector<192x128xf32>
    %89 = vector.shape_cast %88 : vector<192x128xf32> to vector<12x16x128xf32>
    %cst_28 = arith.constant 0.000000e+00 : f32
    %90 = vector.shape_cast %4 : vector<16x128xi1> to vector<1x16x128xi1>
    %91 = vector.broadcast %90 : vector<1x16x128xi1> to vector<12x16x128xi1>
    %92 = vector.broadcast %cst_28 : f32 to vector<12x16x128xf32>
    %93 = arith.select %91, %92, %87 : vector<12x16x128xi1>, vector<12x16x128xf32>
    %cst_29 = arith.constant 0.000000e+00 : f32
    %94 = vector.shape_cast %6 : vector<16x128xi1> to vector<1x16x128xi1>
    %95 = vector.broadcast %94 : vector<1x16x128xi1> to vector<12x16x128xi1>
    %96 = vector.broadcast %cst_29 : f32 to vector<12x16x128xf32>
    %97 = arith.select %95, %96, %89 : vector<12x16x128xi1>, vector<12x16x128xf32>
    %98 = vector.extract_strided_slice %93 {offsets = [0, 0, 0], sizes = [10, 16, 128], strides = [1, 1, 1]} : vector<12x16x128xf32> to vector<10x16x128xf32>
    %99 = vector.extract_strided_slice %84 {offsets = [0, 0, 0], sizes = [1, 1, 128], strides = [1, 1, 1]} : vector<3x3x128xf32> to vector<1x1x128xf32>
    %100 = vector.broadcast %99 : vector<1x1x128xf32> to vector<10x16x128xf32>
    %101 = arith.mulf %98, %100 : vector<10x16x128xf32>
    %102 = vector.extract_strided_slice %83 {offsets = [0, 0, 0], sizes = [10, 16, 128], strides = [1, 1, 1]} : vector<12x16x128xf32> to vector<10x16x128xf32>
    %103 = vector.extract_strided_slice %84 {offsets = [0, 1, 0], sizes = [1, 1, 128], strides = [1, 1, 1]} : vector<3x3x128xf32> to vector<1x1x128xf32>
    %104 = vector.broadcast %103 : vector<1x1x128xf32> to vector<10x16x128xf32>
    %105 = arith.mulf %102, %104 : vector<10x16x128xf32>
    %106 = arith.addf %101, %105 : vector<10x16x128xf32>
    %107 = vector.extract_strided_slice %97 {offsets = [0, 0, 0], sizes = [10, 16, 128], strides = [1, 1, 1]} : vector<12x16x128xf32> to vector<10x16x128xf32>
    %108 = vector.extract_strided_slice %84 {offsets = [0, 2, 0], sizes = [1, 1, 128], strides = [1, 1, 1]} : vector<3x3x128xf32> to vector<1x1x128xf32>
    %109 = vector.broadcast %108 : vector<1x1x128xf32> to vector<10x16x128xf32>
    %110 = arith.mulf %107, %109 : vector<10x16x128xf32>
    %111 = arith.addf %106, %110 : vector<10x16x128xf32>
    %112 = vector.extract_strided_slice %93 {offsets = [1, 0, 0], sizes = [10, 16, 128], strides = [1, 1, 1]} : vector<12x16x128xf32> to vector<10x16x128xf32>
    %113 = vector.extract_strided_slice %84 {offsets = [1, 0, 0], sizes = [1, 1, 128], strides = [1, 1, 1]} : vector<3x3x128xf32> to vector<1x1x128xf32>
    %114 = vector.broadcast %113 : vector<1x1x128xf32> to vector<10x16x128xf32>
    %115 = arith.mulf %112, %114 : vector<10x16x128xf32>
    %116 = vector.extract_strided_slice %83 {offsets = [1, 0, 0], sizes = [10, 16, 128], strides = [1, 1, 1]} : vector<12x16x128xf32> to vector<10x16x128xf32>
    %117 = vector.extract_strided_slice %84 {offsets = [1, 1, 0], sizes = [1, 1, 128], strides = [1, 1, 1]} : vector<3x3x128xf32> to vector<1x1x128xf32>
    %118 = vector.broadcast %117 : vector<1x1x128xf32> to vector<10x16x128xf32>
    %119 = arith.mulf %116, %118 : vector<10x16x128xf32>
    %120 = arith.addf %115, %119 : vector<10x16x128xf32>
    %121 = vector.extract_strided_slice %97 {offsets = [1, 0, 0], sizes = [10, 16, 128], strides = [1, 1, 1]} : vector<12x16x128xf32> to vector<10x16x128xf32>
    %122 = vector.extract_strided_slice %84 {offsets = [1, 2, 0], sizes = [1, 1, 128], strides = [1, 1, 1]} : vector<3x3x128xf32> to vector<1x1x128xf32>
    %123 = vector.broadcast %122 : vector<1x1x128xf32> to vector<10x16x128xf32>
    %124 = arith.mulf %121, %123 : vector<10x16x128xf32>
    %125 = arith.addf %120, %124 : vector<10x16x128xf32>
    %126 = arith.addf %111, %125 : vector<10x16x128xf32>
    %127 = vector.extract_strided_slice %93 {offsets = [2, 0, 0], sizes = [10, 16, 128], strides = [1, 1, 1]} : vector<12x16x128xf32> to vector<10x16x128xf32>
    %128 = vector.extract_strided_slice %84 {offsets = [2, 0, 0], sizes = [1, 1, 128], strides = [1, 1, 1]} : vector<3x3x128xf32> to vector<1x1x128xf32>
    %129 = vector.broadcast %128 : vector<1x1x128xf32> to vector<10x16x128xf32>
    %130 = arith.mulf %127, %129 : vector<10x16x128xf32>
    %131 = vector.extract_strided_slice %83 {offsets = [2, 0, 0], sizes = [10, 16, 128], strides = [1, 1, 1]} : vector<12x16x128xf32> to vector<10x16x128xf32>
    %132 = vector.extract_strided_slice %84 {offsets = [2, 1, 0], sizes = [1, 1, 128], strides = [1, 1, 1]} : vector<3x3x128xf32> to vector<1x1x128xf32>
    %133 = vector.broadcast %132 : vector<1x1x128xf32> to vector<10x16x128xf32>
    %134 = arith.mulf %131, %133 : vector<10x16x128xf32>
    %135 = arith.addf %130, %134 : vector<10x16x128xf32>
    %136 = vector.extract_strided_slice %97 {offsets = [2, 0, 0], sizes = [10, 16, 128], strides = [1, 1, 1]} : vector<12x16x128xf32> to vector<10x16x128xf32>
    %137 = vector.extract_strided_slice %84 {offsets = [2, 2, 0], sizes = [1, 1, 128], strides = [1, 1, 1]} : vector<3x3x128xf32> to vector<1x1x128xf32>
    %138 = vector.broadcast %137 : vector<1x1x128xf32> to vector<10x16x128xf32>
    %139 = arith.mulf %136, %138 : vector<10x16x128xf32>
    %140 = arith.addf %135, %139 : vector<10x16x128xf32>
    %141 = arith.addf %126, %140 : vector<10x16x128xf32>
    %142 = vector.shape_cast %141 : vector<10x16x128xf32> to vector<160x128xf32>
    %143 = arith.truncf %142 : vector<160x128xf32> to vector<160x128xbf16>
    %c0_30 = arith.constant 0 : index
    %c0_31 = arith.constant 0 : index
    %144 = vector.load %arg7[%c0_30, %c0_31] : memref<128x128xbf16, #tpu.memory_space<vmem>>, vector<128x128xbf16>
    %cst_32 = arith.constant dense<0.000000e+00> : vector<160x128xf32>
    %145 = tpu.matmul %143, %144, %cst_32 {dimension_numbers = #tpu.dot_dimension_numbers<[1], [0], [0], [1], [0, 0, 1, 1], [], []>} : vector<160x128xbf16>, vector<128x128xbf16>, vector<160x128xf32> -> vector<160x128xf32>
    %c0_33 = arith.constant 0 : index
    %c0_34 = arith.constant 0 : index
    %146 = vector.load %arg8[%c0_33, %c0_34] : memref<1x128xf32, #tpu.memory_space<vmem>>, vector<1x128xf32>
    %147 = vector.broadcast %146 : vector<1x128xf32> to vector<160x128xf32>
    %148 = arith.addf %145, %147 : vector<160x128xf32>
    %cst_35 = arith.constant 0.00999999977 : f32
    %149 = vector.broadcast %cst_35 : f32 to vector<160x128xf32>
    %150 = arith.mulf %149, %148 : vector<160x128xf32>
    %151 = arith.maximumf %148, %150 : vector<160x128xf32>
    %152 = vector.shape_cast %151 : vector<160x128xf32> to vector<10x16x128xf32>
    %c0_36 = arith.constant 0 : index
    %c0_37 = arith.constant 0 : index
    %c0_38 = arith.constant 0 : index
    %153 = vector.load %arg10[%c0_36, %c0_37, %c0_38] : memref<12x16x128xf32, #tpu.memory_space<vmem>>, vector<10x16x128xf32>
    tpu.vector_store %arg10[%c0_36, %c0_37, %c0_38], %152 {strides = array<i32>} : memref<12x16x128xf32, #tpu.memory_space<vmem>>, vector<10x16x128xf32>,
    %154 = arith.extui %0 : i1 to i32
    %c0_i32_39 = arith.constant 0 : i32
    %155 = arith.cmpi ne, %154, %c0_i32_39 : i32
    scf.if %155 {
      %c1_82 = arith.constant 1 : index
      %c0_83 = arith.constant 0 : index
      %c0_84 = arith.constant 0 : index
      %229 = vector.load %arg10[%c1_82, %c0_83, %c0_84] : memref<12x16x128xf32, #tpu.memory_space<vmem>>, vector<1x16x128xf32>
      %c0_85 = arith.constant 0 : index
      %c0_86 = arith.constant 0 : index
      %c0_87 = arith.constant 0 : index
      %230 = vector.load %arg10[%c0_85, %c0_86, %c0_87] : memref<12x16x128xf32, #tpu.memory_space<vmem>>, vector<1x16x128xf32>
      tpu.vector_store %arg10[%c0_85, %c0_86, %c0_87], %229 {strides = array<i32>} : memref<12x16x128xf32, #tpu.memory_space<vmem>>, vector<1x16x128xf32>,
    } else {
    }
    %156 = arith.extui %1 : i1 to i32
    %c0_i32_40 = arith.constant 0 : i32
    %157 = arith.cmpi ne, %156, %c0_i32_40 : i32
    scf.if %157 {
      %c8 = arith.constant 8 : index
      %c0_82 = arith.constant 0 : index
      %c0_83 = arith.constant 0 : index
      %229 = vector.load %arg10[%c8, %c0_82, %c0_83] : memref<12x16x128xf32, #tpu.memory_space<vmem>>, vector<1x16x128xf32>
      %c9 = arith.constant 9 : index
      %c0_84 = arith.constant 0 : index
      %c0_85 = arith.constant 0 : index
      %230 = vector.load %arg10[%c9, %c0_84, %c0_85] : memref<12x16x128xf32, #tpu.memory_space<vmem>>, vector<1x16x128xf32>
      tpu.vector_store %arg10[%c9, %c0_84, %c0_85], %229 {strides = array<i32>} : memref<12x16x128xf32, #tpu.memory_space<vmem>>, vector<1x16x128xf32>,
    } else {
    }
    %c1 = arith.constant 1 : index
    %c0_41 = arith.constant 0 : index
    %c0_42 = arith.constant 0 : index
    %158 = vector.load %arg10[%c1, %c0_41, %c0_42] : memref<12x16x128xf32, #tpu.memory_space<vmem>>, vector<8x16x128xf32>
    %c0_43 = arith.constant 0 : index
    %c0_44 = arith.constant 0 : index
    %c0_45 = arith.constant 0 : index
    %159 = vector.load %arg10[%c0_43, %c0_44, %c0_45] : memref<12x16x128xf32, #tpu.memory_space<vmem>>, vector<8x16x128xf32>
    %c2 = arith.constant 2 : index
    %c0_46 = arith.constant 0 : index
    %c0_47 = arith.constant 0 : index
    %160 = vector.load %arg10[%c2, %c0_46, %c0_47] : memref<12x16x128xf32, #tpu.memory_space<vmem>>, vector<8x16x128xf32>
    %cst_48 = arith.constant 7.500000e-01 : f32
    %161 = vector.broadcast %cst_48 : f32 to vector<8x16x128xf32>
    %162 = arith.mulf %161, %158 : vector<8x16x128xf32>
    %cst_49 = arith.constant 2.500000e-01 : f32
    %163 = vector.broadcast %cst_49 : f32 to vector<8x16x128xf32>
    %164 = arith.mulf %163, %159 : vector<8x16x128xf32>
    %165 = arith.addf %162, %164 : vector<8x16x128xf32>
    %cst_50 = arith.constant 7.500000e-01 : f32
    %166 = vector.broadcast %cst_50 : f32 to vector<8x16x128xf32>
    %167 = arith.mulf %166, %158 : vector<8x16x128xf32>
    %cst_51 = arith.constant 2.500000e-01 : f32
    %168 = vector.broadcast %cst_51 : f32 to vector<8x16x128xf32>
    %169 = arith.mulf %168, %160 : vector<8x16x128xf32>
    %170 = arith.addf %167, %169 : vector<8x16x128xf32>
    %171 = vector.shape_cast %165 : vector<8x16x128xf32> to vector<128x128xf32>
    %c1_i32_52 = arith.constant 1 : i32
    %172 = tpu.dynamic_rotate %171 by %c1_i32_52 dim 0 : vector<128x128xf32>, i32 -> vector<128x128xf32>
    %173 = vector.shape_cast %172 : vector<128x128xf32> to vector<8x16x128xf32>
    %c127_i32 = arith.constant 127 : i32
    %174 = tpu.dynamic_rotate %171 by %c127_i32 dim 0 : vector<128x128xf32>, i32 -> vector<128x128xf32>
    %175 = vector.shape_cast %174 : vector<128x128xf32> to vector<8x16x128xf32>
    %176 = vector.shape_cast %4 : vector<16x128xi1> to vector<1x16x128xi1>
    %177 = vector.broadcast %176 : vector<1x16x128xi1> to vector<8x16x128xi1>
    %178 = arith.select %177, %165, %173 : vector<8x16x128xi1>, vector<8x16x128xf32>
    %179 = vector.shape_cast %6 : vector<16x128xi1> to vector<1x16x128xi1>
    %180 = vector.broadcast %179 : vector<1x16x128xi1> to vector<8x16x128xi1>
    %181 = arith.select %180, %165, %175 : vector<8x16x128xi1>, vector<8x16x128xf32>
    %cst_53 = arith.constant 7.500000e-01 : f32
    %182 = vector.broadcast %cst_53 : f32 to vector<8x16x128xf32>
    %183 = arith.mulf %182, %165 : vector<8x16x128xf32>
    %cst_54 = arith.constant 2.500000e-01 : f32
    %184 = vector.broadcast %cst_54 : f32 to vector<8x16x128xf32>
    %185 = arith.mulf %184, %178 : vector<8x16x128xf32>
    %186 = arith.addf %183, %185 : vector<8x16x128xf32>
    %187 = arith.truncf %186 : vector<8x16x128xf32> to vector<8x16x128xbf16>
    %c0_55 = arith.constant 0 : index
    %c0_56 = arith.constant 0 : index
    %c0_57 = arith.constant 0 : index
    %c0_58 = arith.constant 0 : index
    %c0_59 = arith.constant 0 : index
    %188 = vector.load %arg9[%c0_55, %c0_56, %c0_57, %c0_58, %c0_59] : memref<1x4x8x16x128xbf16, #tpu.memory_space<vmem>>, vector<1x1x8x16x128xbf16>
    %189 = vector.shape_cast %188 : vector<1x1x8x16x128xbf16> to vector<8x16x128xbf16>
    %190 = vector.shape_cast %187 : vector<8x16x128xbf16> to vector<1x1x8x16x128xbf16>
    tpu.vector_store %arg9[%c0_55, %c0_56, %c0_57, %c0_58, %c0_59], %190 {strides = array<i32>} : memref<1x4x8x16x128xbf16, #tpu.memory_space<vmem>>, vector<1x1x8x16x128xbf16>,
    %cst_60 = arith.constant 7.500000e-01 : f32
    %191 = vector.broadcast %cst_60 : f32 to vector<8x16x128xf32>
    %192 = arith.mulf %191, %165 : vector<8x16x128xf32>
    %cst_61 = arith.constant 2.500000e-01 : f32
    %193 = vector.broadcast %cst_61 : f32 to vector<8x16x128xf32>
    %194 = arith.mulf %193, %181 : vector<8x16x128xf32>
    %195 = arith.addf %192, %194 : vector<8x16x128xf32>
    %196 = arith.truncf %195 : vector<8x16x128xf32> to vector<8x16x128xbf16>
    %c0_62 = arith.constant 0 : index
    %c1_63 = arith.constant 1 : index
    %c0_64 = arith.constant 0 : index
    %c0_65 = arith.constant 0 : index
    %c0_66 = arith.constant 0 : index
    %197 = vector.load %arg9[%c0_62, %c1_63, %c0_64, %c0_65, %c0_66] : memref<1x4x8x16x128xbf16, #tpu.memory_space<vmem>>, vector<1x1x8x16x128xbf16>
    %198 = vector.shape_cast %197 : vector<1x1x8x16x128xbf16> to vector<8x16x128xbf16>
    %199 = vector.shape_cast %196 : vector<8x16x128xbf16> to vector<1x1x8x16x128xbf16>
    tpu.vector_store %arg9[%c0_62, %c1_63, %c0_64, %c0_65, %c0_66], %199 {strides = array<i32>} : memref<1x4x8x16x128xbf16, #tpu.memory_space<vmem>>, vector<1x1x8x16x128xbf16>,
    %200 = vector.shape_cast %170 : vector<8x16x128xf32> to vector<128x128xf32>
    %c1_i32_67 = arith.constant 1 : i32
    %201 = tpu.dynamic_rotate %200 by %c1_i32_67 dim 0 : vector<128x128xf32>, i32 -> vector<128x128xf32>
    %202 = vector.shape_cast %201 : vector<128x128xf32> to vector<8x16x128xf32>
    %c127_i32_68 = arith.constant 127 : i32
    %203 = tpu.dynamic_rotate %200 by %c127_i32_68 dim 0 : vector<128x128xf32>, i32 -> vector<128x128xf32>
    %204 = vector.shape_cast %203 : vector<128x128xf32> to vector<8x16x128xf32>
    %205 = vector.shape_cast %4 : vector<16x128xi1> to vector<1x16x128xi1>
    %206 = vector.broadcast %205 : vector<1x16x128xi1> to vector<8x16x128xi1>
    %207 = arith.select %206, %170, %202 : vector<8x16x128xi1>, vector<8x16x128xf32>
    %208 = vector.shape_cast %6 : vector<16x128xi1> to vector<1x16x128xi1>
    %209 = vector.broadcast %208 : vector<1x16x128xi1> to vector<8x16x128xi1>
    %210 = arith.select %209, %170, %204 : vector<8x16x128xi1>, vector<8x16x128xf32>
    %cst_69 = arith.constant 7.500000e-01 : f32
    %211 = vector.broadcast %cst_69 : f32 to vector<8x16x128xf32>
    %212 = arith.mulf %211, %170 : vector<8x16x128xf32>
    %cst_70 = arith.constant 2.500000e-01 : f32
    %213 = vector.broadcast %cst_70 : f32 to vector<8x16x128xf32>
    %214 = arith.mulf %213, %207 : vector<8x16x128xf32>
    %215 = arith.addf %212, %214 : vector<8x16x128xf32>
    %216 = arith.truncf %215 : vector<8x16x128xf32> to vector<8x16x128xbf16>
    %c0_71 = arith.constant 0 : index
    %c2_72 = arith.constant 2 : index
    %c0_73 = arith.constant 0 : index
    %c0_74 = arith.constant 0 : index
    %c0_75 = arith.constant 0 : index
    %217 = vector.load %arg9[%c0_71, %c2_72, %c0_73, %c0_74, %c0_75] : memref<1x4x8x16x128xbf16, #tpu.memory_space<vmem>>, vector<1x1x8x16x128xbf16>
    %218 = vector.shape_cast %217 : vector<1x1x8x16x128xbf16> to vector<8x16x128xbf16>
    %219 = vector.shape_cast %216 : vector<8x16x128xbf16> to vector<1x1x8x16x128xbf16>
    tpu.vector_store %arg9[%c0_71, %c2_72, %c0_73, %c0_74, %c0_75], %219 {strides = array<i32>} : memref<1x4x8x16x128xbf16, #tpu.memory_space<vmem>>, vector<1x1x8x16x128xbf16>,
    %cst_76 = arith.constant 7.500000e-01 : f32
    %220 = vector.broadcast %cst_76 : f32 to vector<8x16x128xf32>
    %221 = arith.mulf %220, %170 : vector<8x16x128xf32>
    %cst_77 = arith.constant 2.500000e-01 : f32
    %222 = vector.broadcast %cst_77 : f32 to vector<8x16x128xf32>
    %223 = arith.mulf %222, %210 : vector<8x16x128xf32>
    %224 = arith.addf %221, %223 : vector<8x16x128xf32>
    %225 = arith.truncf %224 : vector<8x16x128xf32> to vector<8x16x128xbf16>
    %c0_78 = arith.constant 0 : index
    %c3 = arith.constant 3 : index
    %c0_79 = arith.constant 0 : index
    %c0_80 = arith.constant 0 : index
    %c0_81 = arith.constant 0 : index
    %226 = vector.load %arg9[%c0_78, %c3, %c0_79, %c0_80, %c0_81] : memref<1x4x8x16x128xbf16, #tpu.memory_space<vmem>>, vector<1x1x8x16x128xbf16>
    %227 = vector.shape_cast %226 : vector<1x1x8x16x128xbf16> to vector<8x16x128xbf16>
    %228 = vector.shape_cast %225 : vector<8x16x128xbf16> to vector<1x1x8x16x128xbf16>
    tpu.vector_store %arg9[%c0_78, %c3, %c0_79, %c0_80, %c0_81], %228 {strides = array<i32>} : memref<1x4x8x16x128xbf16, #tpu.memory_space<vmem>>, vector<1x1x8x16x128xbf16>,
    return
  }
  func.func @transform_0(%arg0: i32, %arg1: i32) -> (i32, i32, i32, i32, i32) {
    %c0_i32 = arith.constant 0 : i32
    %c0_i32_0 = arith.constant 0 : i32
    %c0_i32_1 = arith.constant 0 : i32
    %c0_i32_2 = arith.constant 0 : i32
    return %arg0, %arg1, %c0_i32, %c0_i32_0, %c0_i32_1 : i32, i32, i32, i32, i32
  }
  func.func @transform_1(%arg0: i32, %arg1: i32) -> (i32, i32, i32) {
    %c0_i32 = arith.constant 0 : i32
    %c0_i32_0 = arith.constant 0 : i32
    %c0_i32_1 = arith.constant 0 : i32
    %c0_i32_2 = arith.constant 0 : i32
    return %c0_i32, %c0_i32_0, %c0_i32_1 : i32, i32, i32
  }
  func.func @transform_2(%arg0: i32, %arg1: i32) -> (i32, i32) {
    %c0_i32 = arith.constant 0 : i32
    %c0_i32_0 = arith.constant 0 : i32
    %c0_i32_1 = arith.constant 0 : i32
    return %c0_i32, %c0_i32_0 : i32, i32
  }
  func.func @transform_3(%arg0: i32, %arg1: i32) -> (i32, i32) {
    %c0_i32 = arith.constant 0 : i32
    %c0_i32_0 = arith.constant 0 : i32
    %c0_i32_1 = arith.constant 0 : i32
    return %c0_i32, %c0_i32_0 : i32, i32
  }
  func.func @transform_4(%arg0: i32, %arg1: i32) -> (i32, i32, i32) {
    %c0_i32 = arith.constant 0 : i32
    %c0_i32_0 = arith.constant 0 : i32
    %c0_i32_1 = arith.constant 0 : i32
    %c0_i32_2 = arith.constant 0 : i32
    return %c0_i32, %c0_i32_0, %c0_i32_1 : i32, i32, i32
  }
  func.func @transform_5(%arg0: i32, %arg1: i32) -> (i32, i32) {
    %c0_i32 = arith.constant 0 : i32
    %c0_i32_0 = arith.constant 0 : i32
    %c0_i32_1 = arith.constant 0 : i32
    return %c0_i32, %c0_i32_0 : i32, i32
  }
  func.func @transform_6(%arg0: i32, %arg1: i32) -> (i32, i32) {
    %c0_i32 = arith.constant 0 : i32
    %c0_i32_0 = arith.constant 0 : i32
    %c0_i32_1 = arith.constant 0 : i32
    return %c0_i32, %c0_i32_0 : i32, i32
  }
  func.func @transform_7(%arg0: i32, %arg1: i32) -> (i32, i32, i32, i32, i32) {
    %c0_i32 = arith.constant 0 : i32
    %c0_i32_0 = arith.constant 0 : i32
    %c0_i32_1 = arith.constant 0 : i32
    %c0_i32_2 = arith.constant 0 : i32
    return %arg0, %c0_i32, %arg1, %c0_i32_0, %c0_i32_1 : i32, i32, i32, i32, i32
  }
}

</mosaic_0001>

<bundles_post_ra>
// kernel: _lambda_.1
= control target key start
LH: loop header
LB: loop body
LE: loop exit
PB: predicated region body
PF: predicated region fallthrough
CT: control target
= control target key end

     0   :  { %s3960_s24 = smov 0   ;;  %s3962_s25 = smov 0   ;;  %s6511_s0 = inlined_call_operand.vmem [shape: f32[2,2,14,16,128], index: 0, kind: input, shape index: {}]   ;;  %s6512_s1 = inlined_call_operand.vmem [shape: f32[3,3,128], index: 1, kind: input, shape index: {}]   ;;  %s6513_s2 = inlined_call_operand.vmem [shape: bf16[128,128], index: 2, kind: input, shape index: {}]   ;;  %s6514_s3 = inlined_call_operand.vmem [shape: f32[1,128], index: 3, kind: input, shape index: {}]   ;;  %s6515_s4 = inlined_call_operand.vmem [shape: f32[3,3,128], index: 4, kind: input, shape index: {}]   ;;  %s6516_s5 = inlined_call_operand.vmem [shape: bf16[128,128], index: 5, kind: input, shape index: {}]   ;;  %s6517_s6 = inlined_call_operand.vmem [shape: f32[1,128], index: 6, kind: input, shape index: {}]   ;;  %s6518_s7 = inlined_call_operand.vmem [shape: bf16[2,4,16,16,128], index: 7, kind: output, shape index: {}]  }
   0x1   :  { %s3964_s26 = smov 0   ;;  %s3966_s27 = smov 0  }
   0x2   :  { %s3968_s28 = smov 0   ;;  %s3970_s29 = smov 0  }
   0x3   :  { %s3972_s30 = smov 0  }
   0x4 LB: > { %s26_s8 = sadd.s32 1, %s3908_s28  ;;  %s29_s9 = sadd.s32 1, %s3912_s29  ;;  %s3916_s30 = sphi %s3972_s30, %s17_s30   ;;  %s3912_s29 = sphi %s3970_s29, %s6580_s29   ;;  %s3908_s28 = sphi %s3968_s28, %s6579_s28   ;;  %s3904_s27 = sphi %s3966_s27, %s6578_s27   ;;  %s3900_s26 = sphi %s3964_s26, %s6577_s26   ;;  %s3896_s25 = sphi %s3962_s25, %s6576_s25   ;;  %s3892_s24 = sphi %s3960_s24, %s6575_s24  }
   0x5   : > { %p27_p0 = scmp.ge.s32.totalorder %s26_s8, 2  ;;  %s3267_s10 = sadd.s32 4294967295, %s3916_s30  }
   0x6   : > { %p202_p1 = scmp.ne.s32.totalorder %s3896_s25, %s3892_s24  ;;  %p203_p2 = scmp.eq.s32.totalorder %s3267_s10, 3 }
   0x7   : > { %s6582_s8 = smov (%p27_p0, %s26_s8), 0  ;;  %s6584_s9 = smov (!%p27_p0, %s29_s9), %s3912_s29 }
   0x8   : > { %s188_s11 = ssub.s32 %s3908_s28, %s6582_s8  ;;  %p31_p3 = scmp.ge.s32.totalorder %s6584_s9, 2 }
   0x9   : > { %p3271_p4 = scmp.ge.s32.totalorder %s3916_s30, 1  ;;  %p4006_p5 = por %p203_p2, %p202_p1 }
   0xa   : > { %p257_p6 = scmp.lt.s32.totalorder %s3916_s30, 5  ;;  %s6586_s9 = smov (%p31_p3, %s6584_s9), 0 }
   0xb   : > { %s187_s13 = ssub.s32 %s3912_s29, %s6586_s9  ;;  %s192_s15 = sadd.s32 1, %s3896_s25 }
   0xc   : > { %p258_p7 = pnand %p3271_p4, %p257_p6  ;;  %s189_s14 = sor.u32 %s188_s11, %s187_s13 }
   0xd   : > { %p190_p8 = scmp.eq.s32.totalorder %s189_s14, 0 }
   0xe   : > { %261 = sbr.rel (%p258_p7) target bundleno = 862 (0x35e), region = 48 }
   0xf   : > { %s4017_s16 = scalar_select %p190_p8, %s3896_s25, %s192_s15  }
  0x13   : > { %s289_s17 = sand.u32 1, %s3892_s24   ;;  %v3845_v0 = vld [vmem:[%s6513_s2 + $0x38] sm:$0xff]   ;;  %v3846_v1 = vld [vmem:[%s6513_s2 + $0x30] sm:$0xff]   ;;  %p292_p9 = scmp.lt.s32.totalorder %s3904_s27, 1  ;;  %v3847_v2 = vld [vmem:[%s6513_s2 + $0x28] sm:$0xff]   ;;  %v305_v3 = vlaneseq }
  0x14   : > { %s4023_s20 = sshll.u32 %s289_s17, 8  ;;  %3709 = vmatprep.subr.bf16.mxu0 %v3845_v0  ;;  %p294_p10 = scmp.lt.s32.totalorder %s3900_s26, 1  ;;  %v3848_v4 = vld [vmem:[%s6513_s2 + $0x20] sm:$0xff]   ;;  %v3849_v12 = vld [vmem:[%s6513_s2 + $0x18] sm:$0xff]   ;;  %v3850_v32 = vld [vmem:[%s6513_s2 + $0x10] sm:$0xff]  }
  0x15   : > { %3710 = vmatpush3.bf16.msra.mxu0 %v3845_v0  ;;  %s293_s24 = scalar_select %p292_p9, %s3904_s27, 1  ;;  %v4038_v5 = vshrl.u32 %v305_v3, 7  ;;  %v340_v7 = vld [vmem:[%s6512_s1] sm:$0x7]  ;;  %v4049_v8 = vld [vmem:[%s6512_s1 + $0x4] sm:$0x7] }
  0x16   : > { %3711 = vmatprep.subr.bf16.mxu0 %v3846_v1  ;;  %s295_s11 = scalar_select %p294_p10, %s3900_s26, 1  ;;  %v3851_v50 = vld [vmem:[%s6513_s2 + $0x8] sm:$0xff]   ;;  %v3852_v3 = vld [vmem:[%s6513_s2] sm:$0xff]  }
  0x17   : > { %s3786_s13 = smul.u32 56, %s293_s24  ;;  %v4041_v6 = vadd.s32 8, %v4038_v5  ;;  %v4052_v9 = vsub.s32 0, %v4038_v5  ;;  %v4055_v10 = vsub.s32 1, %v4038_v5  ;;  %v4058_v11 = vsub.s32 2, %v4038_v5  ;;  %s4963_s14 = scalar_lea.vmem [#allocation3], %s4023_s20 }
  0x18   : > { %s3785_s17 = smul.u32 28, %s295_s11  ;;  %vm308_vm0 = vcmp.eq.s32.totalorder %v4038_v5, 0  ;;  %vm371_vm2 = vcmp.lt.s32.totalorder %v4038_v5, 1  ;;  %vm428_vm3 = vcmp.lt.s32.totalorder %v4038_v5, 7  ;;  %p3283_p11 = scmp.ne.s32.totalorder %s3900_s26, 0 }
  0x19   : > { %3712 = vmatpush3.bf16.msra.mxu0 %v3846_v1  ;;  %vm311_vm1 = vcmp.eq.s32.totalorder %v4041_v6, 15  ;;  %v4080_v16 = vrot.slane %v340_v7, %v4052_v9  ;;  %v4083_v17 = vrot.slane %v340_v7, %v4055_v10  ;;  %v4086_v18 = vrot.slane %v340_v7, %v4058_v11 }
  0x1a   : > { %3713 = vmatprep.subr.bf16.mxu0 %v3847_v2  ;;  %s298_s18 = sadd.s32 %s3786_s13, %s3785_s17  ;;  %v4090_v19 = vrot.slane %v4049_v8, %v4052_v9  ;;  %v4105_v26 = vrot.slane %v4049_v8, %v4055_v10 }
  0x1b   : > { %s3273_s10 = sshll.u32 %s298_s18, 3 }
  0x1c   : > { %s4066_s15 = scalar_lea.vmem %s6511_s0, %s3273_s10 }
  0x1d   : > { %3714 = vmatpush3.bf16.msra.mxu0 %v3847_v2  ;;  %v4073_v13 = vld [vmem:[%s4066_s15] sm:$0xff]  ;;  %v313_v14 = vld [vmem:[%s4066_s15 + $0x8] sm:$0xff]  ;;  %v4077_v15 = vld [vmem:[%s4066_s15 + $0x10] sm:$0xff] }
  0x1e   : > { %3715 = vmatprep.subr.bf16.mxu0 %v3848_v4  ;;  %v4093_v20 = vld [vmem:[%s4066_s15 + $0x18] sm:$0xff]  ;;  %v4096_v21 = vld [vmem:[%s4066_s15 + $0x20] sm:$0xff]  ;;  %v4099_v22 = vld [vmem:[%s4066_s15 + $0x28] sm:$0xff]  ;;  %v343_v23 = vrot.slane %v4073_v13, 7  ;;  %v344_v24 = vrot.slane %v313_v14, 7  ;;  %v345_v25 = vrot.slane %v4077_v15, 7  ;;  %v553_v2 = vmul.f32 %v4083_v17, %v4073_v13 }
  0x1f   : > { %v4108_v27 = vld [vmem:[%s4066_s15 + $0xd8] sm:$0xff]  ;;  %v346_v28 = vrot.slane %v4093_v20, 7  ;;  %v347_v29 = vrot.slane %v4096_v21, 7  ;;  %v348_v30 = vrot.slane %v4099_v22, 7  ;;  %v400_v31 = vrot.slane %v4073_v13, 1  ;;  %v4118_v33 = vld [vmem:[%s4066_s15 + $0x30] sm:$0xff] }
  0x20   : > { %v370_v34 = vrot.slane %v4108_v27, 7  ;;  %v397_v35 = vsel %vm371_vm2, %v344_v24, %v345_v25  ;;  %v398_v36 = vsel %vm371_vm2, %v343_v23, %v344_v24  ;;  %v401_v37 = vrot.slane %v313_v14, 1  ;;  %v342_v24 = vld [vmem:[%s6512_s1 + $0x8] sm:$0x7] }
  0x21   : > { %3716 = vmatpush3.bf16.msra.mxu0 %v3848_v4  ;;  %v4129_v38 = vsel %vm371_vm2, %v347_v29, %v348_v30  ;;  %v395_v39 = vsel %vm371_vm2, %v346_v28, %v347_v29  ;;  %v396_v40 = vsel %vm371_vm2, %v345_v25, %v346_v28  ;;  %v402_v41 = vrot.slane %v4077_v15, 1 }
  0x22   : > { %3717 = vmatprep.subr.bf16.mxu0 %v3849_v12  ;;  %v399_v42 = vsel %vm371_vm2, %v370_v34, %v343_v23  ;;  %v403_v43 = vrot.slane %v4093_v20, 1  ;;  %v404_v44 = vrot.slane %v4096_v21, 1  ;;  %v405_v45 = vrot.slane %v4099_v22, 1 }
  0x23   : > { %v406_v46 = vrot.slane %v4118_v33, 1  ;;  %v454_v47 = vsel %vm428_vm3, %v401_v37, %v402_v41  ;;  %v455_v48 = vsel %vm428_vm3, %v400_v31, %v401_v37  ;;  %v461_v49 = vsel %vm308_vm0, 0.0, %v399_v42 }
  0x24   : > { %v451_v51 = vsel %vm428_vm3, %v404_v44, %v405_v45  ;;  %v452_v52 = vsel %vm428_vm3, %v403_v43, %v404_v44  ;;  %v453_v53 = vsel %vm428_vm3, %v402_v41, %v403_v43  ;;  %v463_v54 = vsel %vm308_vm0, 0.0, %v397_v35 }
  0x25   : > { %3718 = vmatpush3.bf16.msra.mxu0 %v3849_v12  ;;  %v450_v55 = vsel %vm428_vm3, %v405_v45, %v406_v46  ;;  %v465_v56 = vsel %vm308_vm0, 0.0, %v395_v39  ;;  %v494_v57 = vsel %vm311_vm1, 0.0, %v454_v47  ;;  %v496_v58 = vsel %vm311_vm1, 0.0, %v452_v52 }
  0x26   : > { %3719 = vmatprep.subr.bf16.mxu0 %v3850_v32  ;;  %v498_v59 = vsel %vm311_vm1, 0.0, %v450_v55  ;;  %v525_v60 = vmul.f32 %v4080_v16, %v461_v49  ;;  %v526_v61 = vmul.f32 %v4080_v16, %v398_v36  ;;  %v4178_v62 = vmul.f32 %v4080_v16, %v463_v54 }
  0x27   : > { %v4181_v63 = vmul.f32 %v4080_v16, %v396_v40  ;;  %v4184_v0 = vmul.f32 %v4080_v16, %v465_v56  ;;  %v4188_v1 = vmul.f32 %v4080_v16, %v4129_v38  ;;  %v554_v4 = vmul.f32 %v4083_v17, %v313_v14 }
  0x28   : > { %v605_v7 = vmul.f32 %v4086_v18, %v455_v48  ;;  %v606_v12 = vmul.f32 %v4086_v18, %v494_v57  ;;  %v4199_v23 = vmul.f32 %v4086_v18, %v453_v53  ;;  %v577_v25 = vadd.f32 %v553_v2, %v525_v60  ;;  %v4241_v60 = vld [vmem:[%s4066_s15 + $0x38] sm:$0xff] }
  0x29   : > { %3720 = vmatpush3.bf16.msra.mxu0 %v3850_v32  ;;  %v4205_v28 = vmul.f32 %v4086_v18, %v496_v58  ;;  %v4208_v29 = vmul.f32 %v4086_v18, %v451_v51  ;;  %v4211_v14 = vmul.f32 %v4086_v18, %v498_v59  ;;  %v578_v32 = vadd.f32 %v554_v4, %v526_v61 }
  0x2a   : > { %3721 = vmatprep.subr.bf16.mxu0 %v3851_v50  ;;  %v657_v35 = vmul.f32 %v4090_v19, %v463_v54  ;;  %v658_v36 = vmul.f32 %v4090_v19, %v396_v40  ;;  %v659_v37 = vmul.f32 %v4090_v19, %v465_v56  ;;  %v629_v39 = vadd.f32 %v605_v7, %v577_v25  ;;  %v4251_v7 = vld [vmem:[%s4066_s15 + $0x40] sm:$0xff] }
  0x2b   : > { %v660_v41 = vmul.f32 %v4090_v19, %v4129_v38  ;;  %v685_v42 = vmul.f32 %v4105_v26, %v4077_v15  ;;  %v686_v43 = vmul.f32 %v4105_v26, %v4093_v20  ;;  %v630_v44 = vadd.f32 %v606_v12, %v578_v32 }
  0x2c   : > { %v4224_v45 = vrot.slane %v4049_v8, %v4058_v11  ;;  %v4227_v40 = vrot.slane %v342_v24, %v4052_v9  ;;  %v4230_v47 = vrot.slane %v342_v24, %v4055_v10  ;;  %v349_v52 = vrot.slane %v4118_v33, 7 }
  0x2d   : > { %3722 = vmatpush3.bf16.msra.mxu0 %v3851_v50  ;;  %v709_v48 = vadd.f32 %v685_v42, %v657_v35  ;;  %v710_v49 = vadd.f32 %v686_v43, %v658_v36  ;;  %v4233_v50 = vrot.slane %v342_v24, %v4058_v11  ;;  %v407_v42 = vrot.slane %v4241_v60, 1 }
  0x2e   : > { %3723 = vmatprep.subr.bf16.mxu0 %v3852_v3  ;;  %v737_v54 = vmul.f32 %v4224_v45, %v453_v53  ;;  %v738_v55 = vmul.f32 %v4224_v45, %v496_v58  ;;  %v739_v8 = vmul.f32 %v4224_v45, %v451_v51  ;;  %v740_v57 = vmul.f32 %v4224_v45, %v498_v59 }
  0x2f   : > { %v813_v61 = vmul.f32 %v4227_v40, %v465_v56  ;;  %v814_v2 = vmul.f32 %v4227_v40, %v4129_v38  ;;  %v841_v4 = vmul.f32 %v4230_v47, %v4096_v21  ;;  %v842_v53 = vmul.f32 %v4230_v47, %v4099_v22 }
  0x30   : > { %v761_v58 = vadd.f32 %v737_v54, %v709_v48  ;;  %v762_v12 = vadd.f32 %v738_v55, %v710_v49  ;;  %v893_v24 = vmul.f32 %v4233_v50, %v451_v51  ;;  %v894_v25 = vmul.f32 %v4233_v50, %v498_v59 }
  0x31   : > { %3724 = vmatpush3.bf16.msra.mxu0 %v3852_v3  ;;  %v865_v3 = vadd.f32 %v841_v4, %v813_v61  ;;  %v866_v32 = vadd.f32 %v842_v53, %v814_v2  ;;  %v350_v56 = vrot.slane %v4241_v60, 7  ;;  %v393_v38 = vsel %vm371_vm2, %v348_v30, %v349_v52 }
  0x32   : > { %v785_v35 = vadd.f32 %v761_v58, %v629_v39  ;;  %v786_v36 = vadd.f32 %v762_v12, %v630_v44  ;;  %v408_v43 = vrot.slane %v4251_v7, 1  ;;  %v4268_v59 = vsel %vm308_vm0, 0.0, %v393_v38  ;;  %v4306_v38 = vld [vmem:[%s4066_s15 + $0x50] sm:$0xff] }
  0x33   : > { %v917_v48 = vadd.f32 %v893_v24, %v865_v3  ;;  %v918_v49 = vadd.f32 %v894_v25, %v866_v32  ;;  %v4264_v51 = vsel %vm371_vm2, %v349_v52, %v350_v56  ;;  %v4276_v30 = vsel %vm428_vm3, %v406_v46, %v407_v42  ;;  %v4299_v25 = vld [vmem:[%s4066_s15 + $0x48] sm:$0xff] }
  0x34   : > { %v448_v54 = vsel %vm428_vm3, %v407_v42, %v408_v43  ;;  %v555_v39 = vmul.f32 %v4083_v17, %v4077_v15  ;;  %v556_v44 = vmul.f32 %v4083_v17, %v4093_v20  ;;  %v687_v2 = vmul.f32 %v4105_v26, %v4096_v21 }
  0x35   : > { %v941_v52 = vadd.f32 %v917_v48, %v785_v35  ;;  %v942_v55 = vadd.f32 %v918_v49, %v786_v36  ;;  %v4284_v61 = vsel %vm311_vm1, 0.0, %v448_v54  ;;  %v688_v15 = vmul.f32 %v4105_v26, %v4099_v22 }
  0x36   : > { %v579_v4 = vadd.f32 %v555_v39, %v4178_v62  ;;  %v580_v46 = vadd.f32 %v556_v44, %v4181_v63  ;;  %v815_v20 = vmul.f32 %v4227_v40, %v4268_v59  ;;  %v711_v58 = vadd.f32 %v687_v2, %v659_v37 }
  0x37   : > { %v965_v53 = vpack.c.bf16 %v942_v55, %v941_v52  ;;  %v816_v12 = vmul.f32 %v4227_v40, %v4264_v51  ;;  %v843_v24 = vmul.f32 %v4230_v47, %v4118_v33  ;;  %v712_v3 = vadd.f32 %v688_v15, %v660_v41 }
  0x38   : > { %v631_v62 = vadd.f32 %v4199_v23, %v579_v4  ;;  %v632_v63 = vadd.f32 %v4205_v28, %v580_v46  ;;  %v844_v32 = vmul.f32 %v4230_v47, %v4241_v60  ;;  %v763_v37 = vadd.f32 %v739_v8, %v711_v58 }
  0x39   : > { %3725 = vmatprep.mubr.bf16.mxu0 %v965_v53  ;;  %v867_v35 = vadd.f32 %v843_v24, %v815_v20  ;;  %v895_v36 = vmul.f32 %v4233_v50, %v4276_v30  ;;  %v896_v42 = vmul.f32 %v4233_v50, %v4284_v61  ;;  %v764_v48 = vadd.f32 %v740_v57, %v712_v3 }
  0x3a   : > { %v868_v49 = vadd.f32 %v844_v32, %v816_v12  ;;  %v351_v23 = vrot.slane %v4251_v7, 7  ;;  %v352_v28 = vrot.slane %v4299_v25, 7  ;;  %v787_v41 = vadd.f32 %v763_v37, %v631_v62 }
  0x3b   : > { %v919_v54 = vadd.f32 %v895_v36, %v867_v35  ;;  %v409_v39 = vrot.slane %v4299_v25, 1  ;;  %v410_v44 = vrot.slane %v4306_v38, 1  ;;  %v788_v8 = vadd.f32 %v764_v48, %v632_v63 }
  0x3c   : > { %v920_v52 = vadd.f32 %v896_v42, %v868_v49  ;;  %v4318_v55 = vsel %vm371_vm2, %v351_v23, %v352_v28  ;;  %v391_v57 = vsel %vm371_vm2, %v350_v56, %v351_v23  ;;  %v557_v56 = vmul.f32 %v4083_v17, %v4096_v21  ;;  %v4357_v42 = vld [vmem:[%s4066_s15 + $0x58] sm:$0xff] }
  0x3d   : > { %v943_v2 = vadd.f32 %v919_v54, %v787_v41  ;;  %v446_v4 = vsel %vm428_vm3, %v409_v39, %v410_v44  ;;  %v4326_v46 = vsel %vm428_vm3, %v408_v43, %v409_v39  ;;  %v4330_v15 = vsel %vm308_vm0, 0.0, %v391_v57 }
  0x3e   : > { %v944_v20 = vadd.f32 %v920_v52, %v788_v8  ;;  %v4334_v53 = vsel %vm311_vm1, 0.0, %v446_v4  ;;  %v558_v58 = vmul.f32 %v4083_v17, %v4099_v22  ;;  %v661_v43 = vmul.f32 %v4090_v19, %v4268_v59  ;;  %v4370_v8 = vld [vmem:[%s4066_s15 + $0x60] sm:$0xff] }
  0x3f   : > { %v662_v12 = vmul.f32 %v4090_v19, %v4264_v51  ;;  %v689_v24 = vmul.f32 %v4105_v26, %v4118_v33  ;;  %v690_v62 = vmul.f32 %v4105_v26, %v4241_v60  ;;  %v581_v3 = vadd.f32 %v557_v56, %v4184_v0 }
  0x40   : > { %v966_v63 = vpack.c.bf16 %v944_v20, %v943_v2  ;;  %v582_v21 = vadd.f32 %v558_v58, %v4188_v1  ;;  %v741_v22 = vmul.f32 %v4224_v45, %v4276_v30  ;;  %v742_v35 = vmul.f32 %v4224_v45, %v4284_v61 }
  0x41   : > { %v713_v32 = vadd.f32 %v689_v24, %v661_v43  ;;  %v714_v37 = vadd.f32 %v690_v62, %v662_v12  ;;  %v817_v36 = vmul.f32 %v4227_v40, %v4330_v15  ;;  %v633_v48 = vadd.f32 %v4208_v29, %v581_v3 }
  0x42   : > { %3726 = vmatmul.mubr.bf16.vlgmr.msra.gmra.mxu0 %v966_v63  ;;  %v634_v0 = vadd.f32 %v4211_v14, %v582_v21  ;;  %v818_v1 = vmul.f32 %v4227_v40, %v4318_v55  ;;  %v845_v49 = vmul.f32 %v4230_v47, %v4251_v7  ;;  %v846_v54 = vmul.f32 %v4230_v47, %v4299_v25 }
  0x43   : > { %v765_v23 = vadd.f32 %v741_v22, %v713_v32  ;;  %v766_v41 = vadd.f32 %v742_v35, %v714_v37  ;;  %v897_v39 = vmul.f32 %v4233_v50, %v4326_v46  ;;  %v898_v29 = vmul.f32 %v4233_v50, %v4334_v53 }
  0x44   : > { %v869_v52 = vadd.f32 %v845_v49, %v817_v36  ;;  %v353_v14 = vrot.slane %v4306_v38, 7  ;;  %v354_v57 = vrot.slane %v4357_v42, 7  ;;  %v870_v20 = vadd.f32 %v846_v54, %v818_v1 }
  0x45   : > { %v789_v2 = vadd.f32 %v765_v23, %v633_v48  ;;  %v790_v4 = vadd.f32 %v766_v41, %v634_v0  ;;  %v411_v56 = vrot.slane %v4357_v42, 1  ;;  %v412_v24 = vrot.slane %v4370_v8, 1 }
  0x46   : > { %v921_v58 = vadd.f32 %v897_v39, %v869_v52  ;;  %v4379_v43 = vsel %vm371_vm2, %v353_v14, %v354_v57  ;;  %v389_v12 = vsel %vm371_vm2, %v352_v28, %v353_v14  ;;  %v922_v62 = vadd.f32 %v898_v29, %v870_v20  ;;  %v4425_v39 = vld [vmem:[%s4066_s15 + $0x68] sm:$0xff] }
  0x47   : > { %v4386_v63 = vsel %vm428_vm3, %v410_v44, %v411_v56  ;;  %v4390_v3 = vsel %vm308_vm0, 0.0, %v389_v12  ;;  %v531_v21 = vmul.f32 %v4080_v16, %v4268_v59  ;;  %v444_v32 = vsel %vm428_vm3, %v411_v56, %v412_v24 }
  0x48   : > { %v945_v22 = vadd.f32 %v921_v58, %v789_v2  ;;  %v532_v28 = vmul.f32 %v4080_v16, %v4264_v51  ;;  %v559_v37 = vmul.f32 %v4083_v17, %v4118_v33  ;;  %v946_v35 = vadd.f32 %v922_v62, %v790_v4  ;;  %v4430_v4 = vld [vmem:[%s4066_s15 + $0x70] sm:$0xff] }
  0x49   : > { %v4402_v44 = vsel %vm311_vm1, 0.0, %v444_v32  ;;  %v560_v36 = vmul.f32 %v4083_v17, %v4241_v60  ;;  %v611_v59 = vmul.f32 %v4086_v18, %v4276_v30  ;;  %v612_v0 = vmul.f32 %v4086_v18, %v4284_v61 }
  0x4a   : > { %v583_v48 = vadd.f32 %v559_v37, %v531_v21  ;;  %v663_v51 = vmul.f32 %v4090_v19, %v4330_v15  ;;  %v664_v33 = vmul.f32 %v4090_v19, %v4318_v55  ;;  %v967_v1 = vpack.c.bf16 %v946_v35, %v945_v22 }
  0x4b   : > { %v584_v49 = vadd.f32 %v560_v36, %v532_v28  ;;  %v691_v23 = vmul.f32 %v4105_v26, %v4251_v7  ;;  %v692_v60 = vmul.f32 %v4105_v26, %v4299_v25  ;;  %v743_v41 = vmul.f32 %v4224_v45, %v4326_v46 }
  0x4c   : > { %v635_v30 = vadd.f32 %v611_v59, %v583_v48  ;;  %v744_v61 = vmul.f32 %v4224_v45, %v4334_v53  ;;  %v819_v54 = vmul.f32 %v4227_v40, %v4390_v3  ;;  %3729 = vmatprep.mubr.bf16.mxu0 %v967_v1  ;;  %v820_v2 = vmul.f32 %v4227_v40, %v4379_v43 }
  0x4d   : > { %v636_v52 = vadd.f32 %v612_v0, %v584_v49  ;;  %v715_v29 = vadd.f32 %v691_v23, %v663_v51  ;;  %v716_v14 = vadd.f32 %v692_v60, %v664_v33  ;;  %v847_v20 = vmul.f32 %v4230_v47, %v4306_v38 }
  0x4e   : > { %v848_v56 = vmul.f32 %v4230_v47, %v4357_v42  ;;  %v899_v58 = vmul.f32 %v4233_v50, %v4386_v63  ;;  %v900_v12 = vmul.f32 %v4233_v50, %v4402_v44  ;;  %v355_v22 = vrot.slane %v4370_v8, 7 }
  0x4f   : > { %v767_v62 = vadd.f32 %v743_v41, %v715_v29  ;;  %v768_v21 = vadd.f32 %v744_v61, %v716_v14  ;;  %v356_v32 = vrot.slane %v4425_v39, 7  ;;  %v871_v28 = vadd.f32 %v847_v20, %v819_v54 }
  0x50   : > { %v872_v37 = vadd.f32 %v848_v56, %v820_v2  ;;  %v413_v35 = vrot.slane %v4425_v39, 1  ;;  %v414_v36 = vrot.slane %v4430_v4, 1  ;;  %v387_v51 = vsel %vm371_vm2, %v354_v57, %v355_v22 }
  0x51   : > { %v791_v59 = vadd.f32 %v767_v62, %v635_v30  ;;  %v792_v48 = vadd.f32 %v768_v21, %v636_v52  ;;  %v4446_v0 = vsel %vm371_vm2, %v355_v22, %v356_v32  ;;  %v923_v33 = vadd.f32 %v899_v58, %v871_v28 }
  0x52   : > { %v924_v1 = vadd.f32 %v900_v12, %v872_v37  ;;  %v442_v49 = vsel %vm428_vm3, %v413_v35, %v414_v36  ;;  %v4454_v23 = vsel %vm428_vm3, %v412_v24, %v413_v35  ;;  %v4458_v60 = vsel %vm308_vm0, 0.0, %v387_v51  ;;  %v4491_v12 = vld [vmem:[%s4066_s15 + $0x78] sm:$0xff]  ;;  %v4502_v51 = vld [vmem:[%s4066_s15 + $0x80] sm:$0xff] }
  0x53   : > { %v4462_v30 = vsel %vm311_vm1, 0.0, %v442_v49  ;;  %v533_v57 = vmul.f32 %v4080_v16, %v4330_v15  ;;  %v534_v41 = vmul.f32 %v4080_v16, %v4318_v55  ;;  %v947_v61 = vadd.f32 %v923_v33, %v791_v59 }
  0x54   : > { %v948_v54 = vadd.f32 %v924_v1, %v792_v48  ;;  %v561_v24 = vmul.f32 %v4083_v17, %v4251_v7  ;;  %v562_v52 = vmul.f32 %v4083_v17, %v4299_v25  ;;  %v613_v29 = vmul.f32 %v4086_v18, %v4326_v46 }
  0x55   : > { %v614_v14 = vmul.f32 %v4086_v18, %v4334_v53  ;;  %v665_v15 = vmul.f32 %v4090_v19, %v4390_v3  ;;  %v666_v55 = vmul.f32 %v4090_v19, %v4379_v43  ;;  %v693_v7 = vmul.f32 %v4105_v26, %v4306_v38 }
  0x56   : > { %v968_v2 = vpack.c.bf16 %v948_v54, %v947_v61  ;;  %v585_v20 = vadd.f32 %v561_v24, %v533_v57  ;;  %v586_v56 = vadd.f32 %v562_v52, %v534_v41  ;;  %v694_v25 = vmul.f32 %v4105_v26, %v4357_v42 }
  0x57   : > { %v745_v46 = vmul.f32 %v4224_v45, %v4386_v63  ;;  %v746_v53 = vmul.f32 %v4224_v45, %v4402_v44  ;;  %v821_v58 = vmul.f32 %v4227_v40, %v4458_v60  ;;  %v717_v22 = vadd.f32 %v693_v7, %v665_v15 }
  0x58   : > { %3730 = vmatmul.mubr.bf16.gmra.mxu0 %v968_v2  ;;  %v637_v62 = vadd.f32 %v613_v29, %v585_v20  ;;  %v638_v21 = vadd.f32 %v614_v14, %v586_v56  ;;  %v822_v28 = vmul.f32 %v4227_v40, %v4446_v0  ;;  %v718_v37 = vadd.f32 %v694_v25, %v666_v55 }
  0x59   : > { %v849_v35 = vmul.f32 %v4230_v47, %v4370_v8  ;;  %v850_v59 = vmul.f32 %v4230_v47, %v4425_v39  ;;  %v901_v48 = vmul.f32 %v4233_v50, %v4454_v23  ;;  %v769_v33 = vadd.f32 %v745_v46, %v717_v22 }
  0x5a   : > { %v902_v1 = vmul.f32 %v4233_v50, %v4462_v30  ;;  %v357_v49 = vrot.slane %v4430_v4, 7  ;;  %v358_v57 = vrot.slane %v4491_v12, 7  ;;  %v770_v41 = vadd.f32 %v746_v53, %v718_v37 }
  0x5b   : > { %v873_v61 = vadd.f32 %v849_v35, %v821_v58  ;;  %v874_v54 = vadd.f32 %v850_v59, %v822_v28  ;;  %v415_v24 = vrot.slane %v4491_v12, 1  ;;  %v793_v52 = vadd.f32 %v769_v33, %v637_v62 }
  0x5c   : > { %v4511_v29 = vsel %vm371_vm2, %v357_v49, %v358_v57  ;;  %v385_v14 = vsel %vm371_vm2, %v356_v32, %v357_v49  ;;  %v416_v15 = vrot.slane %v4502_v51, 1  ;;  %v794_v55 = vadd.f32 %v770_v41, %v638_v21  ;;  %v4559_v41 = vld [vmem:[%s4066_s15 + $0x88] sm:$0xff] }
  0x5d   : > { %v925_v2 = vadd.f32 %v901_v48, %v873_v61  ;;  %v926_v20 = vadd.f32 %v902_v1, %v874_v54  ;;  %v4518_v56 = vsel %vm428_vm3, %v414_v36, %v415_v24  ;;  %v4524_v25 = vsel %vm308_vm0, 0.0, %v385_v14  ;;  %v4566_v14 = vld [vmem:[%s4066_s15 + $0x90] sm:$0xff] }
  0x5e   : > { %v440_v7 = vsel %vm428_vm3, %v415_v24, %v416_v15  ;;  %v535_v46 = vmul.f32 %v4080_v16, %v4390_v3  ;;  %v536_v32 = vmul.f32 %v4080_v16, %v4379_v43  ;;  %v563_v36 = vmul.f32 %v4083_v17, %v4306_v38 }
  0x5f   : > { %v949_v53 = vadd.f32 %v925_v2, %v793_v52  ;;  %v950_v58 = vadd.f32 %v926_v20, %v794_v55  ;;  %v4532_v62 = vsel %vm311_vm1, 0.0, %v440_v7  ;;  %v564_v21 = vmul.f32 %v4083_v17, %v4357_v42 }
  0x60   : > { %v615_v22 = vmul.f32 %v4086_v18, %v4386_v63  ;;  %v616_v3 = vmul.f32 %v4086_v18, %v4402_v44  ;;  %v667_v43 = vmul.f32 %v4090_v19, %v4458_v60  ;;  %v587_v37 = vadd.f32 %v563_v36, %v535_v46 }
  0x61   : > { %v969_v28 = vpack.c.bf16 %v950_v58, %v949_v53  ;;  %v668_v35 = vmul.f32 %v4090_v19, %v4446_v0  ;;  %v695_v38 = vmul.f32 %v4105_v26, %v4370_v8  ;;  %v588_v42 = vadd.f32 %v564_v21, %v536_v32 }
  0x62   : > { %v696_v63 = vmul.f32 %v4105_v26, %v4425_v39  ;;  %v747_v59 = vmul.f32 %v4224_v45, %v4454_v23  ;;  %v748_v44 = vmul.f32 %v4224_v45, %v4462_v30  ;;  %v639_v48 = vadd.f32 %v615_v22, %v587_v37 }
  0x63   : > { %3733 = vmatprep.mubr.bf16.mxu0 %v969_v28  ;;  %v719_v33 = vadd.f32 %v695_v38, %v667_v43  ;;  %v823_v1 = vmul.f32 %v4227_v40, %v4524_v25  ;;  %v824_v49 = vmul.f32 %v4227_v40, %v4511_v29  ;;  %v640_v61 = vadd.f32 %v616_v3, %v588_v42 }
  0x64   : > { %v720_v54 = vadd.f32 %v696_v63, %v668_v35  ;;  %v851_v24 = vmul.f32 %v4230_v47, %v4430_v4  ;;  %v852_v52 = vmul.f32 %v4230_v47, %v4491_v12  ;;  %v903_v2 = vmul.f32 %v4233_v50, %v4518_v56 }
  0x65   : > { %v771_v55 = vadd.f32 %v747_v59, %v719_v33  ;;  %v904_v20 = vmul.f32 %v4233_v50, %v4532_v62  ;;  %v359_v7 = vrot.slane %v4502_v51, 7  ;;  %v360_v58 = vrot.slane %v4559_v41, 7 }
  0x66   : > { %v772_v46 = vadd.f32 %v748_v44, %v720_v54  ;;  %v875_v32 = vadd.f32 %v851_v24, %v823_v1  ;;  %v876_v53 = vadd.f32 %v852_v52, %v824_v49  ;;  %v417_v22 = vrot.slane %v4559_v41, 1 }
  0x67   : > { %v795_v36 = vadd.f32 %v771_v55, %v639_v48  ;;  %v383_v21 = vsel %vm371_vm2, %v358_v57, %v359_v7  ;;  %v418_v3 = vrot.slane %v4566_v14, 1  ;;  %v4580_v35 = vsel %vm371_vm2, %v359_v7, %v360_v58  ;;  %v4625_v7 = vld [vmem:[%s4066_s15 + $0x98] sm:$0xff] }
  0x68   : > { %v796_v43 = vadd.f32 %v772_v46, %v640_v61  ;;  %v927_v28 = vadd.f32 %v903_v2, %v875_v32  ;;  %v928_v37 = vadd.f32 %v904_v20, %v876_v53  ;;  %v4586_v42 = vsel %vm428_vm3, %v416_v15, %v417_v22 }
  0x69   : > { %v438_v38 = vsel %vm428_vm3, %v417_v22, %v418_v3  ;;  %v4590_v57 = vsel %vm308_vm0, 0.0, %v383_v21  ;;  %v537_v63 = vmul.f32 %v4080_v16, %v4458_v60  ;;  %v538_v33 = vmul.f32 %v4080_v16, %v4446_v0  ;;  %v4630_v21 = vld [vmem:[%s4066_s15 + $0xa0] sm:$0xff] }
  0x6a   : > { %v951_v59 = vadd.f32 %v927_v28, %v795_v36  ;;  %v952_v44 = vadd.f32 %v928_v37, %v796_v43  ;;  %v4596_v48 = vsel %vm311_vm1, 0.0, %v438_v38  ;;  %v565_v15 = vmul.f32 %v4083_v17, %v4370_v8 }
  0x6b   : > { %v566_v1 = vmul.f32 %v4083_v17, %v4425_v39  ;;  %v617_v49 = vmul.f32 %v4086_v18, %v4454_v23  ;;  %v618_v60 = vmul.f32 %v4086_v18, %v4462_v30  ;;  %v669_v54 = vmul.f32 %v4090_v19, %v4524_v25 }
  0x6c   : > { %v970_v61 = vpack.c.bf16 %v952_v44, %v951_v59  ;;  %v670_v0 = vmul.f32 %v4090_v19, %v4511_v29  ;;  %v697_v8 = vmul.f32 %v4105_v26, %v4430_v4  ;;  %v589_v24 = vadd.f32 %v565_v15, %v537_v63 }
  0x6d   : > { %v590_v39 = vadd.f32 %v566_v1, %v538_v33  ;;  %v698_v52 = vmul.f32 %v4105_v26, %v4491_v12  ;;  %v749_v23 = vmul.f32 %v4224_v45, %v4518_v56  ;;  %v750_v55 = vmul.f32 %v4224_v45, %v4532_v62 }
  0x6e   : > { %3734 = vmatmul.mubr.bf16.gmra.mxu0 %v970_v61  ;;  %v721_v30 = vadd.f32 %v697_v8, %v669_v54  ;;  %v825_v2 = vmul.f32 %v4227_v40, %v4590_v57  ;;  %v826_v20 = vmul.f32 %v4227_v40, %v4580_v35  ;;  %v641_v46 = vadd.f32 %v617_v49, %v589_v24 }
  0x6f   : > { %v642_v32 = vadd.f32 %v618_v60, %v590_v39  ;;  %v722_v53 = vadd.f32 %v698_v52, %v670_v0  ;;  %v853_v36 = vmul.f32 %v4230_v47, %v4502_v51  ;;  %v854_v43 = vmul.f32 %v4230_v47, %v4559_v41 }
  0x70   : > { %v773_v22 = vadd.f32 %v749_v23, %v721_v30  ;;  %v905_v28 = vmul.f32 %v4233_v50, %v4586_v42  ;;  %v906_v37 = vmul.f32 %v4233_v50, %v4596_v48  ;;  %v361_v59 = vrot.slane %v4566_v14, 7 }
  0x71   : > { %v774_v38 = vadd.f32 %v750_v55, %v722_v53  ;;  %v877_v63 = vadd.f32 %v853_v36, %v825_v2  ;;  %v362_v44 = vrot.slane %v4625_v7, 7  ;;  %v878_v15 = vadd.f32 %v854_v43, %v826_v20 }
  0x72   : > { %v797_v33 = vadd.f32 %v773_v22, %v641_v46  ;;  %v419_v1 = vrot.slane %v4625_v7, 1  ;;  %v420_v49 = vrot.slane %v4630_v21, 1  ;;  %v381_v0 = vsel %vm371_vm2, %v360_v58, %v361_v59 }
  0x73   : > { %v798_v60 = vadd.f32 %v774_v38, %v642_v32  ;;  %v929_v61 = vadd.f32 %v905_v28, %v877_v63  ;;  %v4644_v54 = vsel %vm371_vm2, %v361_v59, %v362_v44  ;;  %v930_v8 = vadd.f32 %v906_v37, %v878_v15  ;;  %v4689_v37 = vld [vmem:[%s4066_s15 + $0xa8] sm:$0xff] }
  0x74   : > { %v436_v24 = vsel %vm428_vm3, %v419_v1, %v420_v49  ;;  %v4652_v39 = vsel %vm428_vm3, %v418_v3, %v419_v1  ;;  %v4656_v52 = vsel %vm308_vm0, 0.0, %v381_v0  ;;  %v539_v58 = vmul.f32 %v4080_v16, %v4524_v25  ;;  %v4700_v0 = vld [vmem:[%s4066_s15 + $0xb0] sm:$0xff] }
  0x75   : > { %v953_v23 = vadd.f32 %v929_v61, %v797_v33  ;;  %v4660_v30 = vsel %vm311_vm1, 0.0, %v436_v24  ;;  %v540_v55 = vmul.f32 %v4080_v16, %v4511_v29  ;;  %v954_v2 = vadd.f32 %v930_v8, %v798_v60 }
  0x76   : > { %v567_v3 = vmul.f32 %v4083_v17, %v4430_v4  ;;  %v568_v20 = vmul.f32 %v4083_v17, %v4491_v12  ;;  %v619_v46 = vmul.f32 %v4086_v18, %v4518_v56  ;;  %v620_v32 = vmul.f32 %v4086_v18, %v4532_v62 }
  0x77   : > { %v671_v25 = vmul.f32 %v4090_v19, %v4590_v57  ;;  %v672_v29 = vmul.f32 %v4090_v19, %v4580_v35  ;;  %v699_v53 = vmul.f32 %v4105_v26, %v4502_v51  ;;  %v971_v36 = vpack.c.bf16 %v954_v2, %v953_v23 }
  0x78   : > { %v591_v4 = vadd.f32 %v567_v3, %v539_v58  ;;  %v592_v22 = vadd.f32 %v568_v20, %v540_v55  ;;  %v700_v12 = vmul.f32 %v4105_v26, %v4559_v41  ;;  %v751_v62 = vmul.f32 %v4224_v45, %v4586_v42 }
  0x79   : > { %v723_v56 = vadd.f32 %v699_v53, %v671_v25  ;;  %v752_v43 = vmul.f32 %v4224_v45, %v4596_v48  ;;  %v827_v28 = vmul.f32 %v4227_v40, %v4656_v52  ;;  %3737 = vmatprep.mubr.bf16.mxu0 %v971_v36  ;;  %v828_v33 = vmul.f32 %v4227_v40, %v4644_v54 }
  0x7a   : > { %v643_v38 = vadd.f32 %v619_v46, %v591_v4  ;;  %v644_v63 = vadd.f32 %v620_v32, %v592_v22  ;;  %v724_v59 = vadd.f32 %v700_v12, %v672_v29  ;;  %v855_v1 = vmul.f32 %v4230_v47, %v4566_v14 }
  0x7b   : > { %v775_v15 = vadd.f32 %v751_v62, %v723_v56  ;;  %v856_v60 = vmul.f32 %v4230_v47, %v4625_v7  ;;  %v907_v61 = vmul.f32 %v4233_v50, %v4652_v39  ;;  %v908_v24 = vmul.f32 %v4233_v50, %v4660_v30 }
  0x7c   : > { %v776_v8 = vadd.f32 %v752_v43, %v724_v59  ;;  %v363_v23 = vrot.slane %v4630_v21, 7  ;;  %v364_v58 = vrot.slane %v4689_v37, 7  ;;  %v879_v2 = vadd.f32 %v855_v1, %v827_v28 }
  0x7d   : > { %v799_v55 = vadd.f32 %v775_v15, %v643_v38  ;;  %v880_v3 = vadd.f32 %v856_v60, %v828_v33  ;;  %v421_v20 = vrot.slane %v4689_v37, 1  ;;  %v422_v29 = vrot.slane %v4700_v0, 1 }
  0x7e   : > { %v800_v46 = vadd.f32 %v776_v8, %v644_v63  ;;  %v4709_v32 = vsel %vm371_vm2, %v363_v23, %v364_v58  ;;  %v379_v25 = vsel %vm371_vm2, %v362_v44, %v363_v23  ;;  %v931_v53 = vadd.f32 %v907_v61, %v879_v2  ;;  %v4753_v61 = vld [vmem:[%s4066_s15 + $0xb8] sm:$0xff] }
  0x7f   : > { %v932_v36 = vadd.f32 %v908_v24, %v880_v3  ;;  %v4716_v4 = vsel %vm428_vm3, %v420_v49, %v421_v20  ;;  %v4720_v22 = vsel %vm308_vm0, 0.0, %v379_v25  ;;  %v434_v12 = vsel %vm428_vm3, %v421_v20, %v422_v29  ;;  %v4766_v25 = vld [vmem:[%s4066_s15 + $0xc0] sm:$0xff] }
  0x80   : > { %v541_v56 = vmul.f32 %v4080_v16, %v4590_v57  ;;  %v542_v44 = vmul.f32 %v4080_v16, %v4580_v35  ;;  %v569_v62 = vmul.f32 %v4083_v17, %v4502_v51  ;;  %v955_v43 = vadd.f32 %v931_v53, %v799_v55 }
  0x81   : > { %v956_v49 = vadd.f32 %v932_v36, %v800_v46  ;;  %v4732_v28 = vsel %vm311_vm1, 0.0, %v434_v12  ;;  %v570_v38 = vmul.f32 %v4083_v17, %v4559_v41  ;;  %v621_v57 = vmul.f32 %v4086_v18, %v4586_v42 }
  0x82   : > { %v593_v63 = vadd.f32 %v569_v62, %v541_v56  ;;  %v622_v35 = vmul.f32 %v4086_v18, %v4596_v48  ;;  %v673_v51 = vmul.f32 %v4090_v19, %v4656_v52  ;;  %v674_v15 = vmul.f32 %v4090_v19, %v4644_v54 }
  0x83   : > { %v972_v59 = vpack.c.bf16 %v956_v49, %v955_v43  ;;  %v594_v33 = vadd.f32 %v570_v38, %v542_v44  ;;  %v701_v1 = vmul.f32 %v4105_v26, %v4566_v14  ;;  %v702_v60 = vmul.f32 %v4105_v26, %v4625_v7 }
  0x84   : > { %v645_v41 = vadd.f32 %v621_v57, %v593_v63  ;;  %v753_v42 = vmul.f32 %v4224_v45, %v4652_v39  ;;  %v754_v48 = vmul.f32 %v4224_v45, %v4660_v30  ;;  %v829_v23 = vmul.f32 %v4227_v40, %v4720_v22 }
  0x85   : > { %3738 = vmatmul.mubr.bf16.gmra.mxu0 %v972_v59  ;;  %v646_v8 = vadd.f32 %v622_v35, %v594_v33  ;;  %v725_v24 = vadd.f32 %v701_v1, %v673_v51  ;;  %v830_v55 = vmul.f32 %v4227_v40, %v4709_v32  ;;  %v726_v2 = vadd.f32 %v702_v60, %v674_v15 }
  0x86   : > { %v857_v3 = vmul.f32 %v4230_v47, %v4630_v21  ;;  %v858_v20 = vmul.f32 %v4230_v47, %v4689_v37  ;;  %v909_v46 = vmul.f32 %v4233_v50, %v4716_v4  ;;  %v910_v36 = vmul.f32 %v4233_v50, %v4732_v28 }
  0x87   : > { %v777_v53 = vadd.f32 %v753_v42, %v725_v24  ;;  %v365_v12 = vrot.slane %v4700_v0, 7  ;;  %v366_v56 = vrot.slane %v4753_v61, 7  ;;  %v778_v44 = vadd.f32 %v754_v48, %v726_v2 }
  0x88   : > { %v881_v62 = vadd.f32 %v857_v3, %v829_v23  ;;  %v882_v43 = vadd.f32 %v858_v20, %v830_v55  ;;  %v423_v49 = vrot.slane %v4753_v61, 1  ;;  %v424_v35 = vrot.slane %v4766_v25, 1 }
  0x89   : > { %v801_v38 = vadd.f32 %v777_v53, %v645_v41  ;;  %v4775_v63 = vsel %vm371_vm2, %v365_v12, %v366_v56  ;;  %v377_v57 = vsel %vm371_vm2, %v364_v58, %v365_v12  ;;  %v802_v51 = vadd.f32 %v778_v44, %v646_v8  ;;  %v4823_v44 = vld [vmem:[%s4066_s15 + $0xc8] sm:$0xff] }
  0x8a   : > { %v933_v59 = vadd.f32 %v909_v46, %v881_v62  ;;  %v934_v33 = vadd.f32 %v910_v36, %v882_v43  ;;  %v4782_v15 = vsel %vm428_vm3, %v422_v29, %v423_v49  ;;  %v432_v1 = vsel %vm428_vm3, %v423_v49, %v424_v35 }
  0x8b   : > { %v4788_v41 = vsel %vm308_vm0, 0.0, %v377_v57  ;;  %v543_v60 = vmul.f32 %v4080_v16, %v4656_v52  ;;  %v544_v58 = vmul.f32 %v4080_v16, %v4644_v54  ;;  %v4796_v8 = vsel %vm311_vm1, 0.0, %v432_v1  ;;  %v4830_v57 = vld [vmem:[%s4066_s15 + $0xd0] sm:$0xff] }
  0x8c   : > { %v957_v42 = vadd.f32 %v933_v59, %v801_v38  ;;  %v958_v48 = vadd.f32 %v934_v33, %v802_v51  ;;  %v571_v29 = vmul.f32 %v4083_v17, %v4566_v14  ;;  %v572_v24 = vmul.f32 %v4083_v17, %v4625_v7 }
  0x8d   : > { %v623_v23 = vmul.f32 %v4086_v18, %v4652_v39  ;;  %v624_v52 = vmul.f32 %v4086_v18, %v4660_v30  ;;  %v675_v54 = vmul.f32 %v4090_v19, %v4720_v22  ;;  %v676_v3 = vmul.f32 %v4090_v19, %v4709_v32 }
  0x8e   : > { %v973_v55 = vpack.c.bf16 %v958_v48, %v957_v42  ;;  %v595_v2 = vadd.f32 %v571_v29, %v543_v60  ;;  %v703_v14 = vmul.f32 %v4105_v26, %v4630_v21  ;;  %v596_v7 = vadd.f32 %v572_v24, %v544_v58 }
  0x8f   : > { %v704_v39 = vmul.f32 %v4105_v26, %v4689_v37  ;;  %v755_v20 = vmul.f32 %v4224_v45, %v4716_v4  ;;  %v756_v30 = vmul.f32 %v4224_v45, %v4732_v28  ;;  %v831_v36 = vmul.f32 %v4227_v40, %v4788_v41 }
  0x90   : > { %3741 = vmatprep.mubr.bf16.mxu0 %v973_v55  ;;  %v647_v46 = vadd.f32 %v623_v23, %v595_v2  ;;  %v727_v53 = vadd.f32 %v703_v14, %v675_v54  ;;  %v832_v12 = vmul.f32 %v4227_v40, %v4775_v63  ;;  %v648_v62 = vadd.f32 %v624_v52, %v596_v7 }
  0x91   : > { %v728_v43 = vadd.f32 %v704_v39, %v676_v3  ;;  %v859_v49 = vmul.f32 %v4230_v47, %v4700_v0  ;;  %v860_v38 = vmul.f32 %v4230_v47, %v4753_v61  ;;  %v911_v59 = vmul.f32 %v4233_v50, %v4782_v15 }
  0x92   : > { %v779_v51 = vadd.f32 %v755_v20, %v727_v53  ;;  %v912_v33 = vmul.f32 %v4233_v50, %v4796_v8  ;;  %v367_v1 = vrot.slane %v4766_v25, 7  ;;  %v368_v48 = vrot.slane %v4823_v44, 7 }
  0x93   : > { %v780_v60 = vadd.f32 %v756_v30, %v728_v43  ;;  %v883_v58 = vadd.f32 %v859_v49, %v831_v36  ;;  %v884_v42 = vadd.f32 %v860_v38, %v832_v12  ;;  %v425_v23 = vrot.slane %v4823_v44, 1 }
  0x94   : > { %v803_v29 = vadd.f32 %v779_v51, %v647_v46  ;;  %v375_v24 = vsel %vm371_vm2, %v366_v56, %v367_v1  ;;  %v426_v52 = vrot.slane %v4830_v57, 1  ;;  %v374_v3 = vsel %vm371_vm2, %v367_v1, %v368_v48 }
  0x95   : > { %v804_v54 = vadd.f32 %v780_v60, %v648_v62  ;;  %v935_v55 = vadd.f32 %v911_v59, %v883_v58  ;;  %v936_v2 = vadd.f32 %v912_v33, %v884_v42  ;;  %v4848_v7 = vsel %vm428_vm3, %v424_v35, %v425_v23 }
  0x96   : > { %v430_v14 = vsel %vm428_vm3, %v425_v23, %v426_v52  ;;  %v485_v56 = vsel %vm308_vm0, 0.0, %v375_v24  ;;  %v545_v39 = vmul.f32 %v4080_v16, %v4720_v22  ;;  %v546_v53 = vmul.f32 %v4080_v16, %v4709_v32 }
  0x97   : > { %v959_v20 = vadd.f32 %v935_v55, %v803_v29  ;;  %v960_v30 = vadd.f32 %v936_v2, %v804_v54  ;;  %v518_v46 = vsel %vm311_vm1, 0.0, %v430_v14  ;;  %v573_v36 = vmul.f32 %v4083_v17, %v4630_v21 }
  0x98   : > { %v574_v35 = vmul.f32 %v4083_v17, %v4689_v37  ;;  %v625_v12 = vmul.f32 %v4086_v18, %v4716_v4  ;;  %v626_v22 = vmul.f32 %v4086_v18, %v4732_v28  ;;  %v677_v43 = vmul.f32 %v4090_v19, %v4788_v41 }
  0x99   : > { %v974_v62 = vpack.c.bf16 %v960_v30, %v959_v20  ;;  %v678_v49 = vmul.f32 %v4090_v19, %v4775_v63  ;;  %v705_v32 = vmul.f32 %v4105_v26, %v4700_v0  ;;  %v597_v21 = vadd.f32 %v573_v36, %v545_v39  ;;  %v3853_v39 = vld [vmem:[%s4066_s15 + $0xd8] sm:$0xff] }
  0x9a   : > { %v598_v38 = vadd.f32 %v574_v35, %v546_v53  ;;  %v706_v37 = vmul.f32 %v4105_v26, %v4753_v61  ;;  %v757_v4 = vmul.f32 %v4224_v45, %v4782_v15  ;;  %v758_v51 = vmul.f32 %v4224_v45, %v4796_v8 }
  0x9b   : > { %3742 = vmatmul.mubr.bf16.gmra.mxu0 %v974_v62  ;;  %v729_v28 = vadd.f32 %v705_v32, %v677_v43  ;;  %v833_v59 = vmul.f32 %v4227_v40, %v485_v56  ;;  %v834_v33 = vmul.f32 %v4227_v40, %v374_v3  ;;  %v649_v1 = vadd.f32 %v625_v12, %v597_v21 }
  0x9c   : > { %v650_v60 = vadd.f32 %v626_v22, %v598_v38  ;;  %v730_v58 = vadd.f32 %v706_v37, %v678_v49  ;;  %v861_v42 = vmul.f32 %v4230_v47, %v4766_v25  ;;  %v862_v24 = vmul.f32 %v4230_v47, %v4823_v44 }
  0x9d   : > { %v781_v29 = vadd.f32 %v757_v4, %v729_v28  ;;  %v913_v23 = vmul.f32 %v4233_v50, %v4848_v7  ;;  %v914_v54 = vmul.f32 %v4233_v50, %v518_v46  ;;  %v369_v14 = vrot.slane %v4830_v57, 7 }
  0x9e   : > { %v782_v55 = vadd.f32 %v758_v51, %v730_v58  ;;  %v885_v2 = vadd.f32 %v861_v42, %v833_v59  ;;  %v427_v20 = vrot.slane %v3853_v39, 1  ;;  %v886_v53 = vadd.f32 %v862_v24, %v834_v33 }
  0x9f   : > { %v805_v30 = vadd.f32 %v781_v29, %v649_v1  ;;  %v547_v36 = vmul.f32 %v4080_v16, %v4788_v41  ;;  %v548_v35 = vmul.f32 %v4080_v16, %v4775_v63  ;;  %v372_v62 = vsel %vm371_vm2, %v369_v14, %v370_v34 }
  0xa0   : > { %v806_v12 = vadd.f32 %v782_v55, %v650_v60  ;;  %v937_v22 = vadd.f32 %v913_v23, %v885_v2  ;;  %v373_v43 = vsel %vm371_vm2, %v368_v48, %v369_v14  ;;  %v938_v49 = vadd.f32 %v914_v54, %v886_v53 }
  0xa1   : > { %v429_v32 = vsel %vm428_vm3, %v426_v52, %v427_v20  ;;  %v456_v41 = vsel %vm428_vm3, %v427_v20, %v400_v31  ;;  %v487_v16 = vsel %vm308_vm0, 0.0, %v373_v43  ;;  %v575_v34 = vmul.f32 %v4083_v17, %v4700_v0 }
  0xa2   : > { %v961_v63 = vadd.f32 %v937_v22, %v805_v30  ;;  %v520_v27 = vsel %vm311_vm1, 0.0, %v456_v41  ;;  %v576_v48 = vmul.f32 %v4083_v17, %v4753_v61  ;;  %v962_v21 = vadd.f32 %v938_v49, %v806_v12 }
  0xa3   : > { %v627_v13 = vmul.f32 %v4086_v18, %v4782_v15  ;;  %v628_v31 = vmul.f32 %v4086_v18, %v4796_v8  ;;  %v679_v52 = vmul.f32 %v4090_v19, %v485_v56  ;;  %v599_v38 = vadd.f32 %v575_v34, %v547_v36 }
  0xa4   : > { %v600_v37 = vadd.f32 %v576_v48, %v548_v35  ;;  %v680_v4 = vmul.f32 %v4090_v19, %v374_v3  ;;  %v707_v28 = vmul.f32 %v4105_v26, %v4766_v25  ;;  %v975_v0 = vpack.c.bf16 %v962_v21, %v961_v63 }
  0xa5   : > { %v708_v17 = vmul.f32 %v4105_v26, %v4823_v44  ;;  %v759_v61 = vmul.f32 %v4224_v45, %v4848_v7  ;;  %v760_v15 = vmul.f32 %v4224_v45, %v518_v46  ;;  %v651_v51 = vadd.f32 %v627_v13, %v599_v38 }
  0xa6   : > { %v652_v18 = vadd.f32 %v628_v31, %v600_v37  ;;  %v731_v8 = vadd.f32 %v707_v28, %v679_v52  ;;  %v835_v56 = vmul.f32 %v4227_v40, %v487_v16  ;;  %3745 = vmatprep.mubr.bf16.mxu0 %v975_v0  ;;  %v836_v19 = vmul.f32 %v4227_v40, %v372_v62 }
  0xa7   : > { %v732_v59 = vadd.f32 %v708_v17, %v680_v4  ;;  %v863_v25 = vmul.f32 %v4230_v47, %v4830_v57  ;;  %v864_v3 = vmul.f32 %v3853_v39, %v4230_v47  ;;  %v915_v44 = vmul.f32 %v4233_v50, %v429_v32  ;;  %v4936_v47 = vld [vmem:[%s6514_s3] ss:$0 sm:$0xff] }
  0xa8   : > { %v783_v26 = vadd.f32 %v759_v61, %v731_v8  ;;  %v916_v7 = vmul.f32 %v4233_v50, %v520_v27 }
  0xa9   : > { %v784_v45 = vadd.f32 %v760_v15, %v732_v59  ;;  %v887_v46 = vadd.f32 %v863_v25, %v835_v56  ;;  %v888_v33 = vadd.f32 %v864_v3, %v836_v19 }
  0xaa   : > { %v807_v1 = vadd.f32 %v783_v26, %v651_v51 }
  0xab   : > { %v808_v60 = vadd.f32 %v784_v45, %v652_v18  ;;  %v939_v58 = vadd.f32 %v915_v44, %v887_v46  ;;  %v940_v42 = vadd.f32 %v916_v7, %v888_v33 }
  0xad   : > { %v963_v29 = vadd.f32 %v939_v58, %v807_v1  ;;  %v964_v24 = vadd.f32 %v940_v42, %v808_v60 }
  0xaf   : > { %v976_v40 = vpack.c.bf16 %v964_v24, %v963_v29 }
  0xb1   : > { %3746 = vmatmul.mubr.bf16.gmra.mxu0 %v976_v40 }
 0x102   : > { %v3727_v57 = vpop.f32.mrf.mxu0 }
 0x103   : > { %v1091_v23 = vadd.f32 %v3727_v57, %v4936_v47 }
 0x104   : > { %v1082_v50 = vpop.f32.mrf.mxu0 }
 0x105   : > { %v1179_v54 = vmul.f32 0.01, %v1091_v23  ;;  %v1083_v55 = vadd.f32 %v4936_v47, %v1082_v50 }
 0x106   : > { %v3728_v2 = vpop.f32.mrf.mxu0 }
 0x107   : > { %v1203_v14 = vmax.f32 %v1091_v23, %v1179_v54  ;;  %v1177_v39 = vmul.f32 0.01, %v1083_v55  ;;  %v1094_v20 = vadd.f32 %v3728_v2, %v4936_v47 }
 0x108   : > { %v1085_v30 = vpop.f32.mrf.mxu0 }
 0x109   : > { %1227 = vst [vmem:[#allocation2 + $0x10] sm:$0xff] %v1203_v14  ;;  %v1201_v53 = vmax.f32 %v1083_v55, %v1177_v39  ;;  %v1180_v36 = vmul.f32 0.01, %v1094_v20  ;;  %v1086_v35 = vadd.f32 %v4936_v47, %v1085_v30 }
 0x10b   : > { %1225 = vst [vmem:[#allocation2 + $0xb0] sm:$0xff] %v1201_v53  ;;  %v1204_v12 = vmax.f32 %v1094_v20, %v1180_v36  ;;  %v1178_v22 = vmul.f32 0.01, %v1086_v35 }
 0x10d   : > { %1228 = vst [vmem:[#allocation2 + $0x48] sm:$0xff] %v1204_v12  ;;  %v1202_v62 = vmax.f32 %v1086_v35, %v1178_v22 }
 0x10f   : > { %1226 = vst [vmem:[#allocation2] sm:$0xff] %v1202_v62 }
 0x118   : > { %v3731_v43 = vpop.f32.mrf.mxu0 }
 0x119   : > { %v1107_v49 = vadd.f32 %v3731_v43, %v4936_v47 }
 0x11a   : > { %v1098_v32 = vpop.f32.mrf.mxu0 }
 0x11b   : > { %v1183_v41 = vmul.f32 0.01, %v1107_v49  ;;  %v1099_v16 = vadd.f32 %v4936_v47, %v1098_v32 }
 0x11c   : > { %v3732_v63 = vpop.f32.mrf.mxu0 }
 0x11d   : > { %v1207_v27 = vmax.f32 %v1107_v49, %v1183_v41  ;;  %v1181_v34 = vmul.f32 0.01, %v1099_v16  ;;  %v1110_v48 = vadd.f32 %v3732_v63, %v4936_v47 }
 0x11e   : > { %v1101_v21 = vpop.f32.mrf.mxu0 }
 0x11f   : > { %1231 = vst [vmem:[#allocation2 + $0x40] sm:$0xff] %v1207_v27  ;;  %v1205_v13 = vmax.f32 %v1099_v16, %v1181_v34  ;;  %v1184_v31 = vmul.f32 0.01, %v1110_v48  ;;  %v1102_v52 = vadd.f32 %v4936_v47, %v1101_v21 }
 0x121   : > { %1229 = vst [vmem:[#allocation2 + $0x60] sm:$0xff] %v1205_v13  ;;  %v1208_v38 = vmax.f32 %v1110_v48, %v1184_v31  ;;  %v1182_v37 = vmul.f32 0.01, %v1102_v52 }
 0x123   : > { %1232 = vst [vmem:[#allocation2 + $0x78] sm:$0xff] %v1208_v38  ;;  %v1206_v4 = vmax.f32 %v1102_v52, %v1182_v37 }
 0x125   : > { %1230 = vst [vmem:[#allocation2 + $0x28] sm:$0xff] %v1206_v4 }
 0x12e   : > { %v3735_v28 = vpop.f32.mrf.mxu0 }
 0x12f   : > { %v1123_v0 = vadd.f32 %v3735_v28, %v4936_v47 }
 0x130   : > { %v1114_v17 = vpop.f32.mrf.mxu0 }
 0x131   : > { %v1187_v61 = vmul.f32 0.01, %v1123_v0  ;;  %v1115_v15 = vadd.f32 %v4936_v47, %v1114_v17 }
 0x132   : > { %v3736_v51 = vpop.f32.mrf.mxu0 }
 0x133   : > { %v1211_v18 = vmax.f32 %v1123_v0, %v1187_v61  ;;  %v1185_v8 = vmul.f32 0.01, %v1115_v15  ;;  %v1126_v56 = vadd.f32 %v3736_v51, %v4936_v47 }
 0x134   : > { %v1117_v59 = vpop.f32.mrf.mxu0 }
 0x135   : > { %1235 = vst [vmem:[#allocation2 + $0x18] sm:$0xff] %v1211_v18  ;;  %v1209_v19 = vmax.f32 %v1115_v15, %v1185_v8  ;;  %v1188_v25 = vmul.f32 0.01, %v1126_v56  ;;  %v1118_v3 = vadd.f32 %v4936_v47, %v1117_v59 }
 0x137   : > { %1233 = vst [vmem:[#allocation2 + $0x88] sm:$0xff] %v1209_v19  ;;  %v1212_v26 = vmax.f32 %v1126_v56, %v1188_v25  ;;  %v1186_v44 = vmul.f32 0.01, %v1118_v3 }
 0x139   : > { %1236 = vst [vmem:[#allocation2 + $0x98] sm:$0xff] %v1212_v26  ;;  %v1210_v7 = vmax.f32 %v1118_v3, %v1186_v44 }
 0x13b   : > { %1234 = vst [vmem:[#allocation2 + $0x90] sm:$0xff] %v1210_v7 }
 0x145   : > { %v3739_v45 = vpop.f32.mrf.mxu0 }
 0x146   : > { %v1139_v46 = vadd.f32 %v3739_v45, %v4936_v47 }
 0x147   : > { %v1130_v33 = vpop.f32.mrf.mxu0 }
 0x148   : > { %v1191_v1 = vmul.f32 0.01, %v1139_v46  ;;  %v1131_v60 = vadd.f32 %v4936_v47, %v1130_v33 }
 0x149   : > { %v3740_v58 = vpop.f32.mrf.mxu0 }
 0x14a   : > { %v1215_v42 = vmax.f32 %v1139_v46, %v1191_v1  ;;  %v1189_v29 = vmul.f32 0.01, %v1131_v60  ;;  %v1142_v24 = vadd.f32 %v3740_v58, %v4936_v47 }
 0x14b   : > { %v1133_v40 = vpop.f32.mrf.mxu0 }
 0x14c   : > { %1239 = vst [vmem:[#allocation2 + $0x70] sm:$0xff] %v1215_v42  ;;  %v1213_v57 = vmax.f32 %v1131_v60, %v1189_v29  ;;  %v1192_v23 = vmul.f32 0.01, %v1142_v24  ;;  %v1134_v50 = vadd.f32 %v4936_v47, %v1133_v40 }
 0x14e   : > { %1237 = vst [vmem:[#allocation2 + $0x38] sm:$0xff] %v1213_v57  ;;  %v1216_v54 = vmax.f32 %v1142_v24, %v1192_v23  ;;  %v1190_v55 = vmul.f32 0.01, %v1134_v50 }
 0x150   : > { %1240 = vst [vmem:[#allocation2 + $0xa0] sm:$0xff] %v1216_v54  ;;  %v1214_v2 = vmax.f32 %v1134_v50, %v1190_v55 }
 0x152   : > { %1238 = vst [vmem:[#allocation2 + $0x50] sm:$0xff] %v1214_v2 }
 0x15b   : > { %v3743_v14 = vpop.f32.mrf.mxu0 }
 0x15c   : > { %v1155_v39 = vadd.f32 %v3743_v14, %v4936_v47 }
 0x15d   : > { %v1146_v20 = vpop.f32.mrf.mxu0 }
 0x15e   : > { %v1195_v30 = vmul.f32 0.01, %v1155_v39  ;;  %v1147_v53 = vadd.f32 %v4936_v47, %v1146_v20 }
 0x15f   : > { %v3744_v36 = vpop.f32.mrf.mxu0 }
 0x160   : > { %v1219_v35 = vmax.f32 %v1155_v39, %v1195_v30  ;;  %v1193_v12 = vmul.f32 0.01, %v1147_v53  ;;  %v1158_v22 = vadd.f32 %v3744_v36, %v4936_v47 }
 0x161   : > { %v1149_v62 = vpop.f32.mrf.mxu0 }
 0x162   : > { %1243 = vst [vmem:[#allocation2 + $0x30] sm:$0xff] %v1219_v35  ;;  %v1217_v43 = vmax.f32 %v1147_v53, %v1193_v12  ;;  %v1196_v49 = vmul.f32 0.01, %v1158_v22  ;;  %v1150_v32 = vadd.f32 %v4936_v47, %v1149_v62 }
 0x164   : > { %1241 = vst [vmem:[#allocation2 + $0xa8] sm:$0xff] %v1217_v43  ;;  %v1220_v41 = vmax.f32 %v1158_v22, %v1196_v49  ;;  %v1194_v16 = vmul.f32 0.01, %v1150_v32 }
 0x166   : > { %1244 = vst [vmem:[#allocation2 + $0x58] sm:$0xff] %v1220_v41  ;;  %v1218_v63 = vmax.f32 %v1150_v32, %v1194_v16 }
 0x168   : > { %1242 = vst [vmem:[#allocation2 + $0x68] sm:$0xff] %v1218_v63 }
 0x171   : > { %v3747_v27 = vpop.f32.mrf.mxu0 }
 0x172   : > { %v1171_v34 = vadd.f32 %v3747_v27, %v4936_v47 }
 0x173   : > { %v1162_v48 = vpop.f32.mrf.mxu0 }
 0x174   : > { %v1199_v21 = vmul.f32 0.01, %v1171_v34  ;;  %v1163_v13 = vadd.f32 %v4936_v47, %v1162_v48 }
 0x175   : > { %v3748_v31 = vpop.f32.mrf.mxu0 }
 0x176   : > { %v1223_v52 = vmax.f32 %v1171_v34, %v1199_v21  ;;  %v1197_v38 = vmul.f32 0.01, %v1163_v13  ;;  %v1174_v37 = vadd.f32 %v3748_v31, %v4936_v47 }
 0x177   : > { %v1165_v4 = vpop.f32.mrf.mxu0 }
 0x178   : > { %1247 = vst [vmem:[#allocation2 + $0x20] sm:$0xff] %v1223_v52  ;;  %v1221_v28 = vmax.f32 %v1163_v13, %v1197_v38  ;;  %v1200_v0 = vmul.f32 0.01, %v1174_v37  ;;  %v1166_v17 = vadd.f32 %v4936_v47, %v1165_v4 }
 0x17a   : > { %1245 = vst [vmem:[#allocation2 + $0x80] sm:$0xff] %v1221_v28  ;;  %v1224_v61 = vmax.f32 %v1174_v37, %v1200_v0  ;;  %v1198_v15 = vmul.f32 0.01, %v1166_v17  ;;  %1251 = sbr.rel (%p3283_p11) target bundleno = 386 (0x182), region = 52 }
 0x17c   : > { %1248 = vst [vmem:[#allocation2 + $0x8] sm:$0xff] %v1224_v61  ;;  %v1222_v51 = vmax.f32 %v1166_v17, %v1198_v15 }
 0x17e   : > { %1246 = vst [vmem:[#allocation2 + $0xb8] sm:$0xff] %v1222_v51 }
 0x17f   : > { %v3918_v18 = vmov 0.0  }
 0x180   : > { %1252 = vst [vmem:[#allocation2 + $0xb0] sm:$0xff] %v3918_v18  ;;  %1253 = vst [vmem:[#allocation2] sm:$0xff] %v3918_v18 }
 0x181   : > { %1254 = vst [vmem:[#allocation2 + $0x10] sm:$0xff] %v3918_v18  ;;  %1255 = vst [vmem:[#allocation2 + $0x48] sm:$0xff] %v3918_v18 }
 0x182 PF: > { %p3284_p12 = scmp.ne.s32.totalorder %s3900_s26, 1 }
 0x184   : > { %1258 = sbr.rel (%p3284_p12) target bundleno = 396 (0x18c), region = 56 }
 0x189   : > { %v3919_v47 = vmov 0.0  }
 0x18a   : > { %1260 = vst [vmem:[#allocation2 + $0x80] sm:$0xff] %v3919_v47  ;;  %1261 = vst [vmem:[#allocation2 + $0xb8] sm:$0xff] %v3919_v47 }
 0x18b   : > { %1262 = vst [vmem:[#allocation2 + $0x20] sm:$0xff] %v3919_v47  ;;  %1263 = vst [vmem:[#allocation2 + $0x8] sm:$0xff] %v3919_v47 }
 0x18c PF: > { %v3854_v8 = vld [vmem:[%s6516_s5 + $0x38] sm:$0xff]   ;;  %v3855_v56 = vld [vmem:[%s6516_s5 + $0x30] sm:$0xff]   ;;  %v3856_v59 = vld [vmem:[%s6516_s5 + $0x28] sm:$0xff]  }
 0x18d   : > { %3749 = vmatprep.subr.bf16.mxu1 %v3854_v8  ;;  %v3857_v19 = vld [vmem:[%s6516_s5 + $0x20] sm:$0xff]   ;;  %v4983_v25 = vld [vmem:[#allocation2 + $0xb0] sm:$0xff]  ;;  %v4989_v44 = vld [vmem:[#allocation2 + $0x48] sm:$0xff] }
 0x18e   : > { %3750 = vmatpush3.bf16.msra.mxu1 %v3854_v8  ;;  %v4985_v3 = vld [vmem:[#allocation2] sm:$0xff]  ;;  %v4987_v26 = vld [vmem:[#allocation2 + $0x10] sm:$0xff]  ;;  %v4993_v45 = vld [vmem:[#allocation2 + $0x28] sm:$0xff]  ;;  %v1291_v46 = vrot.slane %v4983_v25, 7  ;;  %v1294_v42 = vrot.slane %v4989_v44, 7  ;;  %v1339_v14 = vrot.slane %v4983_v25, 1 }
 0x18f   : > { %3751 = vmatprep.subr.bf16.mxu1 %v3855_v56  ;;  %v4991_v7 = vld [vmem:[#allocation2 + $0x60] sm:$0xff]  ;;  %v1292_v33 = vrot.slane %v4985_v3, 7  ;;  %v1293_v1 = vrot.slane %v4987_v26, 7  ;;  %v1296_v24 = vrot.slane %v4993_v45, 7  ;;  %v3858_v50 = vld [vmem:[%s6516_s5 + $0x18] sm:$0xff]   ;;  %v1340_v30 = vrot.slane %v4985_v3, 1 }
 0x190   : > { %v4998_v60 = vld [vmem:[#allocation2 + $0x40] sm:$0xff]  ;;  %v1295_v29 = vrot.slane %v4991_v7, 7  ;;  %v1341_v53 = vrot.slane %v4987_v26, 1  ;;  %v1342_v35 = vrot.slane %v4989_v44, 1  ;;  %v1343_v12 = vrot.slane %v4991_v7, 1  ;;  %v3859_v16 = vld [vmem:[%s6516_s5 + $0x10] sm:$0xff]  }
 0x191   : > { %v1297_v40 = vrot.slane %v4998_v60, 7  ;;  %v1336_v57 = vsel %vm371_vm2, %v1292_v33, %v1293_v1  ;;  %v1337_v23 = vsel %vm371_vm2, %v1291_v46, %v1292_v33  ;;  %v1335_v2 = vsel %vm371_vm2, %v1293_v1, %v1294_v42  ;;  %v1288_v62 = vld [vmem:[%s6515_s4] sm:$0x7]  ;;  %v1289_v63 = vld [vmem:[%s6515_s4 + $0x4] sm:$0x7]  ;;  %v3860_v47 = vld [vmem:[%s6516_s5 + $0x8] sm:$0xff]  }
 0x192   : > { %3752 = vmatpush3.bf16.msra.mxu1 %v3855_v56  ;;  %v5000_v58 = vld [vmem:[#allocation2 + $0x8] sm:$0xff]  ;;  %v1334_v55 = vsel %vm371_vm2, %v1294_v42, %v1295_v29  ;;  %v5027_v20 = vsel %vm371_vm2, %v1295_v29, %v1296_v24  ;;  %v1344_v22 = vrot.slane %v4993_v45, 1  ;;  %v1345_v43 = vrot.slane %v4998_v60, 1 }
 0x193   : > { %3753 = vmatprep.subr.bf16.mxu1 %v3856_v59  ;;  %v1314_v54 = vrot.slane %v5000_v58, 7  ;;  %v5023_v39 = vsel %vm371_vm2, %v1296_v24, %v1297_v40  ;;  %v1384_v49 = vsel %vm428_vm3, %v1340_v30, %v1341_v53  ;;  %v1385_v32 = vsel %vm428_vm3, %v1339_v14, %v1340_v30  ;;  %v1290_v27 = vld [vmem:[%s6515_s4 + $0x8] sm:$0x7] }
 0x194   : > { %v5061_v34 = vsel %vm428_vm3, %v1343_v12, %v1344_v22  ;;  %v1382_v48 = vsel %vm428_vm3, %v1342_v35, %v1343_v12  ;;  %v1383_v21 = vsel %vm428_vm3, %v1341_v53, %v1342_v35  ;;  %v1389_v13 = vsel %vm308_vm0, 0.0, %v1336_v57 }
 0x195   : > { %v1338_v36 = vsel %vm371_vm2, %v1314_v54, %v1291_v46  ;;  %v1380_v31 = vsel %vm428_vm3, %v1344_v22, %v1345_v43  ;;  %v1391_v52 = vsel %vm308_vm0, 0.0, %v1334_v55  ;;  %v1412_v38 = vsel %vm311_vm1, 0.0, %v1384_v49 }
 0x196   : > { %3754 = vmatpush3.bf16.msra.mxu1 %v3856_v59  ;;  %v1387_v41 = vsel %vm308_vm0, 0.0, %v1338_v36  ;;  %v1414_v37 = vsel %vm311_vm1, 0.0, %v1382_v48  ;;  %v1416_v4 = vsel %vm311_vm1, 0.0, %v1380_v31  ;;  %v5082_v28 = vrot.slane %v1288_v62, %v4052_v9 }
 0x197   : > { %3755 = vmatprep.subr.bf16.mxu1 %v3857_v19  ;;  %v5085_v0 = vrot.slane %v1288_v62, %v4055_v10  ;;  %v5088_v17 = vrot.slane %v1288_v62, %v4058_v11  ;;  %v5091_v61 = vrot.slane %v1289_v63, %v4052_v9  ;;  %v5094_v15 = vrot.slane %v1289_v63, %v4055_v10 }
 0x198   : > { %v5097_v51 = vrot.slane %v1289_v63, %v4058_v11  ;;  %v5100_v18 = vrot.slane %v1290_v27, %v4052_v9  ;;  %v1439_v8 = vmul.f32 %v5082_v28, %v1387_v41  ;;  %v1440_v56 = vmul.f32 %v5082_v28, %v1337_v23  ;;  %v5151_v41 = vld [vmem:[#allocation2 + $0x78] sm:$0xff] }
 0x199   : > { %v5108_v59 = vmul.f32 %v5082_v28, %v1389_v13  ;;  %v5114_v46 = vmul.f32 %v5082_v28, %v1391_v52  ;;  %v5118_v9 = vmul.f32 %v5082_v28, %v5027_v20  ;;  %v1463_v33 = vmul.f32 %v5085_v0, %v4983_v25 }
 0x19a   : > { %3756 = vmatpush3.bf16.msra.mxu1 %v3857_v19  ;;  %v5111_v19 = vmul.f32 %v5082_v28, %v1335_v2  ;;  %v1464_v1 = vmul.f32 %v5085_v0, %v4985_v3  ;;  %v1507_v42 = vmul.f32 %v5088_v17, %v1385_v32  ;;  %v1508_v29 = vmul.f32 %v5088_v17, %v1412_v38  ;;  %v3861_v3 = vld [vmem:[%s6516_s5] sm:$0xff]  }
 0x19b   : > { %3757 = vmatprep.subr.bf16.mxu1 %v3858_v50  ;;  %v5127_v24 = vmul.f32 %v5088_v17, %v1383_v21  ;;  %v5130_v57 = vmul.f32 %v5088_v17, %v1414_v37  ;;  %v1483_v23 = vadd.f32 %v1463_v33, %v1439_v8  ;;  %v5134_v55 = vmul.f32 %v5088_v17, %v5061_v34 }
 0x19c   : > { %v5137_v30 = vmul.f32 %v5088_v17, %v1416_v4  ;;  %v1551_v53 = vmul.f32 %v5091_v61, %v1389_v13  ;;  %v1552_v36 = vmul.f32 %v5091_v61, %v1335_v2  ;;  %v1553_v35 = vmul.f32 %v5091_v61, %v1391_v52  ;;  %v5158_v13 = vld [vmem:[#allocation2 + $0x88] sm:$0xff] }
 0x19d   : > { %v1554_v12 = vmul.f32 %v5091_v61, %v5027_v20  ;;  %v1527_v22 = vadd.f32 %v1507_v42, %v1483_v23  ;;  %v1575_v49 = vmul.f32 %v5094_v15, %v4987_v26  ;;  %v1576_v32 = vmul.f32 %v5094_v15, %v4989_v44 }
 0x19e   : > { %3758 = vmatpush3.bf16.msra.mxu1 %v3858_v50  ;;  %v1484_v50 = vadd.f32 %v1464_v1, %v1440_v56  ;;  %v1620_v63 = vmul.f32 %v5097_v51, %v1414_v37  ;;  %v1621_v2 = vmul.f32 %v5097_v51, %v5061_v34  ;;  %v1622_v48 = vmul.f32 %v5097_v51, %v1416_v4 }
 0x19f   : > { %3759 = vmatprep.subr.bf16.mxu1 %v3859_v16  ;;  %v1595_v31 = vadd.f32 %v1575_v49, %v1551_v53  ;;  %v1596_v38 = vadd.f32 %v1576_v32, %v1552_v36  ;;  %v1683_v8 = vmul.f32 %v5100_v18, %v1391_v52  ;;  %v1684_v56 = vmul.f32 %v5100_v18, %v5027_v20 }
 0x1a0   : > { %v1528_v62 = vadd.f32 %v1508_v29, %v1484_v50  ;;  %v5167_v37 = vrot.slane %v1290_v27, %v4058_v11  ;;  %v1298_v33 = vrot.slane %v5151_v41, 7  ;;  %v1346_v1 = vrot.slane %v5151_v41, 1 }
 0x1a1   : > { %v1347_v29 = vrot.slane %v5158_v13, 1  ;;  %v5175_v52 = vsel %vm308_vm0, 0.0, %v5023_v39 }
 0x1a2   : > { %3760 = vmatpush3.bf16.msra.mxu1 %v3859_v16  ;;  %v1619_v16 = vmul.f32 %v5097_v51, %v1383_v21  ;;  %v5164_v21 = vrot.slane %v1290_v27, %v4055_v10  ;;  %v1751_v20 = vmul.f32 %v5167_v37, %v5061_v34  ;;  %v1752_v27 = vmul.f32 %v5167_v37, %v1416_v4 }
 0x1a3   : > { %3761 = vmatprep.subr.bf16.mxu1 %v3860_v47  ;;  %v5188_v39 = vsel %vm371_vm2, %v1297_v40, %v1298_v33  ;;  %v1378_v53 = vsel %vm428_vm3, %v1346_v1, %v1347_v29  ;;  %v5196_v34 = vsel %vm428_vm3, %v1345_v43, %v1346_v1  ;;  %v1466_v40 = vmul.f32 %v5085_v0, %v4989_v44 }
 0x1a4   : > { %v1639_v42 = vadd.f32 %v1619_v16, %v1595_v31  ;;  %v1707_v10 = vmul.f32 %v5164_v21, %v4991_v7  ;;  %v1708_v11 = vmul.f32 %v5164_v21, %v4993_v45  ;;  %v5200_v4 = vsel %vm311_vm1, 0.0, %v1378_v53 }
 0x1a5   : > { %v1685_v43 = vmul.f32 %v5100_v18, %v5175_v52  ;;  %v1709_v1 = vmul.f32 %v5164_v21, %v4998_v60 }
 0x1a6   : > { %3762 = vmatpush3.bf16.msra.mxu1 %v3860_v47  ;;  %v1640_v47 = vadd.f32 %v1620_v63, %v1596_v38  ;;  %v1659_v23 = vadd.f32 %v1639_v42, %v1527_v22  ;;  %v1727_v36 = vadd.f32 %v1707_v10, %v1683_v8  ;;  %v1728_v49 = vadd.f32 %v1708_v11, %v1684_v56 }
 0x1a7   : > { %3763 = vmatprep.subr.bf16.mxu1 %v3861_v3  ;;  %v1577_v22 = vmul.f32 %v5094_v15, %v4991_v7  ;;  %v1686_v63 = vmul.f32 %v5100_v18, %v5188_v39  ;;  %v1710_v42 = vmul.f32 %v5164_v21, %v5151_v41 }
 0x1a8   : > { %v1660_v50 = vadd.f32 %v1640_v47, %v1528_v62  ;;  %v1578_v62 = vmul.f32 %v5094_v15, %v4993_v45  ;;  %v1771_v32 = vadd.f32 %v1751_v20, %v1727_v36  ;;  %v1772_v16 = vadd.f32 %v1752_v27, %v1728_v49  ;;  %v5222_v27 = vld [vmem:[#allocation2 + $0x90] sm:$0xff] }
 0x1a9   : > { %v1597_v38 = vadd.f32 %v1577_v22, %v1553_v35  ;;  %v1729_v35 = vadd.f32 %v1709_v1, %v1685_v43  ;;  %v1754_v36 = vmul.f32 %v5167_v37, %v5200_v4  ;;  %v1467_v22 = vmul.f32 %v5085_v0, %v4991_v7 }
 0x1aa   : > { %3764 = vmatpush3.bf16.msra.mxu1 %v3861_v3  ;;  %v1465_v3 = vmul.f32 %v5085_v0, %v4987_v26  ;;  %v1486_v26 = vadd.f32 %v1466_v40, %v5111_v19  ;;  %v1598_v44 = vadd.f32 %v1578_v62, %v1554_v12  ;;  %v1791_v8 = vadd.f32 %v1771_v32, %v1659_v23 }
 0x1ab   : > { %v1792_v56 = vadd.f32 %v1772_v16, %v1660_v50  ;;  %v1641_v11 = vadd.f32 %v1621_v2, %v1597_v38  ;;  %v1730_v12 = vadd.f32 %v1710_v42, %v1686_v63  ;;  %v1753_v23 = vmul.f32 %v5167_v37, %v5196_v34 }
 0x1ac   : > { %v1485_v31 = vadd.f32 %v1465_v3, %v5108_v59  ;;  %v1530_v10 = vadd.f32 %v5130_v57, %v1486_v26  ;;  %v1642_v20 = vadd.f32 %v1622_v48, %v1598_v44  ;;  %v5224_v59 = vld [vmem:[#allocation2 + $0x18] sm:$0xff]  ;;  %v1300_v2 = vrot.slane %v5222_v27, 7 }
 0x1ad   : > { %v1811_v19 = vpack.c.bf16 %v1792_v56, %v1791_v8  ;;  %v1773_v57 = vadd.f32 %v1753_v23, %v1729_v35  ;;  %v1348_v48 = vrot.slane %v5222_v27, 1  ;;  %v1349_v49 = vrot.slane %v5224_v59, 1  ;;  %v5284_v35 = vld [vmem:[#allocation2 + $0x38] sm:$0xff] }
 0x1ae   : > { %v1529_v47 = vadd.f32 %v5127_v24, %v1485_v31  ;;  %v1662_v53 = vadd.f32 %v1642_v20, %v1530_v10  ;;  %v1299_v24 = vrot.slane %v5158_v13, 7  ;;  %v1774_v3 = vadd.f32 %v1754_v36, %v1730_v12 }
 0x1af   : > { %3765 = vmatprep.mubr.bf16.mxu1 %v1811_v19  ;;  %v1468_v62 = vmul.f32 %v5085_v0, %v4993_v45  ;;  %v1376_v43 = vsel %vm428_vm3, %v1348_v48, %v1349_v49  ;;  %v5248_v63 = vsel %vm428_vm3, %v1347_v29, %v1348_v48  ;;  %v1487_v45 = vadd.f32 %v1467_v22, %v5114_v46 }
 0x1b0   : > { %v1661_v50 = vadd.f32 %v1641_v11, %v1529_v47  ;;  %v1330_v40 = vsel %vm371_vm2, %v1298_v33, %v1299_v24  ;;  %v5242_v16 = vsel %vm371_vm2, %v1299_v24, %v1300_v2  ;;  %v1794_v31 = vadd.f32 %v1774_v3, %v1662_v53  ;;  %v5276_v11 = vld [vmem:[#allocation2 + $0x98] sm:$0xff] }
 0x1b1   : > { %v5252_v33 = vsel %vm308_vm0, 0.0, %v1330_v40  ;;  %v5256_v7 = vsel %vm311_vm1, 0.0, %v1376_v43  ;;  %v1488_v26 = vadd.f32 %v1468_v62, %v5118_v9  ;;  %v1555_v38 = vmul.f32 %v5091_v61, %v5175_v52 }
 0x1b2   : > { %v1793_v32 = vadd.f32 %v1773_v57, %v1661_v50  ;;  %v1556_v29 = vmul.f32 %v5091_v61, %v5188_v39  ;;  %v1579_v44 = vmul.f32 %v5094_v15, %v4998_v60  ;;  %v1531_v56 = vadd.f32 %v5134_v55, %v1487_v45 }
 0x1b3   : > { %v1580_v1 = vmul.f32 %v5094_v15, %v5151_v41  ;;  %v1623_v46 = vmul.f32 %v5097_v51, %v5196_v34  ;;  %v1532_v9 = vadd.f32 %v5137_v30, %v1488_v26  ;;  %v1624_v47 = vmul.f32 %v5097_v51, %v5200_v4 }
 0x1b4   : > { %v1812_v8 = vpack.c.bf16 %v1794_v31, %v1793_v32  ;;  %v1599_v42 = vadd.f32 %v1579_v44, %v1555_v38  ;;  %v1687_v10 = vmul.f32 %v5100_v18, %v5252_v33  ;;  %v1688_v55 = vmul.f32 %v5100_v18, %v5242_v16 }
 0x1b5   : > { %v1600_v20 = vadd.f32 %v1580_v1, %v1556_v29  ;;  %v1711_v19 = vmul.f32 %v5164_v21, %v5158_v13  ;;  %v1712_v30 = vmul.f32 %v5164_v21, %v5222_v27  ;;  %v1755_v23 = vmul.f32 %v5167_v37, %v5248_v63 }
 0x1b6   : > { %3766 = vmatmul.mubr.bf16.vlgmr.msra.gmra.mxu1 %v1812_v8  ;;  %v1643_v12 = vadd.f32 %v1623_v46, %v1599_v42  ;;  %v1756_v50 = vmul.f32 %v5167_v37, %v5256_v7  ;;  %v1301_v53 = vrot.slane %v5224_v59, 7  ;;  %v1302_v48 = vrot.slane %v5276_v11, 7 }
 0x1b7   : > { %v1644_v36 = vadd.f32 %v1624_v47, %v1600_v20  ;;  %v1731_v24 = vadd.f32 %v1711_v19, %v1687_v10  ;;  %v1732_v57 = vadd.f32 %v1712_v30, %v1688_v55  ;;  %v1350_v22 = vrot.slane %v5276_v11, 1 }
 0x1b8   : > { %v1663_v3 = vadd.f32 %v1643_v12, %v1531_v56  ;;  %v1328_v40 = vsel %vm371_vm2, %v1300_v2, %v1301_v53  ;;  %v1351_v62 = vrot.slane %v5284_v35, 1  ;;  %v5298_v45 = vsel %vm371_vm2, %v1301_v53, %v1302_v48  ;;  %v5342_v12 = vld [vmem:[#allocation2 + $0x50] sm:$0xff] }
 0x1b9   : > { %v1664_v32 = vadd.f32 %v1644_v36, %v1532_v9  ;;  %v1775_v43 = vadd.f32 %v1755_v23, %v1731_v24  ;;  %v1776_v31 = vadd.f32 %v1756_v50, %v1732_v57  ;;  %v5304_v38 = vsel %vm428_vm3, %v1349_v49, %v1350_v22  ;;  %v5346_v24 = vld [vmem:[#allocation2 + $0x70] sm:$0xff] }
 0x1ba   : > { %v1374_v26 = vsel %vm428_vm3, %v1350_v22, %v1351_v62  ;;  %v5308_v2 = vsel %vm308_vm0, 0.0, %v1328_v40  ;;  %v1445_v29 = vmul.f32 %v5082_v28, %v5175_v52  ;;  %v1446_v1 = vmul.f32 %v5082_v28, %v5188_v39 }
 0x1bb   : > { %v1795_v44 = vadd.f32 %v1775_v43, %v1663_v3  ;;  %v1796_v8 = vadd.f32 %v1776_v31, %v1664_v32  ;;  %v5314_v56 = vsel %vm311_vm1, 0.0, %v1374_v26  ;;  %v1469_v49 = vmul.f32 %v5085_v0, %v4998_v60 }
 0x1bc   : > { %v1470_v46 = vmul.f32 %v5085_v0, %v5151_v41  ;;  %v1513_v9 = vmul.f32 %v5088_v17, %v5196_v34  ;;  %v1514_v52 = vmul.f32 %v5088_v17, %v5200_v4  ;;  %v1557_v47 = vmul.f32 %v5091_v61, %v5252_v33 }
 0x1bd   : > { %v1813_v42 = vpack.c.bf16 %v1796_v8, %v1795_v44  ;;  %v1558_v10 = vmul.f32 %v5091_v61, %v5242_v16  ;;  %v1581_v39 = vmul.f32 %v5094_v15, %v5158_v13  ;;  %v1489_v60 = vadd.f32 %v1469_v49, %v1445_v29 }
 0x1be   : > { %v1490_v20 = vadd.f32 %v1470_v46, %v1446_v1  ;;  %v1582_v41 = vmul.f32 %v5094_v15, %v5222_v27  ;;  %v1625_v34 = vmul.f32 %v5097_v51, %v5248_v63  ;;  %v1626_v55 = vmul.f32 %v5097_v51, %v5256_v7 }
 0x1bf   : > { %3769 = vmatprep.mubr.bf16.mxu1 %v1813_v42  ;;  %v1601_v4 = vadd.f32 %v1581_v39, %v1557_v47  ;;  %v1689_v19 = vmul.f32 %v5100_v18, %v5308_v2  ;;  %v1690_v30 = vmul.f32 %v5100_v18, %v5298_v45  ;;  %v1533_v23 = vadd.f32 %v1513_v9, %v1489_v60 }
 0x1c0   : > { %v1534_v50 = vadd.f32 %v1514_v52, %v1490_v20  ;;  %v1602_v53 = vadd.f32 %v1582_v41, %v1558_v10  ;;  %v1713_v36 = vmul.f32 %v5164_v21, %v5224_v59  ;;  %v1714_v3 = vmul.f32 %v5164_v21, %v5276_v11 }
 0x1c1   : > { %v1645_v57 = vadd.f32 %v1625_v34, %v1601_v4  ;;  %v1757_v40 = vmul.f32 %v5167_v37, %v5304_v38  ;;  %v1758_v22 = vmul.f32 %v5167_v37, %v5314_v56  ;;  %v1303_v31 = vrot.slane %v5284_v35, 7 }
 0x1c2   : > { %v1646_v32 = vadd.f32 %v1626_v55, %v1602_v53  ;;  %v1733_v43 = vadd.f32 %v1713_v36, %v1689_v19  ;;  %v1304_v26 = vrot.slane %v5342_v12, 7  ;;  %v1734_v44 = vadd.f32 %v1714_v3, %v1690_v30 }
 0x1c3   : > { %v1665_v29 = vadd.f32 %v1645_v57, %v1533_v23  ;;  %v1352_v8 = vrot.slane %v5342_v12, 1  ;;  %v1353_v1 = vrot.slane %v5346_v24, 1  ;;  %v1326_v52 = vsel %vm371_vm2, %v1302_v48, %v1303_v31  ;;  %v5404_v57 = vld [vmem:[#allocation2 + $0xa0] sm:$0xff] }
 0x1c4   : > { %v1666_v49 = vadd.f32 %v1646_v32, %v1534_v50  ;;  %v1777_v46 = vadd.f32 %v1757_v40, %v1733_v43  ;;  %v5360_v9 = vsel %vm371_vm2, %v1303_v31, %v1304_v26  ;;  %v1778_v42 = vadd.f32 %v1758_v22, %v1734_v44 }
 0x1c5   : > { %v1372_v47 = vsel %vm428_vm3, %v1352_v8, %v1353_v1  ;;  %v5368_v10 = vsel %vm428_vm3, %v1351_v62, %v1352_v8  ;;  %v5372_v39 = vsel %vm308_vm0, 0.0, %v1326_v52  ;;  %v1447_v48 = vmul.f32 %v5082_v28, %v5252_v33  ;;  %v5414_v8 = vld [vmem:[#allocation2 + $0xa8] sm:$0xff] }
 0x1c6   : > { %v1797_v60 = vadd.f32 %v1777_v46, %v1665_v29  ;;  %v5376_v20 = vsel %vm311_vm1, 0.0, %v1372_v47  ;;  %v1448_v41 = vmul.f32 %v5082_v28, %v5242_v16  ;;  %v1798_v34 = vadd.f32 %v1778_v42, %v1666_v49 }
 0x1c7   : > { %v1471_v62 = vmul.f32 %v5085_v0, %v5158_v13  ;;  %v1472_v4 = vmul.f32 %v5085_v0, %v5222_v27  ;;  %v1515_v55 = vmul.f32 %v5088_v17, %v5248_v63  ;;  %v1516_v19 = vmul.f32 %v5088_v17, %v5256_v7 }
 0x1c8   : > { %v1559_v30 = vmul.f32 %v5091_v61, %v5308_v2  ;;  %v1560_v33 = vmul.f32 %v5091_v61, %v5298_v45  ;;  %v1583_v16 = vmul.f32 %v5094_v15, %v5224_v59  ;;  %v1814_v23 = vpack.c.bf16 %v1798_v34, %v1797_v60 }
 0x1c9   : > { %v1491_v13 = vadd.f32 %v1471_v62, %v1447_v48  ;;  %v1492_v50 = vadd.f32 %v1472_v4, %v1448_v41  ;;  %v1584_v27 = vmul.f32 %v5094_v15, %v5276_v11  ;;  %v1627_v63 = vmul.f32 %v5097_v51, %v5304_v38 }
 0x1ca   : > { %v1603_v53 = vadd.f32 %v1583_v16, %v1559_v30  ;;  %v1628_v7 = vmul.f32 %v5097_v51, %v5314_v56  ;;  %v1691_v36 = vmul.f32 %v5100_v18, %v5372_v39  ;;  %3770 = vmatmul.mubr.bf16.gmra.mxu1 %v1814_v23  ;;  %v1692_v32 = vmul.f32 %v5100_v18, %v5360_v9 }
 0x1cb   : > { %v1535_v3 = vadd.f32 %v1515_v55, %v1491_v13  ;;  %v1536_v40 = vadd.f32 %v1516_v19, %v1492_v50  ;;  %v1604_v22 = vadd.f32 %v1584_v27, %v1560_v33  ;;  %v1715_v31 = vmul.f32 %v5164_v21, %v5284_v35 }
 0x1cc   : > { %v1647_v43 = vadd.f32 %v1627_v63, %v1603_v53  ;;  %v1716_v29 = vmul.f32 %v5164_v21, %v5342_v12  ;;  %v1759_v44 = vmul.f32 %v5167_v37, %v5368_v10  ;;  %v1760_v46 = vmul.f32 %v5167_v37, %v5376_v20 }
 0x1cd   : > { %v1648_v49 = vadd.f32 %v1628_v7, %v1604_v22  ;;  %v1305_v52 = vrot.slane %v5346_v24, 7  ;;  %v1306_v42 = vrot.slane %v5404_v57, 7  ;;  %v1735_v60 = vadd.f32 %v1715_v31, %v1691_v36 }
 0x1ce   : > { %v1667_v47 = vadd.f32 %v1647_v43, %v1535_v3  ;;  %v1736_v48 = vadd.f32 %v1716_v29, %v1692_v32  ;;  %v1354_v41 = vrot.slane %v5404_v57, 1  ;;  %v1355_v55 = vrot.slane %v5414_v8, 1  ;;  %v5466_v43 = vld [vmem:[#allocation2 + $0x68] sm:$0xff] }
 0x1cf   : > { %v1668_v34 = vadd.f32 %v1648_v49, %v1536_v40  ;;  %v5423_v62 = vsel %vm371_vm2, %v1305_v52, %v1306_v42  ;;  %v1324_v4 = vsel %vm371_vm2, %v1304_v26, %v1305_v52  ;;  %v1779_v19 = vadd.f32 %v1759_v44, %v1735_v60 }
 0x1d0   : > { %v1780_v30 = vadd.f32 %v1760_v46, %v1736_v48  ;;  %v5430_v33 = vsel %vm428_vm3, %v1353_v1, %v1354_v41  ;;  %v5434_v16 = vsel %vm308_vm0, 0.0, %v1324_v4  ;;  %v1370_v23 = vsel %vm428_vm3, %v1354_v41, %v1355_v55  ;;  %v5478_v48 = vld [vmem:[#allocation2 + $0x30] sm:$0xff] }
 0x1d1   : > { %v1449_v13 = vmul.f32 %v5082_v28, %v5308_v2  ;;  %v1450_v26 = vmul.f32 %v5082_v28, %v5298_v45  ;;  %v1473_v50 = vmul.f32 %v5085_v0, %v5224_v59  ;;  %v1799_v27 = vadd.f32 %v1779_v19, %v1667_v47 }
 0x1d2   : > { %v1800_v53 = vadd.f32 %v1780_v30, %v1668_v34  ;;  %v5446_v1 = vsel %vm311_vm1, 0.0, %v1370_v23  ;;  %v1474_v63 = vmul.f32 %v5085_v0, %v5276_v11  ;;  %v1517_v36 = vmul.f32 %v5088_v17, %v5304_v38 }
 0x1d3   : > { %v1493_v7 = vadd.f32 %v1473_v50, %v1449_v13  ;;  %v1518_v2 = vmul.f32 %v5088_v17, %v5314_v56  ;;  %v1561_v45 = vmul.f32 %v5091_v61, %v5372_v39  ;;  %v1562_v40 = vmul.f32 %v5091_v61, %v5360_v9 }
 0x1d4   : > { %v1815_v59 = vpack.c.bf16 %v1800_v53, %v1799_v27  ;;  %v1494_v3 = vadd.f32 %v1474_v63, %v1450_v26  ;;  %v1585_v22 = vmul.f32 %v5094_v15, %v5284_v35  ;;  %v1586_v11 = vmul.f32 %v5094_v15, %v5342_v12 }
 0x1d5   : > { %v1537_v32 = vadd.f32 %v1517_v36, %v1493_v7  ;;  %v1629_v38 = vmul.f32 %v5097_v51, %v5368_v10  ;;  %v1630_v56 = vmul.f32 %v5097_v51, %v5376_v20  ;;  %v1693_v44 = vmul.f32 %v5100_v18, %v5434_v16 }
 0x1d6   : > { %3773 = vmatprep.mubr.bf16.mxu1 %v1815_v59  ;;  %v1538_v31 = vadd.f32 %v1518_v2, %v1494_v3  ;;  %v1605_v29 = vadd.f32 %v1585_v22, %v1561_v45  ;;  %v1694_v49 = vmul.f32 %v5100_v18, %v5423_v62  ;;  %v1606_v46 = vadd.f32 %v1586_v11, %v1562_v40 }
 0x1d7   : > { %v1717_v52 = vmul.f32 %v5164_v21, %v5346_v24  ;;  %v1718_v47 = vmul.f32 %v5164_v21, %v5404_v57  ;;  %v1761_v60 = vmul.f32 %v5167_v37, %v5430_v33  ;;  %v1762_v34 = vmul.f32 %v5167_v37, %v5446_v1 }
 0x1d8   : > { %v1649_v41 = vadd.f32 %v1629_v38, %v1605_v29  ;;  %v1307_v4 = vrot.slane %v5414_v8, 7  ;;  %v1308_v19 = vrot.slane %v5466_v43, 7  ;;  %v1650_v30 = vadd.f32 %v1630_v56, %v1606_v46 }
 0x1d9   : > { %v1737_v23 = vadd.f32 %v1717_v52, %v1693_v44  ;;  %v1738_v13 = vadd.f32 %v1718_v47, %v1694_v49  ;;  %v1356_v26 = vrot.slane %v5466_v43, 1  ;;  %v1357_v63 = vrot.slane %v5478_v48, 1 }
 0x1da   : > { %v1669_v50 = vadd.f32 %v1649_v41, %v1537_v32  ;;  %v5487_v27 = vsel %vm371_vm2, %v1307_v4, %v1308_v19  ;;  %v1322_v53 = vsel %vm371_vm2, %v1306_v42, %v1307_v4  ;;  %v1670_v7 = vadd.f32 %v1650_v30, %v1538_v31  ;;  %v5534_v41 = vld [vmem:[#allocation2 + $0x58] sm:$0xff] }
 0x1db   : > { %v1781_v36 = vadd.f32 %v1761_v60, %v1737_v23  ;;  %v1782_v2 = vadd.f32 %v1762_v34, %v1738_v13  ;;  %v5494_v45 = vsel %vm428_vm3, %v1355_v55, %v1356_v26  ;;  %v1368_v59 = vsel %vm428_vm3, %v1356_v26, %v1357_v63  ;;  %v5540_v13 = vld [vmem:[#allocation2 + $0x80] sm:$0xff] }
 0x1dc   : > { %v5500_v3 = vsel %vm308_vm0, 0.0, %v1322_v53  ;;  %v1451_v40 = vmul.f32 %v5082_v28, %v5372_v39  ;;  %v1452_v42 = vmul.f32 %v5082_v28, %v5360_v9  ;;  %v5508_v11 = vsel %vm311_vm1, 0.0, %v1368_v59 }
 0x1dd   : > { %v1801_v22 = vadd.f32 %v1781_v36, %v1669_v50  ;;  %v1802_v32 = vadd.f32 %v1782_v2, %v1670_v7  ;;  %v1475_v55 = vmul.f32 %v5085_v0, %v5284_v35  ;;  %v1476_v38 = vmul.f32 %v5085_v0, %v5342_v12 }
 0x1de   : > { %v1519_v56 = vmul.f32 %v5088_v17, %v5368_v10  ;;  %v1520_v39 = vmul.f32 %v5088_v17, %v5376_v20  ;;  %v1563_v9 = vmul.f32 %v5091_v61, %v5434_v16  ;;  %v1564_v44 = vmul.f32 %v5091_v61, %v5423_v62 }
 0x1df   : > { %v1816_v31 = vpack.c.bf16 %v1802_v32, %v1801_v22  ;;  %v1495_v29 = vadd.f32 %v1475_v55, %v1451_v40  ;;  %v1587_v35 = vmul.f32 %v5094_v15, %v5346_v24  ;;  %v1496_v49 = vadd.f32 %v1476_v38, %v1452_v42 }
 0x1e0   : > { %v1588_v12 = vmul.f32 %v5094_v15, %v5404_v57  ;;  %v1631_v10 = vmul.f32 %v5097_v51, %v5430_v33  ;;  %v1632_v20 = vmul.f32 %v5097_v51, %v5446_v1  ;;  %v1695_v47 = vmul.f32 %v5100_v18, %v5500_v3 }
 0x1e1   : > { %3774 = vmatmul.mubr.bf16.gmra.mxu1 %v1816_v31  ;;  %v1539_v46 = vadd.f32 %v1519_v56, %v1495_v29  ;;  %v1607_v52 = vadd.f32 %v1587_v35, %v1563_v9  ;;  %v1696_v60 = vmul.f32 %v5100_v18, %v5487_v27  ;;  %v1540_v34 = vadd.f32 %v1520_v39, %v1496_v49 }
 0x1e2   : > { %v1608_v4 = vadd.f32 %v1588_v12, %v1564_v44  ;;  %v1719_v30 = vmul.f32 %v5164_v21, %v5414_v8  ;;  %v1720_v23 = vmul.f32 %v5164_v21, %v5466_v43  ;;  %v1763_v50 = vmul.f32 %v5167_v37, %v5494_v45 }
 0x1e3   : > { %v1651_v26 = vadd.f32 %v1631_v10, %v1607_v52  ;;  %v1764_v53 = vmul.f32 %v5167_v37, %v5508_v11  ;;  %v1309_v7 = vrot.slane %v5478_v48, 7  ;;  %v1310_v40 = vrot.slane %v5534_v41, 7 }
 0x1e4   : > { %v1652_v36 = vadd.f32 %v1632_v20, %v1608_v4  ;;  %v1739_v2 = vadd.f32 %v1719_v30, %v1695_v47  ;;  %v1740_v59 = vadd.f32 %v1720_v23, %v1696_v60  ;;  %v1358_v32 = vrot.slane %v5534_v41, 1 }
 0x1e5   : > { %v1671_v42 = vadd.f32 %v1651_v26, %v1539_v46  ;;  %v1320_v22 = vsel %vm371_vm2, %v1308_v19, %v1309_v7  ;;  %v1359_v55 = vrot.slane %v5540_v13, 1  ;;  %v5554_v9 = vsel %vm371_vm2, %v1309_v7, %v1310_v40  ;;  %v5598_v26 = vld [vmem:[#allocation2 + $0xb8] sm:$0xff] }
 0x1e6   : > { %v1672_v38 = vadd.f32 %v1652_v36, %v1540_v34  ;;  %v1783_v56 = vadd.f32 %v1763_v50, %v1739_v2  ;;  %v1784_v39 = vadd.f32 %v1764_v53, %v1740_v59  ;;  %v5560_v29 = vsel %vm428_vm3, %v1357_v63, %v1358_v32  ;;  %v5602_v2 = vld [vmem:[#allocation2 + $0x20] sm:$0xff] }
 0x1e7   : > { %v1366_v31 = vsel %vm428_vm3, %v1358_v32, %v1359_v55  ;;  %v5564_v19 = vsel %vm308_vm0, 0.0, %v1320_v22  ;;  %v1453_v44 = vmul.f32 %v5082_v28, %v5434_v16  ;;  %v1454_v10 = vmul.f32 %v5082_v28, %v5423_v62 }
 0x1e8   : > { %v1803_v35 = vadd.f32 %v1783_v56, %v1671_v42  ;;  %v1804_v49 = vadd.f32 %v1784_v39, %v1672_v38  ;;  %v5570_v12 = vsel %vm311_vm1, 0.0, %v1366_v31  ;;  %v1477_v63 = vmul.f32 %v5085_v0, %v5346_v24 }
 0x1e9   : > { %v1478_v20 = vmul.f32 %v5085_v0, %v5404_v57  ;;  %v1521_v46 = vmul.f32 %v5088_v17, %v5430_v33  ;;  %v1522_v16 = vmul.f32 %v5088_v17, %v5446_v1  ;;  %v1565_v47 = vmul.f32 %v5091_v61, %v5500_v3 }
 0x1ea   : > { %v1817_v52 = vpack.c.bf16 %v1804_v49, %v1803_v35  ;;  %v1566_v60 = vmul.f32 %v5091_v61, %v5487_v27  ;;  %v1589_v62 = vmul.f32 %v5094_v15, %v5414_v8  ;;  %v1497_v24 = vadd.f32 %v1477_v63, %v1453_v44 }
 0x1eb   : > { %v1498_v34 = vadd.f32 %v1478_v20, %v1454_v10  ;;  %v1590_v57 = vmul.f32 %v5094_v15, %v5466_v43  ;;  %v1633_v33 = vmul.f32 %v5097_v51, %v5494_v45  ;;  %v1634_v4 = vmul.f32 %v5097_v51, %v5508_v11 }
 0x1ec   : > { %3777 = vmatprep.mubr.bf16.mxu1 %v1817_v52  ;;  %v1609_v1 = vadd.f32 %v1589_v62, %v1565_v47  ;;  %v1697_v30 = vmul.f32 %v5100_v18, %v5564_v19  ;;  %v1698_v23 = vmul.f32 %v5100_v18, %v5554_v9  ;;  %v1541_v50 = vadd.f32 %v1521_v46, %v1497_v24 }
 0x1ed   : > { %v1542_v53 = vadd.f32 %v1522_v16, %v1498_v34  ;;  %v1610_v7 = vadd.f32 %v1590_v57, %v1566_v60  ;;  %v1721_v36 = vmul.f32 %v5164_v21, %v5478_v48  ;;  %v1722_v42 = vmul.f32 %v5164_v21, %v5534_v41 }
 0x1ee   : > { %v1653_v59 = vadd.f32 %v1633_v33, %v1609_v1  ;;  %v1765_v22 = vmul.f32 %v5167_v37, %v5560_v29  ;;  %v1766_v32 = vmul.f32 %v5167_v37, %v5570_v12  ;;  %v1311_v39 = vrot.slane %v5540_v13, 7 }
 0x1ef   : > { %v1654_v38 = vadd.f32 %v1634_v4, %v1610_v7  ;;  %v1741_v56 = vadd.f32 %v1721_v36, %v1697_v30  ;;  %v1312_v31 = vrot.slane %v5598_v26, 7  ;;  %v1742_v35 = vadd.f32 %v1722_v42, %v1698_v23 }
 0x1f0   : > { %v1673_v44 = vadd.f32 %v1653_v59, %v1541_v50  ;;  %v1360_v49 = vrot.slane %v5598_v26, 1  ;;  %v1361_v10 = vrot.slane %v5602_v2, 1  ;;  %v1318_v16 = vsel %vm371_vm2, %v1310_v40, %v1311_v39 }
 0x1f1   : > { %v1674_v63 = vadd.f32 %v1654_v38, %v1542_v53  ;;  %v1785_v20 = vadd.f32 %v1765_v22, %v1741_v56  ;;  %v1317_v46 = vsel %vm371_vm2, %v1311_v39, %v1312_v31  ;;  %v1786_v52 = vadd.f32 %v1766_v32, %v1742_v35 }
 0x1f2   : > { %v1364_v47 = vsel %vm428_vm3, %v1360_v49, %v1361_v10  ;;  %v1365_v60 = vsel %vm428_vm3, %v1359_v55, %v1360_v49  ;;  %v1407_v62 = vsel %vm308_vm0, 0.0, %v1318_v16  ;;  %v1455_v57 = vmul.f32 %v5082_v28, %v5500_v3 }
 0x1f3   : > { %v1805_v24 = vadd.f32 %v1785_v20, %v1673_v44  ;;  %v1432_v34 = vsel %vm311_vm1, 0.0, %v1364_v47  ;;  %v1456_v40 = vmul.f32 %v5082_v28, %v5487_v27  ;;  %v1806_v33 = vadd.f32 %v1786_v52, %v1674_v63 }
 0x1f4   : > { %v1479_v1 = vmul.f32 %v5085_v0, %v5414_v8  ;;  %v1480_v55 = vmul.f32 %v5085_v0, %v5466_v43  ;;  %v1523_v4 = vmul.f32 %v5088_v17, %v5494_v45  ;;  %v1524_v30 = vmul.f32 %v5088_v17, %v5508_v11 }
 0x1f5   : > { %v1567_v23 = vmul.f32 %v5091_v61, %v5564_v19  ;;  %v1568_v3 = vmul.f32 %v5091_v61, %v5554_v9  ;;  %v1591_v27 = vmul.f32 %v5094_v15, %v5478_v48  ;;  %v1818_v50 = vpack.c.bf16 %v1806_v33, %v1805_v24 }
 0x1f6   : > { %v1499_v8 = vadd.f32 %v1479_v1, %v1455_v57  ;;  %v1500_v53 = vadd.f32 %v1480_v55, %v1456_v40  ;;  %v1592_v43 = vmul.f32 %v5094_v15, %v5534_v41  ;;  %v1635_v45 = vmul.f32 %v5097_v51, %v5560_v29 }
 0x1f7   : > { %v1611_v7 = vadd.f32 %v1591_v27, %v1567_v23  ;;  %v1636_v11 = vmul.f32 %v5097_v51, %v5570_v12  ;;  %v1699_v36 = vmul.f32 %v5100_v18, %v1407_v62  ;;  %3778 = vmatmul.mubr.bf16.gmra.mxu1 %v1818_v50  ;;  %v1700_v32 = vmul.f32 %v5100_v18, %v1317_v46 }
 0x1f8   : > { %v1543_v59 = vadd.f32 %v1523_v4, %v1499_v8  ;;  %v1544_v42 = vadd.f32 %v1524_v30, %v1500_v53  ;;  %v1612_v22 = vadd.f32 %v1592_v43, %v1568_v3  ;;  %v1723_v56 = vmul.f32 %v5164_v21, %v5540_v13 }
 0x1f9   : > { %v1655_v38 = vadd.f32 %v1635_v45, %v1611_v7  ;;  %v1724_v39 = vmul.f32 %v5164_v21, %v5598_v26  ;;  %v1767_v44 = vmul.f32 %v5167_v37, %v1365_v60  ;;  %v1768_v49 = vmul.f32 %v5167_v37, %v1432_v34 }
 0x1fa   : > { %v1656_v35 = vadd.f32 %v1636_v11, %v1612_v22  ;;  %v1313_v63 = vrot.slane %v5602_v2, 7  ;;  %v1362_v20 = vrot.slane %v5000_v58, 1  ;;  %v1743_v52 = vadd.f32 %v1723_v56, %v1699_v36 }
 0x1fb   : > { %v1675_v16 = vadd.f32 %v1655_v38, %v1543_v59  ;;  %v1744_v47 = vadd.f32 %v1724_v39, %v1700_v32  ;;  %v1457_v24 = vmul.f32 %v5082_v28, %v5564_v19  ;;  %v1526_v27 = vmul.f32 %v5088_v17, %v5570_v12 }
 0x1fc   : > { %v1676_v57 = vadd.f32 %v1656_v35, %v1544_v42  ;;  %v1315_v40 = vsel %vm371_vm2, %v1313_v63, %v1314_v54  ;;  %v1316_v33 = vsel %vm371_vm2, %v1312_v31, %v1313_v63  ;;  %v1363_v1 = vsel %vm428_vm3, %v1361_v10, %v1362_v20 }
 0x1fd   : > { %v1787_v55 = vadd.f32 %v1767_v44, %v1743_v52  ;;  %v1788_v4 = vadd.f32 %v1768_v49, %v1744_v47  ;;  %v1386_v30 = vsel %vm428_vm3, %v1362_v20, %v1339_v14  ;;  %v1409_v19 = vsel %vm308_vm0, 0.0, %v1316_v33 }
 0x1fe   : > { %v1434_v23 = vsel %vm311_vm1, 0.0, %v1386_v30  ;;  %v1458_v54 = vmul.f32 %v5082_v28, %v5554_v9  ;;  %v1481_v31 = vmul.f32 %v5085_v0, %v5478_v48  ;;  %v1482_v10 = vmul.f32 %v5085_v0, %v5534_v41 }
 0x1ff   : > { %v1807_v3 = vadd.f32 %v1787_v55, %v1675_v16  ;;  %v1808_v25 = vadd.f32 %v1788_v4, %v1676_v57  ;;  %v1525_v14 = vmul.f32 %v5088_v17, %v5560_v29  ;;  %v1569_v53 = vmul.f32 %v5091_v61, %v1407_v62 }
 0x200   : > { %v1501_v50 = vadd.f32 %v1481_v31, %v1457_v24  ;;  %v1502_v8 = vadd.f32 %v1482_v10, %v1458_v54  ;;  %v1570_v28 = vmul.f32 %v5091_v61, %v1317_v46  ;;  %v1593_v48 = vmul.f32 %v5094_v15, %v5540_v13 }
 0x201   : > { %v1819_v9 = vpack.c.bf16 %v1808_v25, %v1807_v3  ;;  %v1594_v0 = vmul.f32 %v5094_v15, %v5598_v26  ;;  %v1637_v41 = vmul.f32 %v5097_v51, %v1365_v60  ;;  %v1638_v7 = vmul.f32 %v5097_v51, %v1432_v34 }
 0x202   : > { %v1545_v43 = vadd.f32 %v1525_v14, %v1501_v50  ;;  %v1546_v29 = vadd.f32 %v1526_v27, %v1502_v8  ;;  %v1701_v17 = vmul.f32 %v5100_v18, %v1409_v19  ;;  %v1613_v12 = vadd.f32 %v1593_v48, %v1569_v53 }
 0x203   : > { %3781 = vmatprep.mubr.bf16.mxu1 %v1819_v9  ;;  %v1614_v62 = vadd.f32 %v1594_v0, %v1570_v28  ;;  %v1702_v61 = vmul.f32 %v5100_v18, %v1315_v40  ;;  %v1725_v46 = vmul.f32 %v5164_v21, %v5602_v2  ;;  %v1726_v13 = vmul.f32 %v5164_v21, %v5000_v58  ;;  %v5707_v58 = vld [vmem:[%s6517_s6] ss:$0 sm:$0xff] }
 0x204   : > { %v1769_v15 = vmul.f32 %v5167_v37, %v1363_v1  ;;  %v1770_v26 = vmul.f32 %v5167_v37, %v1434_v23  ;;  %v1657_v60 = vadd.f32 %v1637_v41, %v1613_v12 }
 0x205   : > { %v1658_v45 = vadd.f32 %v1638_v7, %v1614_v62  ;;  %v1745_v51 = vadd.f32 %v1725_v46, %v1701_v17  ;;  %v1746_v34 = vadd.f32 %v1726_v13, %v1702_v61 }
 0x206   : > { %v1677_v11 = vadd.f32 %v1657_v60, %v1545_v43 }
 0x207   : > { %v1678_v36 = vadd.f32 %v1658_v45, %v1546_v29  ;;  %v1789_v59 = vadd.f32 %v1769_v15, %v1745_v51  ;;  %v1790_v42 = vadd.f32 %v1770_v26, %v1746_v34 }
 0x209   : > { %v1809_v22 = vadd.f32 %v1789_v59, %v1677_v11  ;;  %v1810_v18 = vadd.f32 %v1790_v42, %v1678_v36 }
 0x20b   : > { %v1820_v32 = vpack.c.bf16 %v1810_v18, %v1809_v22 }
 0x20d   : > { %3782 = vmatmul.mubr.bf16.gmra.mxu1 %v1820_v32 }
 0x276   : > { %v3767_v21 = vpop.f32.mrf.mxu1 }
 0x277   : > { %v1935_v37 = vadd.f32 %v3767_v21, %v5707_v58 }
 0x278   : > { %v1926_v2 = vpop.f32.mrf.mxu1 }
 0x279   : > { %v2007_v38 = vmul.f32 0.01, %v1935_v37  ;;  %v1927_v56 = vadd.f32 %v5707_v58, %v1926_v2 }
 0x27a   : > { %v3768_v39 = vpop.f32.mrf.mxu1 }
 0x27b   : > { %v2027_v44 = vmax.f32 %v1935_v37, %v2007_v38  ;;  %v2005_v35 = vmul.f32 0.01, %v1927_v56  ;;  %v1938_v49 = vadd.f32 %v3768_v39, %v5707_v58 }
 0x27c   : > { %v1929_v63 = vpop.f32.mrf.mxu1 }
 0x27d   : > { %2047 = vst [vmem:[#allocation2 + $0x10] sm:$0xff] %v2027_v44  ;;  %v2025_v20 = vmax.f32 %v1927_v56, %v2005_v35  ;;  %v2008_v16 = vmul.f32 0.01, %v1938_v49  ;;  %v1930_v52 = vadd.f32 %v5707_v58, %v1929_v63 }
 0x27f   : > { %2045 = vst [vmem:[#allocation2 + $0xb0] sm:$0xff] %v2025_v20  ;;  %v2028_v47 = vmax.f32 %v1938_v49, %v2008_v16  ;;  %v2006_v24 = vmul.f32 0.01, %v1930_v52 }
 0x281   : > { %2048 = vst [vmem:[#allocation2 + $0x48] sm:$0xff] %v2028_v47  ;;  %v2026_v57 = vmax.f32 %v1930_v52, %v2006_v24 }
 0x283   : > { %2046 = vst [vmem:[#allocation2] sm:$0xff] %v2026_v57 }
 0x28a   : > { %v3771_v40 = vpop.f32.mrf.mxu1 }
 0x28b   : > { %v1951_v33 = vadd.f32 %v3771_v40, %v5707_v58 }
 0x28c   : > { %v1942_v1 = vpop.f32.mrf.mxu1 }
 0x28d   : > { %v2011_v55 = vmul.f32 0.01, %v1951_v33  ;;  %v1943_v4 = vadd.f32 %v5707_v58, %v1942_v1 }
 0x28e   : > { %v3772_v30 = vpop.f32.mrf.mxu1 }
 0x28f   : > { %v2031_v19 = vmax.f32 %v1951_v33, %v2011_v55  ;;  %v2009_v23 = vmul.f32 0.01, %v1943_v4  ;;  %v1954_v54 = vadd.f32 %v3772_v30, %v5707_v58 }
 0x290   : > { %v1945_v31 = vpop.f32.mrf.mxu1 }
 0x291   : > { %2051 = vst [vmem:[#allocation2 + $0x40] sm:$0xff] %v2031_v19  ;;  %v2029_v10 = vmax.f32 %v1943_v4, %v2009_v23  ;;  %v2012_v3 = vmul.f32 0.01, %v1954_v54  ;;  %v1946_v25 = vadd.f32 %v5707_v58, %v1945_v31 }
 0x293   : > { %2049 = vst [vmem:[#allocation2 + $0x60] sm:$0xff] %v2029_v10  ;;  %v2032_v14 = vmax.f32 %v1954_v54, %v2012_v3  ;;  %v2010_v27 = vmul.f32 0.01, %v1946_v25 }
 0x295   : > { %2052 = vst [vmem:[#allocation2 + $0x78] sm:$0xff] %v2032_v14  ;;  %v2030_v50 = vmax.f32 %v1946_v25, %v2010_v27 }
 0x297   : > { %2050 = vst [vmem:[#allocation2 + $0x28] sm:$0xff] %v2030_v50 }
 0x2a1   : > { %v3775_v8 = vpop.f32.mrf.mxu1 }
 0x2a2   : > { %v1967_v53 = vadd.f32 %v3775_v8, %v5707_v58 }
 0x2a3   : > { %v1958_v28 = vpop.f32.mrf.mxu1 }
 0x2a4   : > { %v2015_v9 = vmul.f32 0.01, %v1967_v53  ;;  %v1959_v48 = vadd.f32 %v5707_v58, %v1958_v28 }
 0x2a5   : > { %v3776_v0 = vpop.f32.mrf.mxu1 }
 0x2a6   : > { %v2035_v41 = vmax.f32 %v1967_v53, %v2015_v9  ;;  %v2013_v43 = vmul.f32 0.01, %v1959_v48  ;;  %v1970_v29 = vadd.f32 %v3776_v0, %v5707_v58 }
 0x2a7   : > { %v1961_v7 = vpop.f32.mrf.mxu1 }
 0x2a8   : > { %2055 = vst [vmem:[#allocation2 + $0x18] sm:$0xff] %v2035_v41  ;;  %v2033_v17 = vmax.f32 %v1959_v48, %v2013_v43  ;;  %v2016_v12 = vmul.f32 0.01, %v1970_v29  ;;  %v1962_v62 = vadd.f32 %v5707_v58, %v1961_v7 }
 0x2aa   : > { %2053 = vst [vmem:[#allocation2 + $0x88] sm:$0xff] %v2033_v17  ;;  %v2036_v61 = vmax.f32 %v1970_v29, %v2016_v12  ;;  %v2014_v46 = vmul.f32 0.01, %v1962_v62 }
 0x2ac   : > { %2056 = vst [vmem:[#allocation2 + $0x98] sm:$0xff] %v2036_v61  ;;  %v2034_v13 = vmax.f32 %v1962_v62, %v2014_v46 }
 0x2ae   : > { %2054 = vst [vmem:[#allocation2 + $0x90] sm:$0xff] %v2034_v13 }
 0x2b7   : > { %v3779_v15 = vpop.f32.mrf.mxu1 }
 0x2b8   : > { %v1983_v26 = vadd.f32 %v3779_v15, %v5707_v58 }
 0x2b9   : > { %v1974_v60 = vpop.f32.mrf.mxu1 }
 0x2ba   : > { %v2019_v45 = vmul.f32 0.01, %v1983_v26  ;;  %v1975_v51 = vadd.f32 %v5707_v58, %v1974_v60 }
 0x2bb   : > { %v3780_v34 = vpop.f32.mrf.mxu1 }
 0x2bc   : > { %v2039_v11 = vmax.f32 %v1983_v26, %v2019_v45  ;;  %v2017_v36 = vmul.f32 0.01, %v1975_v51  ;;  %v1986_v59 = vadd.f32 %v3780_v34, %v5707_v58 }
 0x2bd   : > { %v1977_v42 = vpop.f32.mrf.mxu1 }
 0x2be   : > { %2059 = vst [vmem:[#allocation2 + $0x70] sm:$0xff] %v2039_v11  ;;  %v2037_v22 = vmax.f32 %v1975_v51, %v2017_v36  ;;  %v2020_v18 = vmul.f32 0.01, %v1986_v59  ;;  %v1978_v32 = vadd.f32 %v5707_v58, %v1977_v42 }
 0x2c0   : > { %2057 = vst [vmem:[#allocation2 + $0x38] sm:$0xff] %v2037_v22  ;;  %v2040_v21 = vmax.f32 %v1986_v59, %v2020_v18  ;;  %v2018_v37 = vmul.f32 0.01, %v1978_v32 }
 0x2c2   : > { %2060 = vst [vmem:[#allocation2 + $0xa0] sm:$0xff] %v2040_v21  ;;  %v2038_v2 = vmax.f32 %v1978_v32, %v2018_v37 }
 0x2c4   : > { %2058 = vst [vmem:[#allocation2 + $0x50] sm:$0xff] %v2038_v2 }
 0x2cd   : > { %v3783_v38 = vpop.f32.mrf.mxu1 }
 0x2ce   : > { %v1999_v56 = vadd.f32 %v3783_v38, %v5707_v58 }
 0x2cf   : > { %v1990_v39 = vpop.f32.mrf.mxu1 }
 0x2d0   : > { %v2023_v44 = vmul.f32 0.01, %v1999_v56  ;;  %v1991_v35 = vadd.f32 %v5707_v58, %v1990_v39 }
 0x2d1   : > { %v3784_v49 = vpop.f32.mrf.mxu1 }
 0x2d2   : > { %v2043_v63 = vmax.f32 %v1999_v56, %v2023_v44  ;;  %v2021_v20 = vmul.f32 0.01, %v1991_v35  ;;  %v2002_v16 = vadd.f32 %v3784_v49, %v5707_v58 }
 0x2d3   : > { %v1993_v52 = vpop.f32.mrf.mxu1 }
 0x2d4   : > { %2063 = vst [vmem:[#allocation2 + $0x30] sm:$0xff] %v2043_v63  ;;  %v2041_v47 = vmax.f32 %v1991_v35, %v2021_v20  ;;  %v2024_v24 = vmul.f32 0.01, %v2002_v16  ;;  %v1994_v57 = vadd.f32 %v5707_v58, %v1993_v52 }
 0x2d6   : > { %2061 = vst [vmem:[#allocation2 + $0xa8] sm:$0xff] %v2041_v47  ;;  %v2044_v40 = vmax.f32 %v2002_v16, %v2024_v24  ;;  %v2022_v33 = vmul.f32 0.01, %v1994_v57  ;;  %2067 = sbr.rel (%p3283_p11) target bundleno = 733 (0x2dd), region = 60 }
 0x2d8   : > { %2064 = vst [vmem:[#allocation2 + $0x58] sm:$0xff] %v2044_v40  ;;  %v2042_v1 = vmax.f32 %v1994_v57, %v2022_v33 }
 0x2da   : > { %2062 = vst [vmem:[#allocation2 + $0x68] sm:$0xff] %v2042_v1 }
 0x2db   : > { %v2069_v55 = vld [vmem:[#allocation2 + $0x10] sm:$0xff]  ;;  %v2070_v4 = vld [vmem:[#allocation2 + $0x48] sm:$0xff] }
 0x2dc   : > { %2071 = vst [vmem:[#allocation2 + $0xb0] sm:$0xff] %v2069_v55  ;;  %2072 = vst [vmem:[#allocation2] sm:$0xff] %v2070_v4 }
 0x2dd PF: > { %2075 = sbr.rel (%p3284_p12) target bundleno = 741 (0x2e5), region = 64 }
 0x2e2   : > { %v2077_v30 = vld [vmem:[#allocation2 + $0xa8] sm:$0xff] }
 0x2e3   : > { %v2078_v19 = vld [vmem:[#allocation2 + $0x68] sm:$0xff]  ;;  %2080 = vst [vmem:[#allocation2 + $0x30] sm:$0xff] %v2077_v30 }
 0x2e4   : > { %2081 = vst [vmem:[#allocation2 + $0x58] sm:$0xff] %v2078_v19 }
 0x2e5 PF: > { %v2083_v58 = vld [vmem:[#allocation2 + $0x10] sm:$0xff]  ;;  %v2084_v23 = vld [vmem:[#allocation2 + $0x48] sm:$0xff]  ;;  %v5735_v3 = vld [vmem:[#allocation2 + $0xa0] sm:$0xff]  ;;  %s3479_s20 = sshll.u32 (%p4006_p5), %s3900_s26, 4  ;;  %s3411_s15 = sshll.u32 (%p4006_p5), %s3904_s27, 7 }
 0x2e6   : > { %v5733_v54 = vld [vmem:[#allocation2 + $0x68] sm:$0xff]  ;;  %v2099_v31 = vld [vmem:[#allocation2 + $0xb0] sm:$0xff]  ;;  %v2100_v10 = vld [vmem:[#allocation2] sm:$0xff]  ;;  %v5737_v25 = vmul.f32 0.75, %v2083_v58  ;;  %v5739_v14 = vmul.f32 0.75, %v2084_v23  ;;  %v5745_v53 = vmul.f32 0.25, %v5735_v3  ;;  %s2897_s12 = sadd.s32 (%p4006_p5), %s3479_s20, %s3411_s15 }
 0x2e7   : > { %6538 = vst [vmem:[#allocation4_spill] sm:$0xff] %v5733_v54  ;;  %v5742_v27 = vmul.f32 0.75, %v5733_v54  ;;  %v2148_v50 = vmul.f32 0.25, %v2099_v31  ;;  %v2149_v8 = vmul.f32 0.25, %v2100_v10  ;;  %v2085_v28 = vld [vmem:[#allocation2 + $0x60] sm:$0xff]  ;;  %v2086_v9 = vld [vmem:[#allocation2 + $0x28] sm:$0xff] }
 0x2e8   : > { %6539 = vst [vmem:[#allocation5_spill] sm:$0xff] %v5745_v53  ;;  %v2150_v48 = vmul.f32 0.25, %v2083_v58  ;;  %v5747_v0 = vmul.f32 0.75, %v2085_v28  ;;  %v5749_v41 = vmul.f32 0.75, %v2086_v9  ;;  %v2151_v43 = vmul.f32 0.25, %v2084_v23  ;;  %v2087_v29 = vld [vmem:[#allocation2 + $0x40] sm:$0xff] }
 0x2e9   : > { %v2088_v7 = vld [vmem:[#allocation2 + $0x78] sm:$0xff]  ;;  %v5751_v17 = vmul.f32 0.25, %v2085_v28  ;;  %v5754_v12 = vadd.f32 %v2148_v50, %v5737_v25  ;;  %v5757_v62 = vadd.f32 %v2149_v8, %v5739_v14  ;;  %v5761_v61 = vadd.f32 %v5745_v53, %v5742_v27  ;;  %v2089_v20 = vld [vmem:[#allocation2 + $0x88] sm:$0xff]  ;;  %v2090_v16 = vld [vmem:[#allocation2 + $0x90] sm:$0xff]  ;;  %s3412_s17 = sshll.u32 (%p4006_p5), %s2897_s12, 2 }
 0x2ea   : > { %v5763_v46 = vmul.f32 0.75, %v2087_v29  ;;  %v5766_v13 = vadd.f32 %v2150_v48, %v5747_v0  ;;  %v5769_v15 = vadd.f32 %v2151_v43, %v5749_v41  ;;  %v5771_v26 = vmul.f32 0.75, %v2088_v7  ;;  %v2091_v23 = vld [vmem:[#allocation2 + $0x18] sm:$0xff]  ;;  %v5927_v54 = vld [vmem:[#allocation2 + $0xa8] sm:$0xff]  ;;  %s6433_s21 = scalar_lea.vmem (%p4006_p5), %s6518_s7, %s3412_s17 }
 0x2eb   : > { %v5773_v60 = vmul.f32 0.25, %v2086_v9  ;;  %v2212_v45 = vrot.slane %v5754_v12, 7  ;;  %v2213_v51 = vrot.slane %v5757_v62, 7  ;;  %v6519_v34 = vrot.slane %v5761_v61, 7  ;;  %v2092_v31 = vld [vmem:[#allocation2 + $0x98] sm:$0xff]  ;;  %6551 = vst [vmem:[#allocation17_spill] sm:$0xff] %v5927_v54 }
 0x2ec   : > { %v5779_v11 = vmul.f32 0.75, %v5754_v12  ;;  %v5782_v36 = vmul.f32 0.75, %v5757_v62  ;;  %v2214_v59 = vrot.slane %v5766_v13, 7  ;;  %v2215_v42 = vrot.slane %v5769_v15, 7 }
 0x2ed   : > { %v5787_v22 = vmul.f32 0.75, %v5766_v13  ;;  %v2242_v18 = vsel %vm371_vm2, %v2212_v45, %v2213_v51  ;;  %v2243_v32 = vsel %vm371_vm2, %v6519_v34, %v2212_v45  ;;  %v5796_v21 = vmul.f32 0.75, %v5769_v15 }
 0x2ee   : > { %v5800_v37 = vadd.f32 %v5751_v17, %v5763_v46  ;;  %v2276_v2 = vsel %vm308_vm0, %v5754_v12, %v2243_v32  ;;  %v2325_v38 = vmul.f32 0.25, %v2242_v18  ;;  %v2240_v56 = vsel %vm371_vm2, %v2214_v59, %v2215_v42 }
 0x2ef   : > { %v2241_v39 = vsel %vm371_vm2, %v2213_v51, %v2214_v59  ;;  %v2324_v44 = vmul.f32 0.25, %v2276_v2  ;;  %v2327_v49 = vmul.f32 0.25, %v2240_v56  ;;  %v5814_v63 = vadd.f32 %v5773_v60, %v5771_v26  ;;  %v2093_v51 = vld [vmem:[#allocation2 + $0x38] sm:$0xff]  ;;  %v2094_v56 = vld [vmem:[#allocation2 + $0x50] sm:$0xff] }
 0x2f0   : > { %v2278_v35 = vsel %vm308_vm0, %v5766_v13, %v2241_v39  ;;  %v2341_v52 = vadd.f32 %v2325_v38, %v5782_v36  ;;  %v2216_v24 = vrot.slane %v5800_v37, 7  ;;  %v5819_v57 = vmul.f32 0.75, %v5800_v37 }
 0x2f1   : > { %v2326_v47 = vmul.f32 0.25, %v2278_v35  ;;  %v2340_v40 = vadd.f32 %v2324_v44, %v5779_v11  ;;  %v2343_v33 = vadd.f32 %v2327_v49, %v5796_v21  ;;  %v2217_v1 = vrot.slane %v5814_v63, 7 }
 0x2f2   : > { %v5825_v55 = vmul.f32 0.75, %v5814_v63  ;;  %v2239_v30 = vsel %vm371_vm2, %v2215_v42, %v2216_v24  ;;  %v5830_v19 = vmul.f32 0.75, %v2089_v20  ;;  %v5832_v58 = vmul.f32 0.75, %v2090_v16 }
 0x2f3   : > { %v2342_v4 = vadd.f32 %v2326_v47, %v5787_v22  ;;  %v3483_v10 = vpack.c.bf16 %v2341_v52, %v2340_v40  ;;  %v2238_v50 = vsel %vm371_vm2, %v2216_v24, %v2217_v1  ;;  %v2280_v8 = vsel %vm308_vm0, %v5800_v37, %v2239_v30  ;;  %v2095_v30 = vld [vmem:[#allocation2 + $0x70] sm:$0xff] }
 0x2f4   : > { %6540 = vst [vmem:[#allocation6_spill] sm:$0xff] %v5830_v19  ;;  %6541 = vst [vmem:[#allocation7_spill] sm:$0xff] %v5832_v58  ;;  %v5839_v28 = vmul.f32 0.25, %v2087_v29  ;;  %v2328_v48 = vmul.f32 0.25, %v2280_v8  ;;  %v2329_v43 = vmul.f32 0.25, %v2238_v50  ;;  %v5841_v45 = vmul.f32 0.25, %v2088_v7 }
 0x2f5   : > { %v3488_v9 = vpack.c.bf16 %v2343_v33, %v2342_v4  ;;  %3484 = vst [vmem:[%s4963_s14] sm:$0xff] %v3483_v10   ;;  %v5848_v42 = vmul.f32 0.75, %v2091_v23  ;;  %v5850_v18 = vmul.f32 0.75, %v2092_v31  ;;  %v5852_v32 = vmul.f32 0.25, %v2089_v20 }
 0x2f6   : > { %v5846_v59 = vadd.f32 %v5839_v28, %v5830_v19  ;;  %v2344_v29 = vadd.f32 %v2328_v48, %v5819_v57  ;;  %v2345_v2 = vadd.f32 %v2329_v43, %v5825_v55  ;;  %v5859_v7 = vadd.f32 %v5841_v45, %v5832_v58 }
 0x2f7   : > { %6542 = vst [vmem:[#allocation8_spill] sm:$0xff] %v5848_v42  ;;  %6543 = vst [vmem:[#allocation9_spill] sm:$0xff] %v5850_v18  ;;  %v5861_v38 = vmul.f32 0.25, %v2090_v16  ;;  %v5869_v35 = vadd.f32 %v5852_v32, %v5848_v42  ;;  %v5871_v49 = vmul.f32 0.75, %v2093_v51  ;;  %v5887_v4 = vmul.f32 0.75, %v2094_v56 }
 0x2f8   : > { %3640 = vst [vmem:[%s4963_s14 + $0x8] sm:$0xff] %v3488_v9   ;;  %v2218_v39 = vrot.slane %v5846_v59, 7  ;;  %v5865_v44 = vmul.f32 0.75, %v5846_v59  ;;  %v3493_v20 = vpack.c.bf16 %v2345_v2, %v2344_v29  ;;  %v2219_v52 = vrot.slane %v5859_v7, 7 }
 0x2f9   : > { %6544 = vst [vmem:[#allocation10_spill] sm:$0xff] %v5871_v49  ;;  %v5875_v47 = vmul.f32 0.75, %v5859_v7  ;;  %v5879_v16 = vadd.f32 %v5861_v38, %v5850_v18  ;;  %v2220_v40 = vrot.slane %v5869_v35, 7  ;;  %v5885_v33 = vmul.f32 0.75, %v5869_v35  ;;  %6545 = vst [vmem:[#allocation11_spill] sm:$0xff] %v5887_v4 }
 0x2fa   : > { %v2237_v24 = vsel %vm371_vm2, %v2217_v1, %v2218_v39  ;;  %3641 = vst [vmem:[%s4963_s14 + $0x10] sm:$0xff] %v3493_v20   ;;  %v2236_v10 = vsel %vm371_vm2, %v2218_v39, %v2219_v52  ;;  %v5901_v29 = vmul.f32 0.25, %v2091_v23  ;;  %v5908_v20 = vmul.f32 0.25, %v2092_v31 }
 0x2fb   : > { %v2282_v50 = vsel %vm308_vm0, %v5846_v59, %v2237_v24  ;;  %v2221_v8 = vrot.slane %v5879_v16, 7  ;;  %v5897_v1 = vmul.f32 0.75, %v5879_v16  ;;  %v2331_v48 = vmul.f32 0.25, %v2236_v10 }
 0x2fc   : > { %v2330_v9 = vmul.f32 0.25, %v2282_v50  ;;  %v2235_v43 = vsel %vm371_vm2, %v2219_v52, %v2220_v40  ;;  %6546 = vst [vmem:[#allocation12_spill] sm:$0xff] %v5901_v29  ;;  %6547 = vst [vmem:[#allocation13_spill] sm:$0xff] %v5908_v20  ;;  %v5910_v24 = vmul.f32 0.75, %v2095_v30  ;;  %v5916_v23 = vadd.f32 %v5901_v29, %v5871_v49  ;;  %v2916_v6 = vld [vmem:[%s4963_s14] sm:$0xff] (%p4006_p5)  }
 0x2fd   : > { %v2234_v2 = vsel %vm371_vm2, %v2220_v40, %v2221_v8  ;;  %v2284_v39 = vsel %vm308_vm0, %v5869_v35, %v2235_v43  ;;  %v2347_v10 = vadd.f32 %v2331_v48, %v5875_v47  ;;  %v5920_v40 = vadd.f32 %v5908_v20, %v5887_v4  ;;  %2917 = vst [vmem:[%s6433_s21] sm:$0xff] (%p4006_p5), %v2916_v6  }
 0x2fe   : > { %6548 = vst [vmem:[#allocation14_spill] sm:$0xff] %v5910_v24  ;;  %v2346_v34 = vadd.f32 %v2330_v9, %v5865_v44  ;;  %v2332_v50 = vmul.f32 0.25, %v2284_v39  ;;  %v2333_v52 = vmul.f32 0.25, %v2234_v2  ;;  %v5923_v31 = vmul.f32 0.75, %v5735_v3 }
 0x2ff   : > { %v5925_v43 = vmul.f32 0.25, %v2093_v51  ;;  %v5931_v39 = vmul.f32 0.25, %v2094_v56  ;;  %v2222_v53 = vrot.slane %v5916_v23, 7  ;;  %v2223_v4 = vrot.slane %v5920_v40, 7 }
 0x300   : > { %6549 = vst [vmem:[#allocation15_spill] sm:$0xff] %v5923_v31  ;;  %v3498_v9 = vpack.c.bf16 %v2347_v10, %v2346_v34  ;;  %v2348_v48 = vadd.f32 %v2332_v50, %v5885_v33  ;;  %v2349_v2 = vadd.f32 %v2333_v52, %v5897_v1  ;;  %v5936_v49 = vmul.f32 0.75, %v5916_v23 }
 0x301   : > { %6550 = vst [vmem:[#allocation16_spill] sm:$0xff] %v5925_v43  ;;  %6552 = vst [vmem:[#allocation18_spill] sm:$0xff] %v5931_v39  ;;  %v5939_v3 = vmul.f32 0.75, %v5920_v40  ;;  %v5944_v34 = vadd.f32 %v5925_v43, %v5910_v24  ;;  %v5948_v56 = vadd.f32 %v5931_v39, %v5923_v31  ;;  %v5951_v10 = vmul.f32 0.75, %v5927_v54 }
 0x302   : > { %3642 = vst [vmem:[%s4963_s14 + $0x18] sm:$0xff] %v3498_v9   ;;  %v3503_v51 = vpack.c.bf16 %v2349_v2, %v2348_v48  ;;  %v2232_v50 = vsel %vm371_vm2, %v2222_v53, %v2223_v4  ;;  %v2233_v52 = vsel %vm371_vm2, %v2221_v8, %v2222_v53  ;;  %v5957_v18 = vmul.f32 0.25, %v2095_v30 }
 0x303   : > { %6553 = vst [vmem:[#allocation19_spill] sm:$0xff] %v5951_v10  ;;  %v5960_v9 = vmul.f32 0.75, %v5761_v61  ;;  %v2286_v48 = vsel %vm308_vm0, %v5916_v23, %v2233_v52  ;;  %v2335_v2 = vmul.f32 0.25, %v2232_v50  ;;  %v2224_v31 = vrot.slane %v5944_v34, 7 }
 0x304   : > { %6554 = vst [vmem:[#allocation20_spill] sm:$0xff] %v5957_v18  ;;  %3643 = vst [vmem:[%s4963_s14 + $0x20] sm:$0xff] %v3503_v51   ;;  %v2225_v24 = vrot.slane %v5948_v56, 7  ;;  %v2334_v54 = vmul.f32 0.25, %v2286_v48  ;;  %v5969_v39 = vmul.f32 0.75, %v5944_v34  ;;  %v5972_v53 = vmul.f32 0.75, %v5948_v56 }
 0x305   : > { %v5976_v30 = vadd.f32 %v5957_v18, %v5951_v10  ;;  %v2351_v8 = vadd.f32 %v2335_v2, %v5939_v3  ;;  %v2231_v50 = vsel %vm371_vm2, %v2223_v4, %v2224_v31  ;;  %v2245_v20 = vrot.slane %v5757_v62, 1 }
 0x306   : > { %v2230_v51 = vsel %vm371_vm2, %v2224_v31, %v2225_v24  ;;  %v2350_v48 = vadd.f32 %v2334_v54, %v5936_v49  ;;  %v2288_v43 = vsel %vm308_vm0, %v5944_v34, %v2231_v50  ;;  %v2246_v4 = vrot.slane %v5766_v13, 1 }
 0x307   : > { %v2337_v42 = vmul.f32 0.25, %v2230_v51  ;;  %v2226_v10 = vrot.slane %v5976_v30, 7  ;;  %v2336_v18 = vmul.f32 0.25, %v2288_v43  ;;  %v5990_v2 = vmul.f32 0.75, %v5976_v30 }
 0x308   : > { %v3508_v31 = vpack.c.bf16 %v2351_v8, %v2350_v48  ;;  %v6555_v54 = vrot.slane %v5761_v61, 7  ;;  %v2273_v13 = vsel %vm428_vm3, %v2245_v20, %v2246_v4  ;;  %v6556_v8 = vrot.slane %v5754_v12, 1 }
 0x309   : > { %v2353_v52 = vadd.f32 %v2337_v42, %v5972_v53  ;;  %v2229_v51 = vsel %vm371_vm2, %v2225_v24, %v2226_v10  ;;  %v2352_v43 = vadd.f32 %v2336_v18, %v5969_v39  ;;  %v2293_v18 = vsel %vm311_vm1, %v5757_v62, %v2273_v13 }
 0x30a   : > { %v2228_v58 = vsel %vm371_vm2, %v2226_v10, %v6555_v54  ;;  %v2290_v50 = vsel %vm308_vm0, %v5976_v30, %v2229_v51  ;;  %3644 = vst [vmem:[%s4963_s14 + $0x28] sm:$0xff] %v3508_v31   ;;  %v2274_v48 = vsel %vm428_vm3, %v6556_v8, %v2245_v20  ;;  %v2247_v24 = vrot.slane %v5769_v15, 1 }
 0x30b   : > { %v2339_v29 = vmul.f32 0.25, %v2228_v58  ;;  %v2338_v42 = vmul.f32 0.25, %v2290_v50  ;;  %v3513_v10 = vpack.c.bf16 %v2353_v52, %v2352_v43  ;;  %v2436_v58 = vmul.f32 0.25, %v2274_v48 }
 0x30c   : > { %v2437_v51 = vmul.f32 0.25, %v2293_v18  ;;  %v2248_v31 = vrot.slane %v5800_v37, 1  ;;  %v2272_v50 = vsel %vm428_vm3, %v2246_v4, %v2247_v24  ;;  %v2249_v20 = vrot.slane %v5814_v63, 1 }
 0x30d   : > { %v2355_v54 = vadd.f32 %v2339_v29, %v5960_v9  ;;  %v2354_v19 = vadd.f32 %v2338_v42, %v5990_v2  ;;  %3645 = vst [vmem:[%s4963_s14 + $0x30] sm:$0xff] %v3513_v10   ;;  %v2452_v62 = vadd.f32 %v2436_v58, %v5779_v11  ;;  %v2438_v52 = vmul.f32 0.25, %v2272_v50 }
 0x30e   : > { %v2453_v13 = vadd.f32 %v2437_v51, %v5782_v36  ;;  %v2250_v29 = vrot.slane %v5846_v59, 1  ;;  %v2271_v42 = vsel %vm428_vm3, %v2247_v24, %v2248_v31  ;;  %v2270_v37 = vsel %vm428_vm3, %v2248_v31, %v2249_v20 }
 0x30f   : > { %v3518_v43 = vpack.c.bf16 %v2355_v54, %v2354_v19  ;;  %v2251_v4 = vrot.slane %v5859_v7, 1  ;;  %v2295_v11 = vsel %vm311_vm1, %v5769_v15, %v2271_v42  ;;  %v2454_v36 = vadd.f32 %v2438_v52, %v5787_v22 }
 0x310   : > { %v3523_v8 = vpack.c.bf16 %v2453_v13, %v2452_v62  ;;  %v2269_v48 = vsel %vm428_vm3, %v2249_v20, %v2250_v29  ;;  %v2439_v19 = vmul.f32 0.25, %v2295_v11  ;;  %v2440_v18 = vmul.f32 0.25, %v2270_v37 }
 0x311   : > { %3646 = vst [vmem:[%s4963_s14 + $0x38] sm:$0xff] %v3518_v43   ;;  %v2297_v59 = vsel %vm311_vm1, %v5814_v63, %v2269_v48  ;;  %v2252_v24 = vrot.slane %v5869_v35, 1  ;;  %v2268_v54 = vsel %vm428_vm3, %v2250_v29, %v2251_v4  ;;  %v2253_v15 = vrot.slane %v5879_v16, 1 }
 0x312   : > { %3647 = vst [vmem:[%s4963_s14 + $0x40] sm:$0xff] %v3523_v8   ;;  %v2441_v10 = vmul.f32 0.25, %v2297_v59  ;;  %v2254_v22 = vrot.slane %v5916_v23, 1  ;;  %v2455_v58 = vadd.f32 %v2439_v19, %v5796_v21  ;;  %v2456_v51 = vadd.f32 %v2440_v18, %v5819_v57 }
 0x313   : > { %v2267_v63 = vsel %vm428_vm3, %v2251_v4, %v2252_v24  ;;  %v2442_v31 = vmul.f32 0.25, %v2268_v54  ;;  %v2266_v21 = vsel %vm428_vm3, %v2252_v24, %v2253_v15  ;;  %v2256_v42 = vrot.slane %v5944_v34, 1 }
 0x314   : > { %v2457_v35 = vadd.f32 %v2441_v10, %v5825_v55  ;;  %v2299_v50 = vsel %vm311_vm1, %v5859_v7, %v2267_v63  ;;  %v2265_v20 = vsel %vm428_vm3, %v2253_v15, %v2254_v22  ;;  %v3528_v23 = vpack.c.bf16 %v2455_v58, %v2454_v36 }
 0x315   : > { %v2443_v62 = vmul.f32 0.25, %v2299_v50  ;;  %v2458_v57 = vadd.f32 %v2442_v31, %v5865_v44  ;;  %v2301_v13 = vsel %vm311_vm1, %v5879_v16, %v2265_v20  ;;  %v2444_v52 = vmul.f32 0.25, %v2266_v21 }
 0x316   : > { %v3533_v55 = vpack.c.bf16 %v2457_v35, %v2456_v51  ;;  %v2445_v29 = vmul.f32 0.25, %v2301_v13  ;;  %v2255_v7 = vrot.slane %v5920_v40, 1  ;;  %3648 = vst [vmem:[%s4963_s14 + $0x48] sm:$0xff] %v3528_v23   ;;  %v2257_v37 = vrot.slane %v5948_v56, 1 }
 0x317   : > { %v2459_v43 = vadd.f32 %v2443_v62, %v5875_v47  ;;  %v2258_v4 = vrot.slane %v5976_v30, 1  ;;  %v2460_v44 = vadd.f32 %v2444_v52, %v5885_v33  ;;  %v2259_v11 = vrot.slane %v5761_v61, 1  ;;  %v2131_v30 = vld [vmem:[#allocation2 + $0x58] sm:$0xff] }
 0x318   : > { %3649 = vst [vmem:[%s4963_s14 + $0x50] sm:$0xff] %v3533_v55   ;;  %v2461_v16 = vadd.f32 %v2445_v29, %v5897_v1  ;;  %v2264_v8 = vsel %vm428_vm3, %v2254_v22, %v2255_v7  ;;  %v2263_v47 = vsel %vm428_vm3, %v2255_v7, %v2256_v42  ;;  %v2262_v1 = vsel %vm428_vm3, %v2256_v42, %v2257_v37 }
 0x319   : > { %v3538_v36 = vpack.c.bf16 %v2459_v43, %v2458_v57  ;;  %v2446_v34 = vmul.f32 0.25, %v2264_v8  ;;  %v2261_v48 = vsel %vm428_vm3, %v2257_v37, %v2258_v4  ;;  %v2303_v33 = vsel %vm311_vm1, %v5920_v40, %v2263_v47 }
 0x31a   : > { %v3543_v19 = vpack.c.bf16 %v2461_v16, %v2460_v44  ;;  %v2305_v59 = vsel %vm311_vm1, %v5948_v56, %v2261_v48  ;;  %v2447_v18 = vmul.f32 0.25, %v2303_v33  ;;  %v2448_v10 = vmul.f32 0.25, %v2262_v1  ;;  %v6558_v33 = vld [vmem:[#allocation6_spill] sm:$0xff]  ;;  %v6559_v1 = vld [vmem:[#allocation12_spill] sm:$0xff] }
 0x31b   : > { %3650 = vst [vmem:[%s4963_s14 + $0x58] sm:$0xff] %v3538_v36   ;;  %v2462_v24 = vadd.f32 %v2446_v34, %v5936_v49  ;;  %v2449_v54 = vmul.f32 0.25, %v2305_v59  ;;  %v2260_v15 = vsel %vm428_vm3, %v2258_v4, %v2259_v11  ;;  %v6557_v22 = vrot.slane %v5754_v12, 1 }
 0x31c   : > { %3651 = vst [vmem:[%s4963_s14 + $0x60] sm:$0xff] %v3543_v19   ;;  %v2195_v58 = vmul.f32 0.25, %v2131_v30  ;;  %v6098_v51 = vadd.f32 %v5751_v17, %v5737_v25  ;;  %v2463_v56 = vadd.f32 %v2447_v18, %v5939_v3  ;;  %v2464_v49 = vadd.f32 %v2448_v10, %v5969_v39  ;;  %v6560_v18 = vld [vmem:[#allocation7_spill] sm:$0xff] }
 0x31d   : > { %v2275_v40 = vsel %vm428_vm3, %v2259_v11, %v6557_v22  ;;  %v2465_v63 = vadd.f32 %v2449_v54, %v5972_v53  ;;  %v2450_v31 = vmul.f32 0.25, %v2260_v15  ;;  %v6108_v50 = vadd.f32 %v5773_v60, %v5739_v14  ;;  %v6562_v15 = vld [vmem:[#allocation8_spill] sm:$0xff] }
 0x31e   : > { %v2307_v12 = vsel %vm311_vm1, %v5761_v61, %v2275_v40  ;;  %v6111_v25 = vadd.f32 %v2195_v58, %v5742_v27  ;;  %v3548_v17 = vpack.c.bf16 %v2463_v56, %v2462_v24  ;;  %v2549_v39 = vrot.slane %v6098_v51, 7  ;;  %v6561_v24 = vld [vmem:[#allocation13_spill] sm:$0xff]  ;;  %v6563_v22 = vld [vmem:[#allocation16_spill] sm:$0xff]  ;;  %v6565_v56 = vld [vmem:[#allocation18_spill] sm:$0xff] }
 0x31f   : > { %v2451_v35 = vmul.f32 0.25, %v2307_v12  ;;  %v3553_v3 = vpack.c.bf16 %v2465_v63, %v2464_v49  ;;  %v6115_v20 = vmul.f32 0.75, %v6098_v51  ;;  %v2466_v53 = vadd.f32 %v2450_v31, %v5990_v2  ;;  %v6564_v58 = vld [vmem:[#allocation9_spill] sm:$0xff]  ;;  %v6566_v63 = vld [vmem:[#allocation10_spill] sm:$0xff]  ;;  %v6567_v12 = vld [vmem:[#allocation20_spill] sm:$0xff] }
 0x320   : > { %v2550_v21 = vrot.slane %v6108_v50, 7  ;;  %v2564_v14 = vrot.slane %v6111_v25, 7  ;;  %3652 = vst [vmem:[%s4963_s14 + $0x68] sm:$0xff] %v3548_v17   ;;  %v6124_v27 = vmul.f32 0.75, %v6108_v50  ;;  %v6128_v60 = vadd.f32 %v5839_v28, %v5747_v0 }
 0x321   : > { %v2467_v61 = vadd.f32 %v2451_v35, %v5960_v9  ;;  %3653 = vst [vmem:[%s4963_s14 + $0x70] sm:$0xff] %v3553_v3   ;;  %v6132_v23 = vadd.f32 %v5841_v45, %v5749_v41  ;;  %v6136_v9 = vadd.f32 %v5852_v32, %v5763_v46  ;;  %v6146_v0 = vadd.f32 %v5861_v38, %v5771_v26 }
 0x322   : > { %v2579_v62 = vsel %vm371_vm2, %v2549_v39, %v2550_v21  ;;  %v2580_v57 = vsel %vm371_vm2, %v2564_v14, %v2549_v39  ;;  %v2551_v46 = vrot.slane %v6128_v60, 7  ;;  %v6155_v13 = vmul.f32 0.75, %v6128_v60 }
 0x323   : > { %v3558_v2 = vpack.c.bf16 %v2467_v61, %v2466_v53  ;;  %v2613_v41 = vsel %vm308_vm0, %v6098_v51, %v2580_v57  ;;  %v2662_v28 = vmul.f32 0.25, %v2579_v62  ;;  %v2552_v45 = vrot.slane %v6132_v23, 7 }
 0x324   : > { %v2661_v32 = vmul.f32 0.25, %v2613_v41  ;;  %v6158_v55 = vmul.f32 0.75, %v6132_v23  ;;  %v2553_v26 = vrot.slane %v6136_v9, 7  ;;  %v2578_v29 = vsel %vm371_vm2, %v2550_v21, %v2551_v46 }
 0x325   : > { %3654 = vst [vmem:[%s4963_s14 + $0x78] sm:$0xff] %v3558_v2   ;;  %v2678_v38 = vadd.f32 %v2662_v28, %v6124_v27  ;;  %v2577_v52 = vsel %vm371_vm2, %v2551_v46, %v2552_v45  ;;  %v2554_v7 = vrot.slane %v6146_v0, 7  ;;  %v2615_v42 = vsel %vm308_vm0, %v6128_v60, %v2578_v29 }
 0x326   : > { %v2677_v43 = vadd.f32 %v2661_v32, %v6115_v20  ;;  %v2664_v37 = vmul.f32 0.25, %v2577_v52  ;;  %v2576_v4 = vsel %vm371_vm2, %v2552_v45, %v2553_v26  ;;  %v2663_v44 = vmul.f32 0.25, %v2615_v42 }
 0x327   : > { %v2575_v16 = vsel %vm371_vm2, %v2553_v26, %v2554_v7  ;;  %v2617_v8 = vsel %vm308_vm0, %v6136_v9, %v2576_v4  ;;  %v6179_v11 = vmul.f32 0.75, %v6136_v9  ;;  %v6183_v34 = vmul.f32 0.75, %v6146_v0  ;;  %v6569_v4 = vld [vmem:[#allocation5_spill] sm:$0xff] }
 0x328   : > { %v3563_v36 = vpack.c.bf16 %v2678_v38, %v2677_v43  ;;  %v2680_v47 = vadd.f32 %v2664_v37, %v6158_v55  ;;  %v2665_v48 = vmul.f32 0.25, %v2617_v8  ;;  %v2679_v30 = vadd.f32 %v2663_v44, %v6155_v13  ;;  %v6568_v37 = vld [vmem:[#allocation11_spill] sm:$0xff] }
 0x329   : > { %v2666_v19 = vmul.f32 0.25, %v2575_v16  ;;  %v6188_v59 = vadd.f32 %v6559_v1, %v6558_v33  ;;  %v6192_v10 = vadd.f32 %v6561_v24, %v6560_v18  ;;  %v6198_v40 = vadd.f32 %v6563_v22, %v6562_v15  ;;  %v6571_v22 = vld [vmem:[#allocation4_spill] sm:$0xff] }
 0x32a   : > { %3655 = vst [vmem:[%s4963_s14 + $0x80] sm:$0xff] %v3563_v36   ;;  %v2681_v54 = vadd.f32 %v2665_v48, %v6179_v11  ;;  %v6202_v49 = vadd.f32 %v6565_v56, %v6564_v58  ;;  %v6206_v31 = vadd.f32 %v6567_v12, %v6566_v63  ;;  %v3568_v35 = vpack.c.bf16 %v2680_v47, %v2679_v30  ;;  %v6570_v48 = vld [vmem:[#allocation17_spill] sm:$0xff]  ;;  %v6572_v56 = vld [vmem:[#allocation14_spill] sm:$0xff] }
 0x32b   : > { %v2682_v17 = vadd.f32 %v2666_v19, %v6183_v34  ;;  %v2555_v3 = vrot.slane %v6188_v59, 7  ;;  %v2556_v39 = vrot.slane %v6192_v10, 7  ;;  %v6212_v53 = vmul.f32 0.75, %v6188_v59  ;;  %v2130_v19 = vld [vmem:[#allocation2 + $0x30] sm:$0xff] }
 0x32c   : > { %v6215_v61 = vmul.f32 0.75, %v6192_v10  ;;  %v2557_v21 = vrot.slane %v6198_v40, 7  ;;  %v2558_v2 = vrot.slane %v6202_v49, 7  ;;  %3656 = vst [vmem:[%s4963_s14 + $0x88] sm:$0xff] %v3568_v35   ;;  %v6225_v28 = vmul.f32 0.75, %v6198_v40 }
 0x32d   : > { %v3573_v62 = vpack.c.bf16 %v2682_v17, %v2681_v54  ;;  %v2573_v57 = vsel %vm371_vm2, %v2555_v3, %v2556_v39  ;;  %v2574_v41 = vsel %vm371_vm2, %v2554_v7, %v2555_v3  ;;  %v6239_v29 = vmul.f32 0.75, %v6202_v49 }
 0x32e   : > { %v2619_v46 = vsel %vm308_vm0, %v6188_v59, %v2574_v41  ;;  %v2668_v45 = vmul.f32 0.25, %v2573_v57  ;;  %v2571_v32 = vsel %vm371_vm2, %v2557_v21, %v2558_v2  ;;  %v2572_v26 = vsel %vm371_vm2, %v2556_v39, %v2557_v21  ;;  %v6573_v21 = vld [vmem:[#allocation15_spill] sm:$0xff] }
 0x32f   : > { %3657 = vst [vmem:[%s4963_s14 + $0x90] sm:$0xff] %v3573_v62   ;;  %v2667_v38 = vmul.f32 0.25, %v2619_v46  ;;  %v2621_v52 = vsel %vm308_vm0, %v6198_v40, %v2572_v26  ;;  %v2670_v7 = vmul.f32 0.25, %v2571_v32  ;;  %v6244_v44 = vadd.f32 %v6569_v4, %v6568_v37  ;;  %v6574_v46 = vld [vmem:[#allocation19_spill] sm:$0xff] }
 0x330   : > { %v2684_v43 = vadd.f32 %v2668_v45, %v6215_v61  ;;  %v2669_v42 = vmul.f32 0.25, %v2621_v52  ;;  %v2559_v16 = vrot.slane %v6206_v31, 7  ;;  %v6250_v47 = vmul.f32 0.75, %v6206_v31 }
 0x331   : > { %v2683_v8 = vadd.f32 %v2667_v38, %v6212_v53  ;;  %v2686_v36 = vadd.f32 %v2670_v7, %v6239_v29  ;;  %v2192_v30 = vmul.f32 0.25, %v6570_v48  ;;  %v2560_v1 = vrot.slane %v6244_v44, 7 }
 0x332   : > { %v2685_v33 = vadd.f32 %v2669_v42, %v6225_v28  ;;  %v2570_v18 = vsel %vm371_vm2, %v2558_v2, %v2559_v16  ;;  %v6258_v24 = vmul.f32 0.75, %v6244_v44  ;;  %v2193_v58 = vmul.f32 0.25, %v6571_v22 }
 0x333   : > { %v3578_v54 = vpack.c.bf16 %v2684_v43, %v2683_v8  ;;  %v2623_v15 = vsel %vm308_vm0, %v6206_v31, %v2570_v18  ;;  %v6265_v63 = vadd.f32 %v2192_v30, %v6572_v56  ;;  %v2569_v35 = vsel %vm371_vm2, %v2559_v16, %v2560_v1 }
 0x334   : > { %v3583_v12 = vpack.c.bf16 %v2686_v36, %v2685_v33  ;;  %v2671_v17 = vmul.f32 0.25, %v2623_v15  ;;  %v2194_v3 = vmul.f32 0.25, %v2130_v19  ;;  %v2672_v39 = vmul.f32 0.25, %v2569_v35 }
 0x335   : > { %3658 = vst [vmem:[%s4963_s14 + $0x98] sm:$0xff] %v3578_v54   ;;  %v6271_v2 = vadd.f32 %v2193_v58, %v6573_v21  ;;  %v2561_v62 = vrot.slane %v6265_v63, 7  ;;  %v6275_v57 = vmul.f32 0.75, %v6265_v63  ;;  %v6283_v32 = vmul.f32 0.75, %v6111_v25 }
 0x336   : > { %3659 = vst [vmem:[%s4963_s14 + $0xa0] sm:$0xff] %v3583_v12   ;;  %v2687_v41 = vadd.f32 %v2671_v17, %v6250_v47  ;;  %v6280_v45 = vadd.f32 %v2194_v3, %v6574_v46  ;;  %v2581_v26 = vrot.slane %v6098_v51, 1  ;;  %v2688_v38 = vadd.f32 %v2672_v39, %v6258_v24 }
 0x337   : > { %v2562_v52 = vrot.slane %v6271_v2, 7  ;;  %v2568_v7 = vsel %vm371_vm2, %v2560_v1, %v2561_v62  ;;  %v6291_v43 = vmul.f32 0.75, %v6271_v2  ;;  %v2582_v16 = vrot.slane %v6108_v50, 1 }
 0x338   : > { %v2625_v42 = vsel %vm308_vm0, %v6265_v63, %v2568_v7  ;;  %v2563_v37 = vrot.slane %v6280_v45, 7  ;;  %v6298_v4 = vmul.f32 0.75, %v6280_v45  ;;  %v3588_v8 = vpack.c.bf16 %v2688_v38, %v2687_v41 }
 0x339   : > { %v2567_v36 = vsel %vm371_vm2, %v2561_v62, %v2562_v52  ;;  %v2673_v48 = vmul.f32 0.25, %v2625_v42  ;;  %v2583_v30 = vrot.slane %v6128_v60, 1  ;;  %v2611_v18 = vsel %vm428_vm3, %v2581_v26, %v2582_v16 }
 0x33a   : > { %v2674_v19 = vmul.f32 0.25, %v2567_v36  ;;  %v2565_v33 = vsel %vm371_vm2, %v2563_v37, %v2564_v14  ;;  %v2566_v1 = vsel %vm371_vm2, %v2562_v52, %v2563_v37  ;;  %3660 = vst [vmem:[%s4963_s14 + $0xa8] sm:$0xff] %v3588_v8   ;;  %v2774_v12 = vmul.f32 0.25, %v2611_v18 }
 0x33b   : > { %v2689_v54 = vadd.f32 %v2673_v48, %v6275_v57  ;;  %v2627_v60 = vsel %vm308_vm0, %v6280_v45, %v2566_v1  ;;  %v2676_v15 = vmul.f32 0.25, %v2565_v33  ;;  %v2610_v22 = vsel %vm428_vm3, %v2582_v16, %v2583_v30 }
 0x33c   : > { %v2690_v14 = vadd.f32 %v2674_v19, %v6291_v43  ;;  %v2675_v58 = vmul.f32 0.25, %v2627_v60  ;;  %v2630_v56 = vsel %vm311_vm1, %v6108_v50, %v2610_v22  ;;  %v2584_v3 = vrot.slane %v6132_v23, 1 }
 0x33d   : > { %v2692_v35 = vadd.f32 %v2676_v15, %v6283_v32  ;;  %v2775_v17 = vmul.f32 0.25, %v2630_v56  ;;  %v2585_v39 = vrot.slane %v6136_v9, 1  ;;  %v2790_v41 = vadd.f32 %v2774_v12, %v6115_v20 }
 0x33e   : > { %v3593_v21 = vpack.c.bf16 %v2690_v14, %v2689_v54  ;;  %v2691_v62 = vadd.f32 %v2675_v58, %v6298_v4  ;;  %v2586_v46 = vrot.slane %v6146_v0, 1  ;;  %v2609_v52 = vsel %vm428_vm3, %v2583_v30, %v2584_v3 }
 0x33f   : > { %v2791_v38 = vadd.f32 %v2775_v17, %v6124_v27  ;;  %v2608_v50 = vsel %vm428_vm3, %v2584_v3, %v2585_v39  ;;  %v2587_v7 = vrot.slane %v6188_v59, 1  ;;  %v2776_v20 = vmul.f32 0.25, %v2609_v52 }
 0x340   : > { %3661 = vst [vmem:[%s4963_s14 + $0xb0] sm:$0xff] %v3593_v21   ;;  %v3598_v9 = vpack.c.bf16 %v2692_v35, %v2691_v62  ;;  %v2632_v42 = vsel %vm311_vm1, %v6132_v23, %v2608_v50  ;;  %v2607_v37 = vsel %vm428_vm3, %v2585_v39, %v2586_v46  ;;  %v2588_v30 = vrot.slane %v6192_v10, 1 }
 0x341   : > { %v3603_v27 = vpack.c.bf16 %v2791_v38, %v2790_v41  ;;  %v2777_v16 = vmul.f32 0.25, %v2632_v42  ;;  %v2606_v8 = vsel %vm428_vm3, %v2586_v46, %v2587_v7  ;;  %v2778_v36 = vmul.f32 0.25, %v2607_v37 }
 0x342   : > { %3662 = vst [vmem:[%s4963_s14 + $0xb8] sm:$0xff] %v3598_v9   ;;  %v2792_v48 = vadd.f32 %v2776_v20, %v6155_v13  ;;  %v2634_v59 = vsel %vm311_vm1, %v6146_v0, %v2606_v8  ;;  %v2589_v23 = vrot.slane %v6198_v40, 1  ;;  %v2590_v18 = vrot.slane %v6202_v49, 1 }
 0x343   : > { %3663 = vst [vmem:[%s4963_s14 + $0xc0] sm:$0xff] %v3603_v27   ;;  %v2793_v19 = vadd.f32 %v2777_v16, %v6158_v55  ;;  %v2779_v33 = vmul.f32 0.25, %v2634_v59  ;;  %v2794_v1 = vadd.f32 %v2778_v36, %v6179_v11  ;;  %v2605_v54 = vsel %vm428_vm3, %v2587_v7, %v2588_v30  ;;  %v2940_v36 = vld [vmem:[%s4963_s14 + $0x30] sm:$0xff] (%p4006_p5)   ;;  %v2948_v59 = vld [vmem:[%s4963_s14 + $0x40] sm:$0xff] (%p4006_p5)  }
 0x344   : > { %v2604_v13 = vsel %vm428_vm3, %v2588_v30, %v2589_v23  ;;  %v2591_v0 = vrot.slane %v6206_v31, 1  ;;  %v2592_v60 = vrot.slane %v6244_v44, 1  ;;  %v2780_v11 = vmul.f32 0.25, %v2605_v54  ;;  %v2952_v30 = vld [vmem:[%s4963_s14 + $0x48] sm:$0xff] (%p4006_p5)   ;;  %2941 = vst [vmem:[%s6433_s21 + $0x30] sm:$0xff] (%p4006_p5), %v2940_v36   ;;  %2949 = vst [vmem:[%s6433_s21 + $0x80] sm:$0xff] (%p4006_p5), %v2948_v59  }
 0x345   : > { %v3608_v40 = vpack.c.bf16 %v2793_v19, %v2792_v48  ;;  %v2795_v15 = vadd.f32 %v2779_v33, %v6183_v34  ;;  %v2636_v55 = vsel %vm311_vm1, %v6192_v10, %v2604_v13  ;;  %v2603_v58 = vsel %vm428_vm3, %v2589_v23, %v2590_v18  ;;  %v2944_v48 = vld [vmem:[%s4963_s14 + $0x38] sm:$0xff] (%p4006_p5)   ;;  %v2956_v23 = vld [vmem:[%s4963_s14 + $0x50] sm:$0xff] (%p4006_p5)   ;;  %2953 = vst [vmem:[%s6433_s21 + $0x88] sm:$0xff] (%p4006_p5), %v2952_v30   ;;  %v2964_v33 = vld [vmem:[%s4963_s14 + $0x60] sm:$0xff] (%p4006_p5)  }
 0x346   : > { %v2781_v22 = vmul.f32 0.25, %v2636_v55  ;;  %v2602_v14 = vsel %vm428_vm3, %v2590_v18, %v2591_v0  ;;  %v2593_v31 = vrot.slane %v6265_v63, 1  ;;  %v2796_v12 = vadd.f32 %v2780_v11, %v6212_v53  ;;  %v2960_v19 = vld [vmem:[%s4963_s14 + $0x58] sm:$0xff] (%p4006_p5)   ;;  %2945 = vst [vmem:[%s6433_s21 + $0x38] sm:$0xff] (%p4006_p5), %v2944_v48   ;;  %2957 = vst [vmem:[%s6433_s21 + $0x90] sm:$0xff] (%p4006_p5), %v2956_v23   ;;  %v2972_v18 = vld [vmem:[%s4963_s14 + $0x70] sm:$0xff] (%p4006_p5)  }
 0x347   : > { %3664 = vst [vmem:[%s4963_s14 + $0xc8] sm:$0xff] %v3608_v40   ;;  %v3613_v56 = vpack.c.bf16 %v2795_v15, %v2794_v1  ;;  %v2638_v34 = vsel %vm311_vm1, %v6202_v49, %v2602_v14  ;;  %v2782_v35 = vmul.f32 0.25, %v2603_v58  ;;  %v2601_v39 = vsel %vm428_vm3, %v2591_v0, %v2592_v60  ;;  %2961 = vst [vmem:[%s6433_s21 + $0x98] sm:$0xff] (%p4006_p5), %v2960_v19   ;;  %v2968_v1 = vld [vmem:[%s4963_s14 + $0x68] sm:$0xff] (%p4006_p5)   ;;  %v2976_v13 = vld [vmem:[%s4963_s14 + $0x78] sm:$0xff] (%p4006_p5)  }
 0x348   : > { %v2797_v10 = vadd.f32 %v2781_v22, %v6215_v61  ;;  %v2783_v17 = vmul.f32 0.25, %v2638_v34  ;;  %v2600_v3 = vsel %vm428_vm3, %v2592_v60, %v2593_v31  ;;  %v2784_v21 = vmul.f32 0.25, %v2601_v39  ;;  %2965 = vst [vmem:[%s6433_s21 + $0xa0] sm:$0xff] (%p4006_p5), %v2964_v33   ;;  %2969 = vst [vmem:[%s6433_s21 + $0xa8] sm:$0xff] (%p4006_p5), %v2968_v1   ;;  %v2980_v54 = vld [vmem:[%s4963_s14 + $0x80] sm:$0xff] (%p4006_p5)   ;;  %v2984_v0 = vld [vmem:[%s4963_s14 + $0x88] sm:$0xff] (%p4006_p5)  }
 0x349   : > { %3665 = vst [vmem:[%s4963_s14 + $0xd0] sm:$0xff] %v3613_v56   ;;  %v2798_v63 = vadd.f32 %v2782_v35, %v6225_v28  ;;  %v2640_v53 = vsel %vm311_vm1, %v6244_v44, %v2600_v3  ;;  %v2594_v49 = vrot.slane %v6271_v2, 1  ;;  %v2595_v46 = vrot.slane %v6280_v45, 1  ;;  %2973 = vst [vmem:[%s6433_s21 + $0xb0] sm:$0xff] (%p4006_p5), %v2972_v18   ;;  %v2988_v60 = vld [vmem:[%s4963_s14 + $0x90] sm:$0xff] (%p4006_p5)   ;;  %v2992_v40 = vld [vmem:[%s4963_s14 + $0x98] sm:$0xff] (%p4006_p5)  }
 0x34a   : > { %v3618_v61 = vpack.c.bf16 %v2797_v10, %v2796_v12  ;;  %v2799_v62 = vadd.f32 %v2783_v17, %v6239_v29  ;;  %v2785_v41 = vmul.f32 0.25, %v2640_v53  ;;  %v2800_v38 = vadd.f32 %v2784_v21, %v6250_v47  ;;  %2977 = vst [vmem:[%s6433_s21 + $0xb8] sm:$0xff] (%p4006_p5), %v2976_v13   ;;  %2981 = vst [vmem:[%s6433_s21 + $0x100] sm:$0xff] (%p4006_p5), %v2980_v54   ;;  %v2996_v15 = vld [vmem:[%s4963_s14 + $0xa0] sm:$0xff] (%p4006_p5)   ;;  %v3000_v55 = vld [vmem:[%s4963_s14 + $0xa8] sm:$0xff] (%p4006_p5)  }
 0x34b   : > { %v2599_v50 = vsel %vm428_vm3, %v2593_v31, %v2594_v49  ;;  %v2596_v28 = vrot.slane %v6111_v25, 1  ;;  %v2598_v7 = vsel %vm428_vm3, %v2594_v49, %v2595_v46  ;;  %2985 = vst [vmem:[%s6433_s21 + $0x108] sm:$0xff] (%p4006_p5), %v2984_v0   ;;  %2989 = vst [vmem:[%s6433_s21 + $0x110] sm:$0xff] (%p4006_p5), %v2988_v60   ;;  %v3004_v11 = vld [vmem:[%s4963_s14 + $0xb0] sm:$0xff] (%p4006_p5)   ;;  %v3008_v22 = vld [vmem:[%s4963_s14 + $0xb8] sm:$0xff] (%p4006_p5)  }
 0x34c   : > { %3666 = vst [vmem:[%s4963_s14 + $0xd8] sm:$0xff] %v3618_v61   ;;  %v3623_v44 = vpack.c.bf16 %v2799_v62, %v2798_v63  ;;  %v2801_v52 = vadd.f32 %v2785_v41, %v6258_v24  ;;  %v2786_v9 = vmul.f32 0.25, %v2599_v50  ;;  %v2642_v29 = vsel %vm311_vm1, %v6271_v2, %v2598_v7  ;;  %2993 = vst [vmem:[%s6433_s21 + $0x118] sm:$0xff] (%p4006_p5), %v2992_v40   ;;  %v3012_v14 = vld [vmem:[%s4963_s14 + $0xc0] sm:$0xff] (%p4006_p5)  }
 0x34d   : > { %v2597_v47 = vsel %vm428_vm3, %v2595_v46, %v2596_v28  ;;  %v2612_v45 = vsel %vm428_vm3, %v2596_v28, %v2581_v26  ;;  %v2787_v42 = vmul.f32 0.25, %v2642_v29  ;;  %2997 = vst [vmem:[%s6433_s21 + $0x120] sm:$0xff] (%p4006_p5), %v2996_v15   ;;  %3001 = vst [vmem:[%s6433_s21 + $0x128] sm:$0xff] (%p4006_p5), %v3000_v55  }
 0x34e   : > { %3667 = vst [vmem:[%s4963_s14 + $0xe0] sm:$0xff] %v3623_v44   ;;  %v3628_v24 = vpack.c.bf16 %v2801_v52, %v2800_v38  ;;  %v2802_v20 = vadd.f32 %v2786_v9, %v6275_v57  ;;  %v2644_v37 = vsel %vm311_vm1, %v6111_v25, %v2612_v45  ;;  %v2788_v2 = vmul.f32 0.25, %v2597_v47  ;;  %v2920_v25 = vld [vmem:[%s4963_s14 + $0x8] sm:$0xff] (%p4006_p5)   ;;  %v2924_v57 = vld [vmem:[%s4963_s14 + $0x10] sm:$0xff] (%p4006_p5)   ;;  %3005 = vst [vmem:[%s6433_s21 + $0x130] sm:$0xff] (%p4006_p5), %v3004_v11  }
 0x34f   : > { %v2789_v27 = vmul.f32 0.25, %v2644_v37  ;;  %v2803_v16 = vadd.f32 %v2787_v42, %v6291_v43  ;;  %v2932_v43 = vld [vmem:[%s4963_s14 + $0x20] sm:$0xff] (%p4006_p5)   ;;  %2921 = vst [vmem:[%s6433_s21 + $0x8] sm:$0xff] (%p4006_p5), %v2920_v25   ;;  %2925 = vst [vmem:[%s6433_s21 + $0x10] sm:$0xff] (%p4006_p5), %v2924_v57   ;;  %v3016_v58 = vld [vmem:[%s4963_s14 + $0xc8] sm:$0xff] (%p4006_p5)  }
 0x350   : > { %3668 = vst [vmem:[%s4963_s14 + $0xe8] sm:$0xff] %v3628_v24   ;;  %v2804_v51 = vadd.f32 %v2788_v2, %v6298_v4  ;;  %v2936_v4 = vld [vmem:[%s4963_s14 + $0x28] sm:$0xff] (%p4006_p5)   ;;  %2933 = vst [vmem:[%s6433_s21 + $0x20] sm:$0xff] (%p4006_p5), %v2932_v43   ;;  %v3020_v31 = vld [vmem:[%s4963_s14 + $0xd0] sm:$0xff] (%p4006_p5)  }
 0x351   : > { %v2805_v5 = vadd.f32 %v2789_v27, %v6283_v32  ;;  %v3633_v8 = vpack.c.bf16 %v2803_v16, %v2802_v20  ;;  %2893 = sbr.rel (!%p4006_p5) target bundleno = 862 (0x35e), region = 68  ;;  %v2928_v32 = vld [vmem:[%s4963_s14 + $0x18] sm:$0xff] (%p4006_p5)   ;;  %2937 = vst [vmem:[%s6433_s21 + $0x28] sm:$0xff] (%p4006_p5), %v2936_v4   ;;  %3009 = vst [vmem:[%s6433_s21 + $0x138] sm:$0xff] (%p4006_p5), %v3008_v22  }
 0x352   : > { %2929 = vst [vmem:[%s6433_s21 + $0x18] sm:$0xff] (%p4006_p5), %v2928_v32   ;;  %3013 = vst [vmem:[%s6433_s21 + $0x180] sm:$0xff] (%p4006_p5), %v3012_v14  }
 0x353   : > { %v3638_v26 = vpack.c.bf16 %v2805_v5, %v2804_v51  ;;  %3669 = vst [vmem:[%s4963_s14 + $0xf0] sm:$0xff] %v3633_v8   ;;  %3017 = vst [vmem:[%s6433_s21 + $0x188] sm:$0xff] (%p4006_p5), %v3016_v58   ;;  %v3024_v56 = vld [vmem:[%s4963_s14 + $0xd8] sm:$0xff] (%p4006_p5)  }
 0x354   : > { %3021 = vst [vmem:[%s6433_s21 + $0x190] sm:$0xff] (%p4006_p5), %v3020_v31   ;;  %3025 = vst [vmem:[%s6433_s21 + $0x198] sm:$0xff] (%p4006_p5), %v3024_v56  }
 0x355   : > { %3670 = vst [vmem:[%s4963_s14 + $0xf8] sm:$0xff] %v3638_v26   ;;  %v3028_v12 = vld [vmem:[%s4963_s14 + $0xe0] sm:$0xff] (%p4006_p5)  }
 0x356   : > { %3029 = vst [vmem:[%s6433_s21 + $0x1a0] sm:$0xff] %v3028_v12  }
 0x357   : > { %v3032_v34 = vld [vmem:[%s4963_s14 + $0xe8] sm:$0xff]  }
 0x358   : > { %3033 = vst [vmem:[%s6433_s21 + $0x1a8] sm:$0xff] %v3032_v34  }
 0x35a   : > { %v3036_v35 = vld [vmem:[%s4963_s14 + $0xf0] sm:$0xff]  }
 0x35b   : > { %3037 = vst [vmem:[%s6433_s21 + $0x1b0] sm:$0xff] %v3036_v35  }
 0x35c   : > { %v3040_v10 = vld [vmem:[%s4963_s14 + $0xf8] sm:$0xff]  }
 0x35d   : > { %3041 = vst [vmem:[%s6433_s21 + $0x1b8] sm:$0xff] %v3040_v10  }
 0x35e PF: > { %s17_s30 = sadd.s32 1, %s3916_s30   ;;  %s6575_s24 = smov %s3896_s25 }
 0x35f   : > { %p14_p13 = scmp.ge.s32.totalorder %s17_s30, 6   ;;  %s6576_s25 = smov %s4017_s16 }
 0x360   : > { %s6577_s26 = smov %s3908_s28  ;;  %s6578_s27 = smov %s3912_s29 }
 0x361   : > { %s6579_s28 = smov %s6582_s8  ;;  %s6580_s29 = smov %s6586_s9 }
 0x362   :  { %16 = sbr.rel (!%p14_p13) target bundleno = 4 (0x4), region = 144 }

</bundles_post_ra>
